<compile_context>
chip_gen: v7x
topology: tpu7x:2x2x1
jax: 0.10.0
libtpu: 0.0.40
codegen_flags: <defaults>
</compile_context>

<pallas_src>
import functools

import numpy as np
import jax
import jax.numpy as jnp
from jax import lax
from jax.experimental import pallas as pl
from jax.experimental.pallas import tpu as pltpu

# ----------------------------- hyper-parameters -----------------------------
K = 5              # conv kernel size ("_stride" in the torch code)
POOL = 2
C1 = 6             # conv1 out channels
C2 = 16            # conv2 out channels (_outputlayers)
WIN = 20           # sliding-window size   (torch: 100)
STEP = 10          # sliding-window step   (torch: 50)
IMG = 40           # IMG_X == IMG_Y
BATCH = 2
F1, F2 = 120, 84   # fc1 / fc2 widths


def _calc(v):
    return (v - (K - 1)) / POOL


CONST = int(_calc(_calc(WIN)) * _calc(_calc(WIN)) * C2)   # fc1 input features

HC1 = WIN - K + 1          # conv1 output size per crop        (16)
HP1 = HC1 // POOL          # pooled conv1 size per crop        (8)
HC2 = HP1 - K + 1          # conv2 output size per crop        (4)
HP2 = HC2 // POOL          # pooled conv2 size per crop        (2)
assert CONST == HP2 * HP2 * C2

P1F = (IMG - K + 1) // POOL        # pooled conv1 size, full image    (18)
LANE1 = C1 * P1F                   # used lanes of the pooled map     (108)
LANEP = 128                        # lane-padded width
RPI = 24                           # rows per image, pooled map (>=18, mult 8)
NR2 = 16                           # rows per image, conv2 map  (>=14, mult 8)
SC2 = P1F - K + 1                  # conv2 output rows/cols, full img (14)
SPL = SC2 - 1                      # lane-pooled columns              (13)
K2B = K * LANEP                    # banded conv2 contraction         (640)
N2 = SC2 * C2                      # conv2 GEMM output lanes          (224)
NPL = SPL * C2                     # lanes after the lane pool        (208)

CROP_OFFS = list(range(0, IMG - WIN + 1, STEP))           # [0, 10, 20]
# conv1+pool1 is shared across overlapping crops; exact because every crop
# offset is pool aligned (also true for the torch constants: 50 % 2 == 0).
assert all(o % POOL == 0 for o in CROP_OFFS)
X0S = [o // POOL for o in CROP_OFFS]                      # pooled crop offsets
NC = len(X0S)                                             # crops per axis (3)
NCROPS = NC * NC                                          # 9
PSTEP = STEP // POOL                                      # 5
assert X0S == [PSTEP * i for i in range(NC)]
assert max(X0S) + HP1 <= P1F

NF1B = NC * F1                     # cy-blocked fc1 width             (360)
NF2B = NC * F2                     # cy-blocked fc2 width             (252)


# ------------------------ static (numpy) index tables ------------------------
def _w2_band_tables():
    """conv2 as a lane convolution: banded (640, 224) weight gather table."""
    idx = np.zeros((K2B, SC2), np.int32)
    msk = np.zeros((K2B, SC2), np.float32)
    for kh in range(K):
        for sp in range(P1F):
            for c in range(C1):
                r = kh * LANEP + sp * C1 + c
                for s in range(SC2):
                    kw = sp - s
                    if 0 <= kw < K:
                        idx[r, s] = (kh * K + kw) * C1 + c
                        msk[r, s] = 1.0
    return idx, msk


def _fc1_band_tables(i):
    """fc1 in map layout: (208, 3*120) gather table for pool-row offset i."""
    idx = np.zeros((NPL, NC), np.int32)
    msk = np.zeros((NPL, NC), np.float32)
    for s in range(SPL):
        for c2 in range(C2):
            r = s * C2 + c2
            for cy in range(NC):
                d = s - PSTEP * cy
                if 0 <= d and d % POOL == 0 and d // POOL < HP2:
                    j = d // POOL
                    # torch x.view(-1, CONST) flatten order: (c2, i, j)
                    idx[r, cy] = c2 * HP2 * HP2 + i * HP2 + j
                    msk[r, cy] = 1.0
    return idx, msk


_W2_IDX, _W2_MSK = _w2_band_tables()
_F1_TABLES = [_fc1_band_tables(i) for i in range(HP2)]


# ------------------------------- Pallas kernel -------------------------------
def _net_kernel(img_ref, w1_ref, b1_ref, w2_ref, b2_ref,
                wf1a_ref, wf1b_ref, bf1_ref, wf2_ref, bf2_ref,
                wf3_ref, bf3_ref, out_ref, *, nimg):
    """Whole forward pass (all images, all crops), VMEM resident.

    img_ref : (6, 6, nimg*24, 128) pool-phase/shift-split image planes:
              img_ref[a, b, img*24 + i, sp*6 + c] == image[img, 2i+a, 2sp+b].
    w1_ref  : (25, 128) conv1 weights, lane-tiled over the 18 pooled columns.
    b1_ref  : (1, 128)  conv1 bias, lane-tiled.
    w2_ref  : (640, 224) banded conv2 weights (lane-convolution GEMM).
    b2_ref  : (1, 208)  conv2 bias tiled over the 13 lane-pooled columns.
    wf1a/b  : (208, 360) fc1 weights in map layout (crop-y blocks on lanes),
              for pool-row offsets i=0 / i=1.
    wf2_ref : (360, 252) block-diagonal fc2 weights, bf*_ref matching biases.
    wf3_ref : (252, 3)   block-diagonal fc3 weight columns, bf3_ref (1,1).
    out_ref : (nimg*3, 3) rows = (image, crop_x), lanes = crop_y.
    """
    # ---- stage 1: conv1 (shifted VPU FMAs) + 2x2 max-pool + bias + ReLU -----
    w1 = w1_ref[...]                                   # read once
    wrow = [w1[k:k + 1, :] for k in range(K * K)]      # hoisted weight rows
    br = nimg * RPI
    acc = [[jnp.zeros((br, LANEP), jnp.float32) for _ in range(POOL)]
           for _ in range(POOL)]
    for a in range(K + POOL - 1):                      # a = du + kh
        for b in range(K + POOL - 1):                  # b = dv + kw
            pln = img_ref[a, b]                        # aligned full-plane load
            for du in range(POOL):
                kh = a - du
                if not 0 <= kh < K:
                    continue
                for dv in range(POOL):
                    kw = b - dv
                    if not 0 <= kw < K:
                        continue
                    acc[du][dv] = acc[du][dv] + pln * wrow[kh * K + kw]
    pooled = jnp.maximum(jnp.maximum(acc[0][0], acc[0][1]),
                         jnp.maximum(acc[1][0], acc[1][1]))
    # bias / ReLU hoisted after the pool (bias shared, ReLU monotone)
    p1 = jnp.maximum(pooled + b1_ref[...], 0.0)        # (nimg*24, 128)

    # ---- stage 2: conv2 as ONE lane-banded MXU GEMM --------------------------
    # LHS row (img*16 + r) = concat_kh p1[img*24 + r + kh, :]; lane-concat
    # offsets are multiples of 128, row blocks of 16 are 8-aligned.
    pieces = []
    for kh in range(K):
        pieces.append(jnp.concatenate(
            [p1[i * RPI + kh: i * RPI + kh + NR2, :] for i in range(nimg)],
            axis=0))                                   # (nimg*16, 128)
    lhs = jnp.concatenate(pieces, axis=1)              # (nimg*16, 640)
    conv2 = jnp.dot(lhs, w2_ref[...],
                    preferred_element_type=jnp.float32)    # (nimg*16, 224)

    # ---- 2x2 max-pool (lane pairs, then row pairs) + bias + ReLU (hoisted) ---
    op = jnp.maximum(conv2[:, :NPL], conv2[:, C2:C2 + NPL])   # (nimg*16, 208)
    opp = jnp.maximum(op[:-1, :], op[1:, :])                  # (nimg*16-1, 208)
    a2 = jnp.maximum(opp + b2_ref[...], 0.0)

    # ---- MLP head in map layout: crop-y stays on lanes, crop-x on rows -------
    g0 = jnp.dot(a2, wf1a_ref[...], preferred_element_type=jnp.float32)
    g1 = jnp.dot(a2, wf1b_ref[...], preferred_element_type=jnp.float32)
    h1 = jnp.maximum(g0[:-POOL, :] + g1[POOL:, :] + bf1_ref[...], 0.0)
    h2 = jnp.maximum(jnp.dot(h1, wf2_ref[...],
                             preferred_element_type=jnp.float32)
                     + bf2_ref[...], 0.0)
    s = (jnp.dot(h2, wf3_ref[...], preferred_element_type=jnp.float32)
         + bf3_ref[...])                                      # (rows, 3)

    # ---- gather per-crop scores: row 16*img + 5*cx holds the 3 cy scores -----
    out_ref[...] = jnp.concatenate(
        [s[i * NR2 + PSTEP * cx: i * NR2 + PSTEP * cx + 1, :]
         for i in range(nimg) for cx in range(NC)], axis=0)   # (nimg*3, 3)


# --------------------------------- JAX glue ----------------------------------
def _make_planes(images):
    """(B, 40, 40) -> (6, 6, B*24, 128) shift planes, channel-tiled, padded."""
    bsz = images.shape[0]
    planes = []
    for a in range(K + POOL - 1):
        row = []
        for b in range(K + POOL - 1):
            p = images[:, a:a + 2 * P1F:2, b:b + 2 * P1F:2]      # (B, 18, 18)
            p = jnp.repeat(p[..., None], C1, axis=-1)            # (B, 18, 18, 6)
            p = p.reshape(bsz, P1F, LANE1)
            p = jnp.pad(p, ((0, 0), (0, RPI - P1F), (0, LANEP - LANE1)))
            row.append(p.reshape(bsz * RPI, LANEP))
        planes.append(jnp.stack(row, axis=0))
    return jnp.stack(planes, axis=0)                             # (6,6,B*24,128)


def net_forward(images, params):
    (w1, b1, w2, b2, fw1, fb1, fw2, fb2, fw3, fb3) = params
    bsz = images.shape[0]

    # Host-side prep: constant-size relayouts only (no crops, no im2col).
    ph = _make_planes(images)

    w1t = jnp.tile(w1.reshape(C1, K * K).T, (1, P1F))            # (25, 108)
    w1t = jnp.pad(w1t, ((0, 0), (0, LANEP - LANE1)))             # (25, 128)
    b1t = jnp.pad(jnp.tile(b1, (P1F,)), (0, LANEP - LANE1)).reshape(1, LANEP)

    w2r = jnp.transpose(w2, (2, 3, 1, 0)).reshape(K * K * C1, C2)    # (150, 16)
    w2band = (jnp.take(w2r, _W2_IDX, axis=0)
              * _W2_MSK[:, :, None]).reshape(K2B, N2)            # (640, 224)
    b2t = jnp.tile(b2, (SPL,)).reshape(1, NPL)                   # (1, 208)

    fw1T = fw1.T                                                 # (64, 120)
    wf1_banded = []
    for i in range(HP2):
        idx, msk = _F1_TABLES[i]
        wf1_banded.append((jnp.take(fw1T, idx, axis=0)
                           * msk[:, :, None]).reshape(NPL, NF1B))   # (208, 360)
    bf1t = jnp.tile(fb1, (NC,)).reshape(1, NF1B)

    eye = jnp.eye(NC, dtype=jnp.float32)
    wf2b = jnp.kron(eye, fw2.T)                                  # (360, 252)
    bf2t = jnp.tile(fb2, (NC,)).reshape(1, NF2B)
    wf3b = jnp.kron(eye, fw3.reshape(F2, 1))                     # (252, 3)
    bf3t = fb3.reshape(1, 1)

    kernel = functools.partial(_net_kernel, nimg=bsz)
    out = pl.pallas_call(
        kernel,
        out_shape=jax.ShapeDtypeStruct((bsz * NC, NC), jnp.float32),
        grid=(1,),                                    # batch folded: one step
        in_specs=[
            pl.BlockSpec((K + POOL - 1, K + POOL - 1, bsz * RPI, LANEP),
                         lambda g: (0, 0, 0, 0)),
            pl.BlockSpec((K * K, LANEP), lambda g: (0, 0)),
            pl.BlockSpec((1, LANEP), lambda g: (0, 0)),
            pl.BlockSpec((K2B, N2), lambda g: (0, 0)),
            pl.BlockSpec((1, NPL), lambda g: (0, 0)),
            pl.BlockSpec((NPL, NF1B), lambda g: (0, 0)),
            pl.BlockSpec((NPL, NF1B), lambda g: (0, 0)),
            pl.BlockSpec((1, NF1B), lambda g: (0, 0)),
            pl.BlockSpec((NF1B, NF2B), lambda g: (0, 0)),
            pl.BlockSpec((1, NF2B), lambda g: (0, 0)),
            pl.BlockSpec((NF2B, NC), lambda g: (0, 0)),
            pl.BlockSpec((1, 1), lambda g: (0, 0)),
        ],
        out_specs=pl.BlockSpec((bsz * NC, NC), lambda g: (0, 0)),
        compiler_params=pltpu.CompilerParams(
            dimension_semantics=("arbitrary",)),
    )(ph, w1t, b1t, w2band, b2t, wf1_banded[0], wf1_banded[1], bf1t,
      wf2b, bf2t, wf3b, bf3t)

    # rows = (image, crop_x), lanes = crop_y  ->  torch crop order (x outer)
    return out.reshape(bsz, NCROPS, 1, 1)


# ------------------------- pure-JAX reference (check) ------------------------
def reference_forward(images, params):
    (w1, b1, w2, b2, fw1, fb1, fw2, fb2, fw3, fb3) = params
    dn = ('NCHW', 'OIHW', 'NCHW')
    hi = lax.Precision.HIGHEST
    b, h, w = images.shape
    per_image = []
    for bi in range(b):
        scores = []
        for x0 in range(0, h - WIN + 1, STEP):
            for y0 in range(0, w - WIN + 1, STEP):
                x = images[bi, x0:x0 + WIN, y0:y0 + WIN][None, None]
                x = lax.conv_general_dilated(x, w1, (1, 1), 'VALID',
                                             dimension_numbers=dn, precision=hi)
                x = jnp.maximum(x + b1[None, :, None, None], 0.0)
                x = lax.reduce_window(x, -jnp.inf, lax.max,
                                      (1, 1, POOL, POOL), (1, 1, POOL, POOL),
                                      'VALID')
                x = lax.conv_general_dilated(x, w2, (1, 1), 'VALID',
                                             dimension_numbers=dn, precision=hi)
                x = jnp.maximum(x + b2[None, :, None, None], 0.0)
                x = lax.reduce_window(x, -jnp.inf, lax.max,
                                      (1, 1, POOL, POOL), (1, 1, POOL, POOL),
                                      'VALID')
                x = x.reshape(1, CONST)
                x = jnp.maximum(jnp.dot(x, fw1.T, precision=hi) + fb1, 0.0)
                x = jnp.maximum(jnp.dot(x, fw2.T, precision=hi) + fb2, 0.0)
                x = jnp.dot(x, fw3.T, precision=hi) + fb3
                scores.append(x)
        per_image.append(jnp.stack(scores))      # (ncrops, 1, 1)
    return jnp.stack(per_image)                  # (B, ncrops, 1, 1)


# ----------------------------------- main ------------------------------------
if __name__ == "__main__":
    key = jax.random.PRNGKey(0)
    ks = jax.random.split(key, 11)

    def uinit(k, shape, fan_in):
        bound = 1.0 / float(np.sqrt(fan_in))
        return jax.random.uniform(k, shape, jnp.float32, -bound, bound)

    params = (
        uinit(ks[0], (C1, 1, K, K), K * K),                # conv1.weight
        uinit(ks[1], (C1,), K * K),                        # conv1.bias
        uinit(ks[2], (C2, C1, K, K), C1 * K * K),          # conv2.weight
        uinit(ks[3], (C2,), C1 * K * K),                   # conv2.bias
        uinit(ks[4], (F1, CONST), CONST),                  # fc1.weight
        uinit(ks[5], (F1,), CONST),                        # fc1.bias
        uinit(ks[6], (F2, F1), F1),                        # fc2.weight
        uinit(ks[7], (F2,), F1),                           # fc2.bias
        uinit(ks[8], (1, F2), F2),                         # fc3.weight
        uinit(ks[9], (1,), F2),                            # fc3.bias
    )
    images = jax.random.normal(ks[10], (BATCH, IMG, IMG), jnp.float32)

    out = jax.jit(net_forward)(images, params)
    out = jax.block_until_ready(out)

    ref = reference_forward(images, params)
    np.testing.assert_allclose(np.asarray(out), np.asarray(ref),
                               rtol=1e-3, atol=1e-3)
    print("KERNEL_OK")
</pallas_src>

<mosaic_0001>
module attributes {stable_mosaic.version = 11 : i64} {
  func.func @_net_kernel(%arg0: i32, %arg1: memref<6x6x48x128xf32, #tpu.memory_space<vmem>>, %arg2: memref<25x128xf32, #tpu.memory_space<vmem>>, %arg3: memref<1x128xf32, #tpu.memory_space<vmem>>, %arg4: memref<640x224xf32, #tpu.memory_space<vmem>>, %arg5: memref<1x208xf32, #tpu.memory_space<vmem>>, %arg6: memref<208x360xf32, #tpu.memory_space<vmem>>, %arg7: memref<208x360xf32, #tpu.memory_space<vmem>>, %arg8: memref<1x360xf32, #tpu.memory_space<vmem>>, %arg9: memref<360x252xf32, #tpu.memory_space<vmem>>, %arg10: memref<1x252xf32, #tpu.memory_space<vmem>>, %arg11: memref<252x3xf32, #tpu.memory_space<vmem>>, %arg12: memref<1x1xf32, #tpu.memory_space<vmem>>, %arg13: memref<6x3xf32, #tpu.memory_space<vmem>>) attributes {dimension_semantics = [#tpu.dimension_semantics<arbitrary>], iteration_bounds = array<i64: 1>, scalar_prefetch = 0 : i64, scratch_operands = 0 : i64, tpu.core_type = #tpu.core_type<tc>, window_params = [{pipeline_mode = #tpu.pipeline_mode<synchronous>, transform_indices = @transform_0, window_bounds = array<i64: 6, 6, 48, 128>}, {pipeline_mode = #tpu.pipeline_mode<synchronous>, transform_indices = @transform_1, window_bounds = array<i64: 25, 128>}, {pipeline_mode = #tpu.pipeline_mode<synchronous>, transform_indices = @transform_2, window_bounds = array<i64: 1, 128>}, {pipeline_mode = #tpu.pipeline_mode<synchronous>, transform_indices = @transform_3, window_bounds = array<i64: 640, 224>}, {pipeline_mode = #tpu.pipeline_mode<synchronous>, transform_indices = @transform_4, window_bounds = array<i64: 1, 208>}, {pipeline_mode = #tpu.pipeline_mode<synchronous>, transform_indices = @transform_5, window_bounds = array<i64: 208, 360>}, {pipeline_mode = #tpu.pipeline_mode<synchronous>, transform_indices = @transform_6, window_bounds = array<i64: 208, 360>}, {pipeline_mode = #tpu.pipeline_mode<synchronous>, transform_indices = @transform_7, window_bounds = array<i64: 1, 360>}, {pipeline_mode = #tpu.pipeline_mode<synchronous>, transform_indices = @transform_8, window_bounds = array<i64: 360, 252>}, {pipeline_mode = #tpu.pipeline_mode<synchronous>, transform_indices = @transform_9, window_bounds = array<i64: 1, 252>}, {pipeline_mode = #tpu.pipeline_mode<synchronous>, transform_indices = @transform_10, window_bounds = array<i64: 252, 3>}, {pipeline_mode = #tpu.pipeline_mode<synchronous>, transform_indices = @transform_11, window_bounds = array<i64: 1, 1>}, {pipeline_mode = #tpu.pipeline_mode<synchronous>, transform_indices = @transform_12, window_bounds = array<i64: 6, 3>}]} {
    %c0 = arith.constant 0 : index
    %c0_0 = arith.constant 0 : index
    %0 = vector.load %arg2[%c0, %c0_0] : memref<25x128xf32, #tpu.memory_space<vmem>>, vector<25x128xf32>
    %1 = vector.extract_strided_slice %0 {offsets = [0, 0], sizes = [1, 128], strides = [1, 1]} : vector<25x128xf32> to vector<1x128xf32>
    %2 = vector.extract_strided_slice %0 {offsets = [1, 0], sizes = [1, 128], strides = [1, 1]} : vector<25x128xf32> to vector<1x128xf32>
    %3 = vector.extract_strided_slice %0 {offsets = [2, 0], sizes = [1, 128], strides = [1, 1]} : vector<25x128xf32> to vector<1x128xf32>
    %4 = vector.extract_strided_slice %0 {offsets = [3, 0], sizes = [1, 128], strides = [1, 1]} : vector<25x128xf32> to vector<1x128xf32>
    %5 = vector.extract_strided_slice %0 {offsets = [4, 0], sizes = [1, 128], strides = [1, 1]} : vector<25x128xf32> to vector<1x128xf32>
    %6 = vector.extract_strided_slice %0 {offsets = [5, 0], sizes = [1, 128], strides = [1, 1]} : vector<25x128xf32> to vector<1x128xf32>
    %7 = vector.extract_strided_slice %0 {offsets = [6, 0], sizes = [1, 128], strides = [1, 1]} : vector<25x128xf32> to vector<1x128xf32>
    %8 = vector.extract_strided_slice %0 {offsets = [7, 0], sizes = [1, 128], strides = [1, 1]} : vector<25x128xf32> to vector<1x128xf32>
    %9 = vector.extract_strided_slice %0 {offsets = [8, 0], sizes = [1, 128], strides = [1, 1]} : vector<25x128xf32> to vector<1x128xf32>
    %10 = vector.extract_strided_slice %0 {offsets = [9, 0], sizes = [1, 128], strides = [1, 1]} : vector<25x128xf32> to vector<1x128xf32>
    %11 = vector.extract_strided_slice %0 {offsets = [10, 0], sizes = [1, 128], strides = [1, 1]} : vector<25x128xf32> to vector<1x128xf32>
    %12 = vector.extract_strided_slice %0 {offsets = [11, 0], sizes = [1, 128], strides = [1, 1]} : vector<25x128xf32> to vector<1x128xf32>
    %13 = vector.extract_strided_slice %0 {offsets = [12, 0], sizes = [1, 128], strides = [1, 1]} : vector<25x128xf32> to vector<1x128xf32>
    %14 = vector.extract_strided_slice %0 {offsets = [13, 0], sizes = [1, 128], strides = [1, 1]} : vector<25x128xf32> to vector<1x128xf32>
    %15 = vector.extract_strided_slice %0 {offsets = [14, 0], sizes = [1, 128], strides = [1, 1]} : vector<25x128xf32> to vector<1x128xf32>
    %16 = vector.extract_strided_slice %0 {offsets = [15, 0], sizes = [1, 128], strides = [1, 1]} : vector<25x128xf32> to vector<1x128xf32>
    %17 = vector.extract_strided_slice %0 {offsets = [16, 0], sizes = [1, 128], strides = [1, 1]} : vector<25x128xf32> to vector<1x128xf32>
    %18 = vector.extract_strided_slice %0 {offsets = [17, 0], sizes = [1, 128], strides = [1, 1]} : vector<25x128xf32> to vector<1x128xf32>
    %19 = vector.extract_strided_slice %0 {offsets = [18, 0], sizes = [1, 128], strides = [1, 1]} : vector<25x128xf32> to vector<1x128xf32>
    %20 = vector.extract_strided_slice %0 {offsets = [19, 0], sizes = [1, 128], strides = [1, 1]} : vector<25x128xf32> to vector<1x128xf32>
    %21 = vector.extract_strided_slice %0 {offsets = [20, 0], sizes = [1, 128], strides = [1, 1]} : vector<25x128xf32> to vector<1x128xf32>
    %22 = vector.extract_strided_slice %0 {offsets = [21, 0], sizes = [1, 128], strides = [1, 1]} : vector<25x128xf32> to vector<1x128xf32>
    %23 = vector.extract_strided_slice %0 {offsets = [22, 0], sizes = [1, 128], strides = [1, 1]} : vector<25x128xf32> to vector<1x128xf32>
    %24 = vector.extract_strided_slice %0 {offsets = [23, 0], sizes = [1, 128], strides = [1, 1]} : vector<25x128xf32> to vector<1x128xf32>
    %25 = vector.extract_strided_slice %0 {offsets = [24, 0], sizes = [1, 128], strides = [1, 1]} : vector<25x128xf32> to vector<1x128xf32>
    %cst = arith.constant 0.000000e+00 : f32
    %26 = vector.broadcast %cst : f32 to vector<48x128xf32>
    %cst_1 = arith.constant 0.000000e+00 : f32
    %27 = vector.broadcast %cst_1 : f32 to vector<48x128xf32>
    %cst_2 = arith.constant 0.000000e+00 : f32
    %28 = vector.broadcast %cst_2 : f32 to vector<48x128xf32>
    %cst_3 = arith.constant 0.000000e+00 : f32
    %29 = vector.broadcast %cst_3 : f32 to vector<48x128xf32>
    %c0_4 = arith.constant 0 : index
    %c0_5 = arith.constant 0 : index
    %c0_6 = arith.constant 0 : index
    %c0_7 = arith.constant 0 : index
    %30 = vector.load %arg1[%c0_4, %c0_5, %c0_6, %c0_7] : memref<6x6x48x128xf32, #tpu.memory_space<vmem>>, vector<1x1x48x128xf32>
    %31 = vector.shape_cast %30 : vector<1x1x48x128xf32> to vector<48x128xf32>
    %32 = vector.broadcast %1 : vector<1x128xf32> to vector<48x128xf32>
    %33 = arith.mulf %31, %32 : vector<48x128xf32>
    %34 = arith.addf %26, %33 : vector<48x128xf32>
    %c0_8 = arith.constant 0 : index
    %c1 = arith.constant 1 : index
    %c0_9 = arith.constant 0 : index
    %c0_10 = arith.constant 0 : index
    %35 = vector.load %arg1[%c0_8, %c1, %c0_9, %c0_10] : memref<6x6x48x128xf32, #tpu.memory_space<vmem>>, vector<1x1x48x128xf32>
    %36 = vector.shape_cast %35 : vector<1x1x48x128xf32> to vector<48x128xf32>
    %37 = vector.broadcast %2 : vector<1x128xf32> to vector<48x128xf32>
    %38 = arith.mulf %36, %37 : vector<48x128xf32>
    %39 = arith.addf %34, %38 : vector<48x128xf32>
    %40 = vector.broadcast %1 : vector<1x128xf32> to vector<48x128xf32>
    %41 = arith.mulf %36, %40 : vector<48x128xf32>
    %42 = arith.addf %27, %41 : vector<48x128xf32>
    %c0_11 = arith.constant 0 : index
    %c2 = arith.constant 2 : index
    %c0_12 = arith.constant 0 : index
    %c0_13 = arith.constant 0 : index
    %43 = vector.load %arg1[%c0_11, %c2, %c0_12, %c0_13] : memref<6x6x48x128xf32, #tpu.memory_space<vmem>>, vector<1x1x48x128xf32>
    %44 = vector.shape_cast %43 : vector<1x1x48x128xf32> to vector<48x128xf32>
    %45 = vector.broadcast %3 : vector<1x128xf32> to vector<48x128xf32>
    %46 = arith.mulf %44, %45 : vector<48x128xf32>
    %47 = arith.addf %39, %46 : vector<48x128xf32>
    %48 = vector.broadcast %2 : vector<1x128xf32> to vector<48x128xf32>
    %49 = arith.mulf %44, %48 : vector<48x128xf32>
    %50 = arith.addf %42, %49 : vector<48x128xf32>
    %c0_14 = arith.constant 0 : index
    %c3 = arith.constant 3 : index
    %c0_15 = arith.constant 0 : index
    %c0_16 = arith.constant 0 : index
    %51 = vector.load %arg1[%c0_14, %c3, %c0_15, %c0_16] : memref<6x6x48x128xf32, #tpu.memory_space<vmem>>, vector<1x1x48x128xf32>
    %52 = vector.shape_cast %51 : vector<1x1x48x128xf32> to vector<48x128xf32>
    %53 = vector.broadcast %4 : vector<1x128xf32> to vector<48x128xf32>
    %54 = arith.mulf %52, %53 : vector<48x128xf32>
    %55 = arith.addf %47, %54 : vector<48x128xf32>
    %56 = vector.broadcast %3 : vector<1x128xf32> to vector<48x128xf32>
    %57 = arith.mulf %52, %56 : vector<48x128xf32>
    %58 = arith.addf %50, %57 : vector<48x128xf32>
    %c0_17 = arith.constant 0 : index
    %c4 = arith.constant 4 : index
    %c0_18 = arith.constant 0 : index
    %c0_19 = arith.constant 0 : index
    %59 = vector.load %arg1[%c0_17, %c4, %c0_18, %c0_19] : memref<6x6x48x128xf32, #tpu.memory_space<vmem>>, vector<1x1x48x128xf32>
    %60 = vector.shape_cast %59 : vector<1x1x48x128xf32> to vector<48x128xf32>
    %61 = vector.broadcast %5 : vector<1x128xf32> to vector<48x128xf32>
    %62 = arith.mulf %60, %61 : vector<48x128xf32>
    %63 = arith.addf %55, %62 : vector<48x128xf32>
    %64 = vector.broadcast %4 : vector<1x128xf32> to vector<48x128xf32>
    %65 = arith.mulf %60, %64 : vector<48x128xf32>
    %66 = arith.addf %58, %65 : vector<48x128xf32>
    %c0_20 = arith.constant 0 : index
    %c5 = arith.constant 5 : index
    %c0_21 = arith.constant 0 : index
    %c0_22 = arith.constant 0 : index
    %67 = vector.load %arg1[%c0_20, %c5, %c0_21, %c0_22] : memref<6x6x48x128xf32, #tpu.memory_space<vmem>>, vector<1x1x48x128xf32>
    %68 = vector.shape_cast %67 : vector<1x1x48x128xf32> to vector<48x128xf32>
    %69 = vector.broadcast %5 : vector<1x128xf32> to vector<48x128xf32>
    %70 = arith.mulf %68, %69 : vector<48x128xf32>
    %71 = arith.addf %66, %70 : vector<48x128xf32>
    %c1_23 = arith.constant 1 : index
    %c0_24 = arith.constant 0 : index
    %c0_25 = arith.constant 0 : index
    %c0_26 = arith.constant 0 : index
    %72 = vector.load %arg1[%c1_23, %c0_24, %c0_25, %c0_26] : memref<6x6x48x128xf32, #tpu.memory_space<vmem>>, vector<1x1x48x128xf32>
    %73 = vector.shape_cast %72 : vector<1x1x48x128xf32> to vector<48x128xf32>
    %74 = vector.broadcast %6 : vector<1x128xf32> to vector<48x128xf32>
    %75 = arith.mulf %73, %74 : vector<48x128xf32>
    %76 = arith.addf %63, %75 : vector<48x128xf32>
    %77 = vector.broadcast %1 : vector<1x128xf32> to vector<48x128xf32>
    %78 = arith.mulf %73, %77 : vector<48x128xf32>
    %79 = arith.addf %28, %78 : vector<48x128xf32>
    %c1_27 = arith.constant 1 : index
    %c1_28 = arith.constant 1 : index
    %c0_29 = arith.constant 0 : index
    %c0_30 = arith.constant 0 : index
    %80 = vector.load %arg1[%c1_27, %c1_28, %c0_29, %c0_30] : memref<6x6x48x128xf32, #tpu.memory_space<vmem>>, vector<1x1x48x128xf32>
    %81 = vector.shape_cast %80 : vector<1x1x48x128xf32> to vector<48x128xf32>
    %82 = vector.broadcast %7 : vector<1x128xf32> to vector<48x128xf32>
    %83 = arith.mulf %81, %82 : vector<48x128xf32>
    %84 = arith.addf %76, %83 : vector<48x128xf32>
    %85 = vector.broadcast %6 : vector<1x128xf32> to vector<48x128xf32>
    %86 = arith.mulf %81, %85 : vector<48x128xf32>
    %87 = arith.addf %71, %86 : vector<48x128xf32>
    %88 = vector.broadcast %2 : vector<1x128xf32> to vector<48x128xf32>
    %89 = arith.mulf %81, %88 : vector<48x128xf32>
    %90 = arith.addf %79, %89 : vector<48x128xf32>
    %91 = vector.broadcast %1 : vector<1x128xf32> to vector<48x128xf32>
    %92 = arith.mulf %81, %91 : vector<48x128xf32>
    %93 = arith.addf %29, %92 : vector<48x128xf32>
    %c1_31 = arith.constant 1 : index
    %c2_32 = arith.constant 2 : index
    %c0_33 = arith.constant 0 : index
    %c0_34 = arith.constant 0 : index
    %94 = vector.load %arg1[%c1_31, %c2_32, %c0_33, %c0_34] : memref<6x6x48x128xf32, #tpu.memory_space<vmem>>, vector<1x1x48x128xf32>
    %95 = vector.shape_cast %94 : vector<1x1x48x128xf32> to vector<48x128xf32>
    %96 = vector.broadcast %8 : vector<1x128xf32> to vector<48x128xf32>
    %97 = arith.mulf %95, %96 : vector<48x128xf32>
    %98 = arith.addf %84, %97 : vector<48x128xf32>
    %99 = vector.broadcast %7 : vector<1x128xf32> to vector<48x128xf32>
    %100 = arith.mulf %95, %99 : vector<48x128xf32>
    %101 = arith.addf %87, %100 : vector<48x128xf32>
    %102 = vector.broadcast %3 : vector<1x128xf32> to vector<48x128xf32>
    %103 = arith.mulf %95, %102 : vector<48x128xf32>
    %104 = arith.addf %90, %103 : vector<48x128xf32>
    %105 = vector.broadcast %2 : vector<1x128xf32> to vector<48x128xf32>
    %106 = arith.mulf %95, %105 : vector<48x128xf32>
    %107 = arith.addf %93, %106 : vector<48x128xf32>
    %c1_35 = arith.constant 1 : index
    %c3_36 = arith.constant 3 : index
    %c0_37 = arith.constant 0 : index
    %c0_38 = arith.constant 0 : index
    %108 = vector.load %arg1[%c1_35, %c3_36, %c0_37, %c0_38] : memref<6x6x48x128xf32, #tpu.memory_space<vmem>>, vector<1x1x48x128xf32>
    %109 = vector.shape_cast %108 : vector<1x1x48x128xf32> to vector<48x128xf32>
    %110 = vector.broadcast %9 : vector<1x128xf32> to vector<48x128xf32>
    %111 = arith.mulf %109, %110 : vector<48x128xf32>
    %112 = arith.addf %98, %111 : vector<48x128xf32>
    %113 = vector.broadcast %8 : vector<1x128xf32> to vector<48x128xf32>
    %114 = arith.mulf %109, %113 : vector<48x128xf32>
    %115 = arith.addf %101, %114 : vector<48x128xf32>
    %116 = vector.broadcast %4 : vector<1x128xf32> to vector<48x128xf32>
    %117 = arith.mulf %109, %116 : vector<48x128xf32>
    %118 = arith.addf %104, %117 : vector<48x128xf32>
    %119 = vector.broadcast %3 : vector<1x128xf32> to vector<48x128xf32>
    %120 = arith.mulf %109, %119 : vector<48x128xf32>
    %121 = arith.addf %107, %120 : vector<48x128xf32>
    %c1_39 = arith.constant 1 : index
    %c4_40 = arith.constant 4 : index
    %c0_41 = arith.constant 0 : index
    %c0_42 = arith.constant 0 : index
    %122 = vector.load %arg1[%c1_39, %c4_40, %c0_41, %c0_42] : memref<6x6x48x128xf32, #tpu.memory_space<vmem>>, vector<1x1x48x128xf32>
    %123 = vector.shape_cast %122 : vector<1x1x48x128xf32> to vector<48x128xf32>
    %124 = vector.broadcast %10 : vector<1x128xf32> to vector<48x128xf32>
    %125 = arith.mulf %123, %124 : vector<48x128xf32>
    %126 = arith.addf %112, %125 : vector<48x128xf32>
    %127 = vector.broadcast %9 : vector<1x128xf32> to vector<48x128xf32>
    %128 = arith.mulf %123, %127 : vector<48x128xf32>
    %129 = arith.addf %115, %128 : vector<48x128xf32>
    %130 = vector.broadcast %5 : vector<1x128xf32> to vector<48x128xf32>
    %131 = arith.mulf %123, %130 : vector<48x128xf32>
    %132 = arith.addf %118, %131 : vector<48x128xf32>
    %133 = vector.broadcast %4 : vector<1x128xf32> to vector<48x128xf32>
    %134 = arith.mulf %123, %133 : vector<48x128xf32>
    %135 = arith.addf %121, %134 : vector<48x128xf32>
    %c1_43 = arith.constant 1 : index
    %c5_44 = arith.constant 5 : index
    %c0_45 = arith.constant 0 : index
    %c0_46 = arith.constant 0 : index
    %136 = vector.load %arg1[%c1_43, %c5_44, %c0_45, %c0_46] : memref<6x6x48x128xf32, #tpu.memory_space<vmem>>, vector<1x1x48x128xf32>
    %137 = vector.shape_cast %136 : vector<1x1x48x128xf32> to vector<48x128xf32>
    %138 = vector.broadcast %10 : vector<1x128xf32> to vector<48x128xf32>
    %139 = arith.mulf %137, %138 : vector<48x128xf32>
    %140 = arith.addf %129, %139 : vector<48x128xf32>
    %141 = vector.broadcast %5 : vector<1x128xf32> to vector<48x128xf32>
    %142 = arith.mulf %137, %141 : vector<48x128xf32>
    %143 = arith.addf %135, %142 : vector<48x128xf32>
    %c2_47 = arith.constant 2 : index
    %c0_48 = arith.constant 0 : index
    %c0_49 = arith.constant 0 : index
    %c0_50 = arith.constant 0 : index
    %144 = vector.load %arg1[%c2_47, %c0_48, %c0_49, %c0_50] : memref<6x6x48x128xf32, #tpu.memory_space<vmem>>, vector<1x1x48x128xf32>
    %145 = vector.shape_cast %144 : vector<1x1x48x128xf32> to vector<48x128xf32>
    %146 = vector.broadcast %11 : vector<1x128xf32> to vector<48x128xf32>
    %147 = arith.mulf %145, %146 : vector<48x128xf32>
    %148 = arith.addf %126, %147 : vector<48x128xf32>
    %149 = vector.broadcast %6 : vector<1x128xf32> to vector<48x128xf32>
    %150 = arith.mulf %145, %149 : vector<48x128xf32>
    %151 = arith.addf %132, %150 : vector<48x128xf32>
    %c2_51 = arith.constant 2 : index
    %c1_52 = arith.constant 1 : index
    %c0_53 = arith.constant 0 : index
    %c0_54 = arith.constant 0 : index
    %152 = vector.load %arg1[%c2_51, %c1_52, %c0_53, %c0_54] : memref<6x6x48x128xf32, #tpu.memory_space<vmem>>, vector<1x1x48x128xf32>
    %153 = vector.shape_cast %152 : vector<1x1x48x128xf32> to vector<48x128xf32>
    %154 = vector.broadcast %12 : vector<1x128xf32> to vector<48x128xf32>
    %155 = arith.mulf %153, %154 : vector<48x128xf32>
    %156 = arith.addf %148, %155 : vector<48x128xf32>
    %157 = vector.broadcast %11 : vector<1x128xf32> to vector<48x128xf32>
    %158 = arith.mulf %153, %157 : vector<48x128xf32>
    %159 = arith.addf %140, %158 : vector<48x128xf32>
    %160 = vector.broadcast %7 : vector<1x128xf32> to vector<48x128xf32>
    %161 = arith.mulf %153, %160 : vector<48x128xf32>
    %162 = arith.addf %151, %161 : vector<48x128xf32>
    %163 = vector.broadcast %6 : vector<1x128xf32> to vector<48x128xf32>
    %164 = arith.mulf %153, %163 : vector<48x128xf32>
    %165 = arith.addf %143, %164 : vector<48x128xf32>
    %c2_55 = arith.constant 2 : index
    %c2_56 = arith.constant 2 : index
    %c0_57 = arith.constant 0 : index
    %c0_58 = arith.constant 0 : index
    %166 = vector.load %arg1[%c2_55, %c2_56, %c0_57, %c0_58] : memref<6x6x48x128xf32, #tpu.memory_space<vmem>>, vector<1x1x48x128xf32>
    %167 = vector.shape_cast %166 : vector<1x1x48x128xf32> to vector<48x128xf32>
    %168 = vector.broadcast %13 : vector<1x128xf32> to vector<48x128xf32>
    %169 = arith.mulf %167, %168 : vector<48x128xf32>
    %170 = arith.addf %156, %169 : vector<48x128xf32>
    %171 = vector.broadcast %12 : vector<1x128xf32> to vector<48x128xf32>
    %172 = arith.mulf %167, %171 : vector<48x128xf32>
    %173 = arith.addf %159, %172 : vector<48x128xf32>
    %174 = vector.broadcast %8 : vector<1x128xf32> to vector<48x128xf32>
    %175 = arith.mulf %167, %174 : vector<48x128xf32>
    %176 = arith.addf %162, %175 : vector<48x128xf32>
    %177 = vector.broadcast %7 : vector<1x128xf32> to vector<48x128xf32>
    %178 = arith.mulf %167, %177 : vector<48x128xf32>
    %179 = arith.addf %165, %178 : vector<48x128xf32>
    %c2_59 = arith.constant 2 : index
    %c3_60 = arith.constant 3 : index
    %c0_61 = arith.constant 0 : index
    %c0_62 = arith.constant 0 : index
    %180 = vector.load %arg1[%c2_59, %c3_60, %c0_61, %c0_62] : memref<6x6x48x128xf32, #tpu.memory_space<vmem>>, vector<1x1x48x128xf32>
    %181 = vector.shape_cast %180 : vector<1x1x48x128xf32> to vector<48x128xf32>
    %182 = vector.broadcast %14 : vector<1x128xf32> to vector<48x128xf32>
    %183 = arith.mulf %181, %182 : vector<48x128xf32>
    %184 = arith.addf %170, %183 : vector<48x128xf32>
    %185 = vector.broadcast %13 : vector<1x128xf32> to vector<48x128xf32>
    %186 = arith.mulf %181, %185 : vector<48x128xf32>
    %187 = arith.addf %173, %186 : vector<48x128xf32>
    %188 = vector.broadcast %9 : vector<1x128xf32> to vector<48x128xf32>
    %189 = arith.mulf %181, %188 : vector<48x128xf32>
    %190 = arith.addf %176, %189 : vector<48x128xf32>
    %191 = vector.broadcast %8 : vector<1x128xf32> to vector<48x128xf32>
    %192 = arith.mulf %181, %191 : vector<48x128xf32>
    %193 = arith.addf %179, %192 : vector<48x128xf32>
    %c2_63 = arith.constant 2 : index
    %c4_64 = arith.constant 4 : index
    %c0_65 = arith.constant 0 : index
    %c0_66 = arith.constant 0 : index
    %194 = vector.load %arg1[%c2_63, %c4_64, %c0_65, %c0_66] : memref<6x6x48x128xf32, #tpu.memory_space<vmem>>, vector<1x1x48x128xf32>
    %195 = vector.shape_cast %194 : vector<1x1x48x128xf32> to vector<48x128xf32>
    %196 = vector.broadcast %15 : vector<1x128xf32> to vector<48x128xf32>
    %197 = arith.mulf %195, %196 : vector<48x128xf32>
    %198 = arith.addf %184, %197 : vector<48x128xf32>
    %199 = vector.broadcast %14 : vector<1x128xf32> to vector<48x128xf32>
    %200 = arith.mulf %195, %199 : vector<48x128xf32>
    %201 = arith.addf %187, %200 : vector<48x128xf32>
    %202 = vector.broadcast %10 : vector<1x128xf32> to vector<48x128xf32>
    %203 = arith.mulf %195, %202 : vector<48x128xf32>
    %204 = arith.addf %190, %203 : vector<48x128xf32>
    %205 = vector.broadcast %9 : vector<1x128xf32> to vector<48x128xf32>
    %206 = arith.mulf %195, %205 : vector<48x128xf32>
    %207 = arith.addf %193, %206 : vector<48x128xf32>
    %c2_67 = arith.constant 2 : index
    %c5_68 = arith.constant 5 : index
    %c0_69 = arith.constant 0 : index
    %c0_70 = arith.constant 0 : index
    %208 = vector.load %arg1[%c2_67, %c5_68, %c0_69, %c0_70] : memref<6x6x48x128xf32, #tpu.memory_space<vmem>>, vector<1x1x48x128xf32>
    %209 = vector.shape_cast %208 : vector<1x1x48x128xf32> to vector<48x128xf32>
    %210 = vector.broadcast %15 : vector<1x128xf32> to vector<48x128xf32>
    %211 = arith.mulf %209, %210 : vector<48x128xf32>
    %212 = arith.addf %201, %211 : vector<48x128xf32>
    %213 = vector.broadcast %10 : vector<1x128xf32> to vector<48x128xf32>
    %214 = arith.mulf %209, %213 : vector<48x128xf32>
    %215 = arith.addf %207, %214 : vector<48x128xf32>
    %c3_71 = arith.constant 3 : index
    %c0_72 = arith.constant 0 : index
    %c0_73 = arith.constant 0 : index
    %c0_74 = arith.constant 0 : index
    %216 = vector.load %arg1[%c3_71, %c0_72, %c0_73, %c0_74] : memref<6x6x48x128xf32, #tpu.memory_space<vmem>>, vector<1x1x48x128xf32>
    %217 = vector.shape_cast %216 : vector<1x1x48x128xf32> to vector<48x128xf32>
    %218 = vector.broadcast %16 : vector<1x128xf32> to vector<48x128xf32>
    %219 = arith.mulf %217, %218 : vector<48x128xf32>
    %220 = arith.addf %198, %219 : vector<48x128xf32>
    %221 = vector.broadcast %11 : vector<1x128xf32> to vector<48x128xf32>
    %222 = arith.mulf %217, %221 : vector<48x128xf32>
    %223 = arith.addf %204, %222 : vector<48x128xf32>
    %c3_75 = arith.constant 3 : index
    %c1_76 = arith.constant 1 : index
    %c0_77 = arith.constant 0 : index
    %c0_78 = arith.constant 0 : index
    %224 = vector.load %arg1[%c3_75, %c1_76, %c0_77, %c0_78] : memref<6x6x48x128xf32, #tpu.memory_space<vmem>>, vector<1x1x48x128xf32>
    %225 = vector.shape_cast %224 : vector<1x1x48x128xf32> to vector<48x128xf32>
    %226 = vector.broadcast %17 : vector<1x128xf32> to vector<48x128xf32>
    %227 = arith.mulf %225, %226 : vector<48x128xf32>
    %228 = arith.addf %220, %227 : vector<48x128xf32>
    %229 = vector.broadcast %16 : vector<1x128xf32> to vector<48x128xf32>
    %230 = arith.mulf %225, %229 : vector<48x128xf32>
    %231 = arith.addf %212, %230 : vector<48x128xf32>
    %232 = vector.broadcast %12 : vector<1x128xf32> to vector<48x128xf32>
    %233 = arith.mulf %225, %232 : vector<48x128xf32>
    %234 = arith.addf %223, %233 : vector<48x128xf32>
    %235 = vector.broadcast %11 : vector<1x128xf32> to vector<48x128xf32>
    %236 = arith.mulf %225, %235 : vector<48x128xf32>
    %237 = arith.addf %215, %236 : vector<48x128xf32>
    %c3_79 = arith.constant 3 : index
    %c2_80 = arith.constant 2 : index
    %c0_81 = arith.constant 0 : index
    %c0_82 = arith.constant 0 : index
    %238 = vector.load %arg1[%c3_79, %c2_80, %c0_81, %c0_82] : memref<6x6x48x128xf32, #tpu.memory_space<vmem>>, vector<1x1x48x128xf32>
    %239 = vector.shape_cast %238 : vector<1x1x48x128xf32> to vector<48x128xf32>
    %240 = vector.broadcast %18 : vector<1x128xf32> to vector<48x128xf32>
    %241 = arith.mulf %239, %240 : vector<48x128xf32>
    %242 = arith.addf %228, %241 : vector<48x128xf32>
    %243 = vector.broadcast %17 : vector<1x128xf32> to vector<48x128xf32>
    %244 = arith.mulf %239, %243 : vector<48x128xf32>
    %245 = arith.addf %231, %244 : vector<48x128xf32>
    %246 = vector.broadcast %13 : vector<1x128xf32> to vector<48x128xf32>
    %247 = arith.mulf %239, %246 : vector<48x128xf32>
    %248 = arith.addf %234, %247 : vector<48x128xf32>
    %249 = vector.broadcast %12 : vector<1x128xf32> to vector<48x128xf32>
    %250 = arith.mulf %239, %249 : vector<48x128xf32>
    %251 = arith.addf %237, %250 : vector<48x128xf32>
    %c3_83 = arith.constant 3 : index
    %c3_84 = arith.constant 3 : index
    %c0_85 = arith.constant 0 : index
    %c0_86 = arith.constant 0 : index
    %252 = vector.load %arg1[%c3_83, %c3_84, %c0_85, %c0_86] : memref<6x6x48x128xf32, #tpu.memory_space<vmem>>, vector<1x1x48x128xf32>
    %253 = vector.shape_cast %252 : vector<1x1x48x128xf32> to vector<48x128xf32>
    %254 = vector.broadcast %19 : vector<1x128xf32> to vector<48x128xf32>
    %255 = arith.mulf %253, %254 : vector<48x128xf32>
    %256 = arith.addf %242, %255 : vector<48x128xf32>
    %257 = vector.broadcast %18 : vector<1x128xf32> to vector<48x128xf32>
    %258 = arith.mulf %253, %257 : vector<48x128xf32>
    %259 = arith.addf %245, %258 : vector<48x128xf32>
    %260 = vector.broadcast %14 : vector<1x128xf32> to vector<48x128xf32>
    %261 = arith.mulf %253, %260 : vector<48x128xf32>
    %262 = arith.addf %248, %261 : vector<48x128xf32>
    %263 = vector.broadcast %13 : vector<1x128xf32> to vector<48x128xf32>
    %264 = arith.mulf %253, %263 : vector<48x128xf32>
    %265 = arith.addf %251, %264 : vector<48x128xf32>
    %c3_87 = arith.constant 3 : index
    %c4_88 = arith.constant 4 : index
    %c0_89 = arith.constant 0 : index
    %c0_90 = arith.constant 0 : index
    %266 = vector.load %arg1[%c3_87, %c4_88, %c0_89, %c0_90] : memref<6x6x48x128xf32, #tpu.memory_space<vmem>>, vector<1x1x48x128xf32>
    %267 = vector.shape_cast %266 : vector<1x1x48x128xf32> to vector<48x128xf32>
    %268 = vector.broadcast %20 : vector<1x128xf32> to vector<48x128xf32>
    %269 = arith.mulf %267, %268 : vector<48x128xf32>
    %270 = arith.addf %256, %269 : vector<48x128xf32>
    %271 = vector.broadcast %19 : vector<1x128xf32> to vector<48x128xf32>
    %272 = arith.mulf %267, %271 : vector<48x128xf32>
    %273 = arith.addf %259, %272 : vector<48x128xf32>
    %274 = vector.broadcast %15 : vector<1x128xf32> to vector<48x128xf32>
    %275 = arith.mulf %267, %274 : vector<48x128xf32>
    %276 = arith.addf %262, %275 : vector<48x128xf32>
    %277 = vector.broadcast %14 : vector<1x128xf32> to vector<48x128xf32>
    %278 = arith.mulf %267, %277 : vector<48x128xf32>
    %279 = arith.addf %265, %278 : vector<48x128xf32>
    %c3_91 = arith.constant 3 : index
    %c5_92 = arith.constant 5 : index
    %c0_93 = arith.constant 0 : index
    %c0_94 = arith.constant 0 : index
    %280 = vector.load %arg1[%c3_91, %c5_92, %c0_93, %c0_94] : memref<6x6x48x128xf32, #tpu.memory_space<vmem>>, vector<1x1x48x128xf32>
    %281 = vector.shape_cast %280 : vector<1x1x48x128xf32> to vector<48x128xf32>
    %282 = vector.broadcast %20 : vector<1x128xf32> to vector<48x128xf32>
    %283 = arith.mulf %281, %282 : vector<48x128xf32>
    %284 = arith.addf %273, %283 : vector<48x128xf32>
    %285 = vector.broadcast %15 : vector<1x128xf32> to vector<48x128xf32>
    %286 = arith.mulf %281, %285 : vector<48x128xf32>
    %287 = arith.addf %279, %286 : vector<48x128xf32>
    %c4_95 = arith.constant 4 : index
    %c0_96 = arith.constant 0 : index
    %c0_97 = arith.constant 0 : index
    %c0_98 = arith.constant 0 : index
    %288 = vector.load %arg1[%c4_95, %c0_96, %c0_97, %c0_98] : memref<6x6x48x128xf32, #tpu.memory_space<vmem>>, vector<1x1x48x128xf32>
    %289 = vector.shape_cast %288 : vector<1x1x48x128xf32> to vector<48x128xf32>
    %290 = vector.broadcast %21 : vector<1x128xf32> to vector<48x128xf32>
    %291 = arith.mulf %289, %290 : vector<48x128xf32>
    %292 = arith.addf %270, %291 : vector<48x128xf32>
    %293 = vector.broadcast %16 : vector<1x128xf32> to vector<48x128xf32>
    %294 = arith.mulf %289, %293 : vector<48x128xf32>
    %295 = arith.addf %276, %294 : vector<48x128xf32>
    %c4_99 = arith.constant 4 : index
    %c1_100 = arith.constant 1 : index
    %c0_101 = arith.constant 0 : index
    %c0_102 = arith.constant 0 : index
    %296 = vector.load %arg1[%c4_99, %c1_100, %c0_101, %c0_102] : memref<6x6x48x128xf32, #tpu.memory_space<vmem>>, vector<1x1x48x128xf32>
    %297 = vector.shape_cast %296 : vector<1x1x48x128xf32> to vector<48x128xf32>
    %298 = vector.broadcast %22 : vector<1x128xf32> to vector<48x128xf32>
    %299 = arith.mulf %297, %298 : vector<48x128xf32>
    %300 = arith.addf %292, %299 : vector<48x128xf32>
    %301 = vector.broadcast %21 : vector<1x128xf32> to vector<48x128xf32>
    %302 = arith.mulf %297, %301 : vector<48x128xf32>
    %303 = arith.addf %284, %302 : vector<48x128xf32>
    %304 = vector.broadcast %17 : vector<1x128xf32> to vector<48x128xf32>
    %305 = arith.mulf %297, %304 : vector<48x128xf32>
    %306 = arith.addf %295, %305 : vector<48x128xf32>
    %307 = vector.broadcast %16 : vector<1x128xf32> to vector<48x128xf32>
    %308 = arith.mulf %297, %307 : vector<48x128xf32>
    %309 = arith.addf %287, %308 : vector<48x128xf32>
    %c4_103 = arith.constant 4 : index
    %c2_104 = arith.constant 2 : index
    %c0_105 = arith.constant 0 : index
    %c0_106 = arith.constant 0 : index
    %310 = vector.load %arg1[%c4_103, %c2_104, %c0_105, %c0_106] : memref<6x6x48x128xf32, #tpu.memory_space<vmem>>, vector<1x1x48x128xf32>
    %311 = vector.shape_cast %310 : vector<1x1x48x128xf32> to vector<48x128xf32>
    %312 = vector.broadcast %23 : vector<1x128xf32> to vector<48x128xf32>
    %313 = arith.mulf %311, %312 : vector<48x128xf32>
    %314 = arith.addf %300, %313 : vector<48x128xf32>
    %315 = vector.broadcast %22 : vector<1x128xf32> to vector<48x128xf32>
    %316 = arith.mulf %311, %315 : vector<48x128xf32>
    %317 = arith.addf %303, %316 : vector<48x128xf32>
    %318 = vector.broadcast %18 : vector<1x128xf32> to vector<48x128xf32>
    %319 = arith.mulf %311, %318 : vector<48x128xf32>
    %320 = arith.addf %306, %319 : vector<48x128xf32>
    %321 = vector.broadcast %17 : vector<1x128xf32> to vector<48x128xf32>
    %322 = arith.mulf %311, %321 : vector<48x128xf32>
    %323 = arith.addf %309, %322 : vector<48x128xf32>
    %c4_107 = arith.constant 4 : index
    %c3_108 = arith.constant 3 : index
    %c0_109 = arith.constant 0 : index
    %c0_110 = arith.constant 0 : index
    %324 = vector.load %arg1[%c4_107, %c3_108, %c0_109, %c0_110] : memref<6x6x48x128xf32, #tpu.memory_space<vmem>>, vector<1x1x48x128xf32>
    %325 = vector.shape_cast %324 : vector<1x1x48x128xf32> to vector<48x128xf32>
    %326 = vector.broadcast %24 : vector<1x128xf32> to vector<48x128xf32>
    %327 = arith.mulf %325, %326 : vector<48x128xf32>
    %328 = arith.addf %314, %327 : vector<48x128xf32>
    %329 = vector.broadcast %23 : vector<1x128xf32> to vector<48x128xf32>
    %330 = arith.mulf %325, %329 : vector<48x128xf32>
    %331 = arith.addf %317, %330 : vector<48x128xf32>
    %332 = vector.broadcast %19 : vector<1x128xf32> to vector<48x128xf32>
    %333 = arith.mulf %325, %332 : vector<48x128xf32>
    %334 = arith.addf %320, %333 : vector<48x128xf32>
    %335 = vector.broadcast %18 : vector<1x128xf32> to vector<48x128xf32>
    %336 = arith.mulf %325, %335 : vector<48x128xf32>
    %337 = arith.addf %323, %336 : vector<48x128xf32>
    %c4_111 = arith.constant 4 : index
    %c4_112 = arith.constant 4 : index
    %c0_113 = arith.constant 0 : index
    %c0_114 = arith.constant 0 : index
    %338 = vector.load %arg1[%c4_111, %c4_112, %c0_113, %c0_114] : memref<6x6x48x128xf32, #tpu.memory_space<vmem>>, vector<1x1x48x128xf32>
    %339 = vector.shape_cast %338 : vector<1x1x48x128xf32> to vector<48x128xf32>
    %340 = vector.broadcast %25 : vector<1x128xf32> to vector<48x128xf32>
    %341 = arith.mulf %339, %340 : vector<48x128xf32>
    %342 = arith.addf %328, %341 : vector<48x128xf32>
    %343 = vector.broadcast %24 : vector<1x128xf32> to vector<48x128xf32>
    %344 = arith.mulf %339, %343 : vector<48x128xf32>
    %345 = arith.addf %331, %344 : vector<48x128xf32>
    %346 = vector.broadcast %20 : vector<1x128xf32> to vector<48x128xf32>
    %347 = arith.mulf %339, %346 : vector<48x128xf32>
    %348 = arith.addf %334, %347 : vector<48x128xf32>
    %349 = vector.broadcast %19 : vector<1x128xf32> to vector<48x128xf32>
    %350 = arith.mulf %339, %349 : vector<48x128xf32>
    %351 = arith.addf %337, %350 : vector<48x128xf32>
    %c4_115 = arith.constant 4 : index
    %c5_116 = arith.constant 5 : index
    %c0_117 = arith.constant 0 : index
    %c0_118 = arith.constant 0 : index
    %352 = vector.load %arg1[%c4_115, %c5_116, %c0_117, %c0_118] : memref<6x6x48x128xf32, #tpu.memory_space<vmem>>, vector<1x1x48x128xf32>
    %353 = vector.shape_cast %352 : vector<1x1x48x128xf32> to vector<48x128xf32>
    %354 = vector.broadcast %25 : vector<1x128xf32> to vector<48x128xf32>
    %355 = arith.mulf %353, %354 : vector<48x128xf32>
    %356 = arith.addf %345, %355 : vector<48x128xf32>
    %357 = vector.broadcast %20 : vector<1x128xf32> to vector<48x128xf32>
    %358 = arith.mulf %353, %357 : vector<48x128xf32>
    %359 = arith.addf %351, %358 : vector<48x128xf32>
    %c5_119 = arith.constant 5 : index
    %c0_120 = arith.constant 0 : index
    %c0_121 = arith.constant 0 : index
    %c0_122 = arith.constant 0 : index
    %360 = vector.load %arg1[%c5_119, %c0_120, %c0_121, %c0_122] : memref<6x6x48x128xf32, #tpu.memory_space<vmem>>, vector<1x1x48x128xf32>
    %361 = vector.shape_cast %360 : vector<1x1x48x128xf32> to vector<48x128xf32>
    %362 = vector.broadcast %21 : vector<1x128xf32> to vector<48x128xf32>
    %363 = arith.mulf %361, %362 : vector<48x128xf32>
    %364 = arith.addf %348, %363 : vector<48x128xf32>
    %c5_123 = arith.constant 5 : index
    %c1_124 = arith.constant 1 : index
    %c0_125 = arith.constant 0 : index
    %c0_126 = arith.constant 0 : index
    %365 = vector.load %arg1[%c5_123, %c1_124, %c0_125, %c0_126] : memref<6x6x48x128xf32, #tpu.memory_space<vmem>>, vector<1x1x48x128xf32>
    %366 = vector.shape_cast %365 : vector<1x1x48x128xf32> to vector<48x128xf32>
    %367 = vector.broadcast %22 : vector<1x128xf32> to vector<48x128xf32>
    %368 = arith.mulf %366, %367 : vector<48x128xf32>
    %369 = arith.addf %364, %368 : vector<48x128xf32>
    %370 = vector.broadcast %21 : vector<1x128xf32> to vector<48x128xf32>
    %371 = arith.mulf %366, %370 : vector<48x128xf32>
    %372 = arith.addf %359, %371 : vector<48x128xf32>
    %c5_127 = arith.constant 5 : index
    %c2_128 = arith.constant 2 : index
    %c0_129 = arith.constant 0 : index
    %c0_130 = arith.constant 0 : index
    %373 = vector.load %arg1[%c5_127, %c2_128, %c0_129, %c0_130] : memref<6x6x48x128xf32, #tpu.memory_space<vmem>>, vector<1x1x48x128xf32>
    %374 = vector.shape_cast %373 : vector<1x1x48x128xf32> to vector<48x128xf32>
    %375 = vector.broadcast %23 : vector<1x128xf32> to vector<48x128xf32>
    %376 = arith.mulf %374, %375 : vector<48x128xf32>
    %377 = arith.addf %369, %376 : vector<48x128xf32>
    %378 = vector.broadcast %22 : vector<1x128xf32> to vector<48x128xf32>
    %379 = arith.mulf %374, %378 : vector<48x128xf32>
    %380 = arith.addf %372, %379 : vector<48x128xf32>
    %c5_131 = arith.constant 5 : index
    %c3_132 = arith.constant 3 : index
    %c0_133 = arith.constant 0 : index
    %c0_134 = arith.constant 0 : index
    %381 = vector.load %arg1[%c5_131, %c3_132, %c0_133, %c0_134] : memref<6x6x48x128xf32, #tpu.memory_space<vmem>>, vector<1x1x48x128xf32>
    %382 = vector.shape_cast %381 : vector<1x1x48x128xf32> to vector<48x128xf32>
    %383 = vector.broadcast %24 : vector<1x128xf32> to vector<48x128xf32>
    %384 = arith.mulf %382, %383 : vector<48x128xf32>
    %385 = arith.addf %377, %384 : vector<48x128xf32>
    %386 = vector.broadcast %23 : vector<1x128xf32> to vector<48x128xf32>
    %387 = arith.mulf %382, %386 : vector<48x128xf32>
    %388 = arith.addf %380, %387 : vector<48x128xf32>
    %c5_135 = arith.constant 5 : index
    %c4_136 = arith.constant 4 : index
    %c0_137 = arith.constant 0 : index
    %c0_138 = arith.constant 0 : index
    %389 = vector.load %arg1[%c5_135, %c4_136, %c0_137, %c0_138] : memref<6x6x48x128xf32, #tpu.memory_space<vmem>>, vector<1x1x48x128xf32>
    %390 = vector.shape_cast %389 : vector<1x1x48x128xf32> to vector<48x128xf32>
    %391 = vector.broadcast %25 : vector<1x128xf32> to vector<48x128xf32>
    %392 = arith.mulf %390, %391 : vector<48x128xf32>
    %393 = arith.addf %385, %392 : vector<48x128xf32>
    %394 = vector.broadcast %24 : vector<1x128xf32> to vector<48x128xf32>
    %395 = arith.mulf %390, %394 : vector<48x128xf32>
    %396 = arith.addf %388, %395 : vector<48x128xf32>
    %c5_139 = arith.constant 5 : index
    %c5_140 = arith.constant 5 : index
    %c0_141 = arith.constant 0 : index
    %c0_142 = arith.constant 0 : index
    %397 = vector.load %arg1[%c5_139, %c5_140, %c0_141, %c0_142] : memref<6x6x48x128xf32, #tpu.memory_space<vmem>>, vector<1x1x48x128xf32>
    %398 = vector.shape_cast %397 : vector<1x1x48x128xf32> to vector<48x128xf32>
    %399 = vector.broadcast %25 : vector<1x128xf32> to vector<48x128xf32>
    %400 = arith.mulf %398, %399 : vector<48x128xf32>
    %401 = arith.addf %396, %400 : vector<48x128xf32>
    %402 = arith.maximumf %342, %356 : vector<48x128xf32>
    %403 = arith.maximumf %393, %401 : vector<48x128xf32>
    %404 = arith.maximumf %402, %403 : vector<48x128xf32>
    %c0_143 = arith.constant 0 : index
    %c0_144 = arith.constant 0 : index
    %405 = vector.load %arg3[%c0_143, %c0_144] : memref<1x128xf32, #tpu.memory_space<vmem>>, vector<1x128xf32>
    %406 = vector.broadcast %405 : vector<1x128xf32> to vector<48x128xf32>
    %407 = arith.addf %404, %406 : vector<48x128xf32>
    %cst_145 = arith.constant 0.000000e+00 : f32
    %408 = vector.broadcast %cst_145 : f32 to vector<48x128xf32>
    %409 = arith.maximumf %407, %408 : vector<48x128xf32>
    %410 = vector.extract_strided_slice %409 {offsets = [0, 0], sizes = [16, 128], strides = [1, 1]} : vector<48x128xf32> to vector<16x128xf32>
    %411 = vector.extract_strided_slice %409 {offsets = [24, 0], sizes = [16, 128], strides = [1, 1]} : vector<48x128xf32> to vector<16x128xf32>
    %412 = tpu.concatenate %410, %411 in 0 : vector<16x128xf32>, vector<16x128xf32> -> vector<32x128xf32>
    %413 = vector.extract_strided_slice %409 {offsets = [1, 0], sizes = [16, 128], strides = [1, 1]} : vector<48x128xf32> to vector<16x128xf32>
    %414 = vector.extract_strided_slice %409 {offsets = [25, 0], sizes = [16, 128], strides = [1, 1]} : vector<48x128xf32> to vector<16x128xf32>
    %415 = tpu.concatenate %413, %414 in 0 : vector<16x128xf32>, vector<16x128xf32> -> vector<32x128xf32>
    %416 = vector.extract_strided_slice %409 {offsets = [2, 0], sizes = [16, 128], strides = [1, 1]} : vector<48x128xf32> to vector<16x128xf32>
    %417 = vector.extract_strided_slice %409 {offsets = [26, 0], sizes = [16, 128], strides = [1, 1]} : vector<48x128xf32> to vector<16x128xf32>
    %418 = tpu.concatenate %416, %417 in 0 : vector<16x128xf32>, vector<16x128xf32> -> vector<32x128xf32>
    %419 = vector.extract_strided_slice %409 {offsets = [3, 0], sizes = [16, 128], strides = [1, 1]} : vector<48x128xf32> to vector<16x128xf32>
    %420 = vector.extract_strided_slice %409 {offsets = [27, 0], sizes = [16, 128], strides = [1, 1]} : vector<48x128xf32> to vector<16x128xf32>
    %421 = tpu.concatenate %419, %420 in 0 : vector<16x128xf32>, vector<16x128xf32> -> vector<32x128xf32>
    %422 = vector.extract_strided_slice %409 {offsets = [4, 0], sizes = [16, 128], strides = [1, 1]} : vector<48x128xf32> to vector<16x128xf32>
    %423 = vector.extract_strided_slice %409 {offsets = [28, 0], sizes = [16, 128], strides = [1, 1]} : vector<48x128xf32> to vector<16x128xf32>
    %424 = tpu.concatenate %422, %423 in 0 : vector<16x128xf32>, vector<16x128xf32> -> vector<32x128xf32>
    %425 = tpu.concatenate %412, %415, %418, %421, %424 in 1 : vector<32x128xf32>, vector<32x128xf32>, vector<32x128xf32>, vector<32x128xf32>, vector<32x128xf32> -> vector<32x640xf32>
    %c0_146 = arith.constant 0 : index
    %c0_147 = arith.constant 0 : index
    %426 = vector.load %arg4[%c0_146, %c0_147] : memref<640x224xf32, #tpu.memory_space<vmem>>, vector<640x224xf32>
    %cst_148 = arith.constant dense<0.000000e+00> : vector<32x224xf32>
    %427 = tpu.matmul %425, %426, %cst_148 {dimension_numbers = #tpu.dot_dimension_numbers<[1], [0], [0], [1], [0, 0, 1, 1], [], []>} : vector<32x640xf32>, vector<640x224xf32>, vector<32x224xf32> -> vector<32x224xf32>
    %428 = vector.extract_strided_slice %427 {offsets = [0, 0], sizes = [32, 208], strides = [1, 1]} : vector<32x224xf32> to vector<32x208xf32>
    %429 = vector.extract_strided_slice %427 {offsets = [0, 16], sizes = [32, 208], strides = [1, 1]} : vector<32x224xf32> to vector<32x208xf32>
    %430 = arith.maximumf %428, %429 : vector<32x208xf32>
    %431 = vector.extract_strided_slice %430 {offsets = [0, 0], sizes = [31, 208], strides = [1, 1]} : vector<32x208xf32> to vector<31x208xf32>
    %432 = vector.extract_strided_slice %430 {offsets = [1, 0], sizes = [31, 208], strides = [1, 1]} : vector<32x208xf32> to vector<31x208xf32>
    %433 = arith.maximumf %431, %432 : vector<31x208xf32>
    %c0_149 = arith.constant 0 : index
    %c0_150 = arith.constant 0 : index
    %434 = vector.load %arg5[%c0_149, %c0_150] : memref<1x208xf32, #tpu.memory_space<vmem>>, vector<1x208xf32>
    %435 = vector.broadcast %434 : vector<1x208xf32> to vector<31x208xf32>
    %436 = arith.addf %433, %435 : vector<31x208xf32>
    %cst_151 = arith.constant 0.000000e+00 : f32
    %437 = vector.broadcast %cst_151 : f32 to vector<31x208xf32>
    %438 = arith.maximumf %436, %437 : vector<31x208xf32>
    %c0_152 = arith.constant 0 : index
    %c0_153 = arith.constant 0 : index
    %439 = vector.load %arg6[%c0_152, %c0_153] : memref<208x360xf32, #tpu.memory_space<vmem>>, vector<208x360xf32>
    %cst_154 = arith.constant dense<0.000000e+00> : vector<31x360xf32>
    %440 = tpu.matmul %438, %439, %cst_154 {dimension_numbers = #tpu.dot_dimension_numbers<[1], [0], [0], [1], [0, 0, 1, 1], [], []>} : vector<31x208xf32>, vector<208x360xf32>, vector<31x360xf32> -> vector<31x360xf32>
    %c0_155 = arith.constant 0 : index
    %c0_156 = arith.constant 0 : index
    %441 = vector.load %arg7[%c0_155, %c0_156] : memref<208x360xf32, #tpu.memory_space<vmem>>, vector<208x360xf32>
    %cst_157 = arith.constant dense<0.000000e+00> : vector<31x360xf32>
    %442 = tpu.matmul %438, %441, %cst_157 {dimension_numbers = #tpu.dot_dimension_numbers<[1], [0], [0], [1], [0, 0, 1, 1], [], []>} : vector<31x208xf32>, vector<208x360xf32>, vector<31x360xf32> -> vector<31x360xf32>
    %443 = vector.extract_strided_slice %440 {offsets = [0, 0], sizes = [29, 360], strides = [1, 1]} : vector<31x360xf32> to vector<29x360xf32>
    %444 = vector.extract_strided_slice %442 {offsets = [2, 0], sizes = [29, 360], strides = [1, 1]} : vector<31x360xf32> to vector<29x360xf32>
    %445 = arith.addf %443, %444 : vector<29x360xf32>
    %c0_158 = arith.constant 0 : index
    %c0_159 = arith.constant 0 : index
    %446 = vector.load %arg8[%c0_158, %c0_159] : memref<1x360xf32, #tpu.memory_space<vmem>>, vector<1x360xf32>
    %447 = vector.broadcast %446 : vector<1x360xf32> to vector<29x360xf32>
    %448 = arith.addf %445, %447 : vector<29x360xf32>
    %cst_160 = arith.constant 0.000000e+00 : f32
    %449 = vector.broadcast %cst_160 : f32 to vector<29x360xf32>
    %450 = arith.maximumf %448, %449 : vector<29x360xf32>
    %c0_161 = arith.constant 0 : index
    %c0_162 = arith.constant 0 : index
    %451 = vector.load %arg9[%c0_161, %c0_162] : memref<360x252xf32, #tpu.memory_space<vmem>>, vector<360x252xf32>
    %cst_163 = arith.constant dense<0.000000e+00> : vector<29x252xf32>
    %452 = tpu.matmul %450, %451, %cst_163 {dimension_numbers = #tpu.dot_dimension_numbers<[1], [0], [0], [1], [0, 0, 1, 1], [], []>} : vector<29x360xf32>, vector<360x252xf32>, vector<29x252xf32> -> vector<29x252xf32>
    %c0_164 = arith.constant 0 : index
    %c0_165 = arith.constant 0 : index
    %453 = vector.load %arg10[%c0_164, %c0_165] : memref<1x252xf32, #tpu.memory_space<vmem>>, vector<1x252xf32>
    %454 = vector.broadcast %453 : vector<1x252xf32> to vector<29x252xf32>
    %455 = arith.addf %452, %454 : vector<29x252xf32>
    %cst_166 = arith.constant 0.000000e+00 : f32
    %456 = vector.broadcast %cst_166 : f32 to vector<29x252xf32>
    %457 = arith.maximumf %455, %456 : vector<29x252xf32>
    %c0_167 = arith.constant 0 : index
    %c0_168 = arith.constant 0 : index
    %458 = vector.load %arg11[%c0_167, %c0_168] : memref<252x3xf32, #tpu.memory_space<vmem>>, vector<252x3xf32>
    %cst_169 = arith.constant dense<0.000000e+00> : vector<29x3xf32>
    %459 = tpu.matmul %457, %458, %cst_169 {dimension_numbers = #tpu.dot_dimension_numbers<[1], [0], [0], [1], [0, 0, 1, 1], [], []>} : vector<29x252xf32>, vector<252x3xf32>, vector<29x3xf32> -> vector<29x3xf32>
    %c0_170 = arith.constant 0 : index
    %c0_171 = arith.constant 0 : index
    %460 = vector.load %arg12[%c0_170, %c0_171] : memref<1x1xf32, #tpu.memory_space<vmem>>, vector<1x1xf32>
    %461 = vector.broadcast %460 : vector<1x1xf32> to vector<29x3xf32>
    %462 = arith.addf %459, %461 : vector<29x3xf32>
    %463 = vector.extract_strided_slice %462 {offsets = [0, 0], sizes = [1, 3], strides = [1, 1]} : vector<29x3xf32> to vector<1x3xf32>
    %464 = vector.extract_strided_slice %462 {offsets = [5, 0], sizes = [1, 3], strides = [1, 1]} : vector<29x3xf32> to vector<1x3xf32>
    %465 = vector.extract_strided_slice %462 {offsets = [10, 0], sizes = [1, 3], strides = [1, 1]} : vector<29x3xf32> to vector<1x3xf32>
    %466 = vector.extract_strided_slice %462 {offsets = [16, 0], sizes = [1, 3], strides = [1, 1]} : vector<29x3xf32> to vector<1x3xf32>
    %467 = vector.extract_strided_slice %462 {offsets = [21, 0], sizes = [1, 3], strides = [1, 1]} : vector<29x3xf32> to vector<1x3xf32>
    %468 = vector.extract_strided_slice %462 {offsets = [26, 0], sizes = [1, 3], strides = [1, 1]} : vector<29x3xf32> to vector<1x3xf32>
    %469 = tpu.concatenate %463, %464, %465, %466, %467, %468 in 0 : vector<1x3xf32>, vector<1x3xf32>, vector<1x3xf32>, vector<1x3xf32>, vector<1x3xf32>, vector<1x3xf32> -> vector<6x3xf32>
    %c0_172 = arith.constant 0 : index
    %c0_173 = arith.constant 0 : index
    %470 = vector.load %arg13[%c0_172, %c0_173] : memref<6x3xf32, #tpu.memory_space<vmem>>, vector<6x3xf32>
    tpu.vector_store %arg13[%c0_172, %c0_173], %469 {strides = array<i32>} : memref<6x3xf32, #tpu.memory_space<vmem>>, vector<6x3xf32>,
    return
  }
  func.func @transform_0(%arg0: i32) -> (i32, i32, i32, i32) {
    %c0_i32 = arith.constant 0 : i32
    %c0_i32_0 = arith.constant 0 : i32
    %c0_i32_1 = arith.constant 0 : i32
    %c0_i32_2 = arith.constant 0 : i32
    %c0_i32_3 = arith.constant 0 : i32
    return %c0_i32, %c0_i32_0, %c0_i32_1, %c0_i32_2 : i32, i32, i32, i32
  }
  func.func @transform_1(%arg0: i32) -> (i32, i32) {
    %c0_i32 = arith.constant 0 : i32
    %c0_i32_0 = arith.constant 0 : i32
    %c0_i32_1 = arith.constant 0 : i32
    return %c0_i32, %c0_i32_0 : i32, i32
  }
  func.func @transform_2(%arg0: i32) -> (i32, i32) {
    %c0_i32 = arith.constant 0 : i32
    %c0_i32_0 = arith.constant 0 : i32
    %c0_i32_1 = arith.constant 0 : i32
    return %c0_i32, %c0_i32_0 : i32, i32
  }
  func.func @transform_3(%arg0: i32) -> (i32, i32) {
    %c0_i32 = arith.constant 0 : i32
    %c0_i32_0 = arith.constant 0 : i32
    %c0_i32_1 = arith.constant 0 : i32
    return %c0_i32, %c0_i32_0 : i32, i32
  }
  func.func @transform_4(%arg0: i32) -> (i32, i32) {
    %c0_i32 = arith.constant 0 : i32
    %c0_i32_0 = arith.constant 0 : i32
    %c0_i32_1 = arith.constant 0 : i32
    return %c0_i32, %c0_i32_0 : i32, i32
  }
  func.func @transform_5(%arg0: i32) -> (i32, i32) {
    %c0_i32 = arith.constant 0 : i32
    %c0_i32_0 = arith.constant 0 : i32
    %c0_i32_1 = arith.constant 0 : i32
    return %c0_i32, %c0_i32_0 : i32, i32
  }
  func.func @transform_6(%arg0: i32) -> (i32, i32) {
    %c0_i32 = arith.constant 0 : i32
    %c0_i32_0 = arith.constant 0 : i32
    %c0_i32_1 = arith.constant 0 : i32
    return %c0_i32, %c0_i32_0 : i32, i32
  }
  func.func @transform_7(%arg0: i32) -> (i32, i32) {
    %c0_i32 = arith.constant 0 : i32
    %c0_i32_0 = arith.constant 0 : i32
    %c0_i32_1 = arith.constant 0 : i32
    return %c0_i32, %c0_i32_0 : i32, i32
  }
  func.func @transform_8(%arg0: i32) -> (i32, i32) {
    %c0_i32 = arith.constant 0 : i32
    %c0_i32_0 = arith.constant 0 : i32
    %c0_i32_1 = arith.constant 0 : i32
    return %c0_i32, %c0_i32_0 : i32, i32
  }
  func.func @transform_9(%arg0: i32) -> (i32, i32) {
    %c0_i32 = arith.constant 0 : i32
    %c0_i32_0 = arith.constant 0 : i32
    %c0_i32_1 = arith.constant 0 : i32
    return %c0_i32, %c0_i32_0 : i32, i32
  }
  func.func @transform_10(%arg0: i32) -> (i32, i32) {
    %c0_i32 = arith.constant 0 : i32
    %c0_i32_0 = arith.constant 0 : i32
    %c0_i32_1 = arith.constant 0 : i32
    return %c0_i32, %c0_i32_0 : i32, i32
  }
  func.func @transform_11(%arg0: i32) -> (i32, i32) {
    %c0_i32 = arith.constant 0 : i32
    %c0_i32_0 = arith.constant 0 : i32
    %c0_i32_1 = arith.constant 0 : i32
    return %c0_i32, %c0_i32_0 : i32, i32
  }
  func.func @transform_12(%arg0: i32) -> (i32, i32) {
    %c0_i32 = arith.constant 0 : i32
    %c0_i32_0 = arith.constant 0 : i32
    %c0_i32_1 = arith.constant 0 : i32
    return %c0_i32, %c0_i32_0 : i32, i32
  }
}

</mosaic_0001>

<bundles_post_ra>
// kernel: tile.29
= control target key start
LH: loop header
LB: loop body
LE: loop exit
PB: predicated region body
PF: predicated region fallthrough
CT: control target
= control target key end

     0   :  { %vm3_vm0 = vcmask 203776   ;;  %s260_s0 = inlined_call_operand.vmem [shape: f32[25,18,6], index: 0, kind: input, shape index: {}]   ;;  %s261_s1 = inlined_call_operand.vmem [shape: f32[25,108], index: 1, kind: output, shape index: {}]  }
   0x1   :  { %v2_v0 = vld [vmem:[%s260_s0] sm:$0x3f]   ;;  %v90_v1 = vld [vmem:[%s260_s0 + $0x8] sm:$0x3f]   ;;  %v92_v2 = vld [vmem:[%s260_s0 + $0x10] sm:$0x3f]  }
   0x2   :  { %4 = vst.msk [vmem:[%s261_s1] sm:$0x3f] %vm3_vm0, %v2_v0   ;;  %91 = vst.msk [vmem:[%s261_s1 + $0x6] sm:$0x3f] %vm3_vm0, %v90_v1   ;;  %v94_v3 = vld [vmem:[%s260_s0 + $0x18] sm:$0x3f]  }
   0x3   :  { %93 = vst.msk [vmem:[%s261_s1 + $0xc] sm:$0x3f] %vm3_vm0, %v92_v2   ;;  %v96_v4 = vld [vmem:[%s260_s0 + $0x20] sm:$0x3f]   ;;  %v98_v5 = vld [vmem:[%s260_s0 + $0x28] sm:$0x3f]  }
   0x4   :  { %95 = vst.msk [vmem:[%s261_s1 + $0x12] sm:$0x3f] %vm3_vm0, %v94_v3   ;;  %97 = vst.msk [vmem:[%s261_s1 + $0x18] sm:$0x3f] %vm3_vm0, %v96_v4   ;;  %v100_v6 = vld [vmem:[%s260_s0 + $0x30] sm:$0x3f]  }
   0x5   :  { %99 = vst.msk [vmem:[%s261_s1 + $0x1e] sm:$0x3f] %vm3_vm0, %v98_v5   ;;  %v102_v7 = vld [vmem:[%s260_s0 + $0x38] sm:$0x3f]   ;;  %v104_v8 = vld [vmem:[%s260_s0 + $0x40] sm:$0x3f]  }
   0x6   :  { %101 = vst.msk [vmem:[%s261_s1 + $0x24] sm:$0x3f] %vm3_vm0, %v100_v6   ;;  %103 = vst.msk [vmem:[%s261_s1 + $0x2a] sm:$0x3f] %vm3_vm0, %v102_v7   ;;  %v106_v9 = vld [vmem:[%s260_s0 + $0x48] sm:$0x3f]  }
   0x7   :  { %105 = vst.msk [vmem:[%s261_s1 + $0x30] sm:$0x3f] %vm3_vm0, %v104_v8   ;;  %v108_v10 = vld [vmem:[%s260_s0 + $0x50] sm:$0x3f]   ;;  %v110_v11 = vld [vmem:[%s260_s0 + $0x58] sm:$0x3f]  }
   0x8   :  { %107 = vst.msk [vmem:[%s261_s1 + $0x36] sm:$0x3f] %vm3_vm0, %v106_v9   ;;  %109 = vst.msk [vmem:[%s261_s1 + $0x3c] sm:$0x3f] %vm3_vm0, %v108_v10   ;;  %v112_v12 = vld [vmem:[%s260_s0 + $0x60] sm:$0x3f]  }
   0x9   :  { %111 = vst.msk [vmem:[%s261_s1 + $0x42] sm:$0x3f] %vm3_vm0, %v110_v11   ;;  %v114_v13 = vld [vmem:[%s260_s0 + $0x68] sm:$0x3f]   ;;  %v116_v14 = vld [vmem:[%s260_s0 + $0x70] sm:$0x3f]  }
   0xa   :  { %113 = vst.msk [vmem:[%s261_s1 + $0x48] sm:$0x3f] %vm3_vm0, %v112_v12   ;;  %115 = vst.msk [vmem:[%s261_s1 + $0x4e] sm:$0x3f] %vm3_vm0, %v114_v13   ;;  %v118_v15 = vld [vmem:[%s260_s0 + $0x78] sm:$0x3f]  }
   0xb   :  { %117 = vst.msk [vmem:[%s261_s1 + $0x54] sm:$0x3f] %vm3_vm0, %v116_v14   ;;  %v120_v16 = vld [vmem:[%s260_s0 + $0x80] sm:$0x3f]   ;;  %v122_v17 = vld [vmem:[%s260_s0 + $0x88] sm:$0x3f]  }
   0xc   :  { %119 = vst.msk [vmem:[%s261_s1 + $0x5a] sm:$0x3f] %vm3_vm0, %v118_v15   ;;  %121 = vst.msk [vmem:[%s261_s1 + $0x60] sm:$0x3f] %vm3_vm0, %v120_v16  }
   0xd   :  { %123 = vst.msk [vmem:[%s261_s1 + $0x66] sm:$0x3f] %vm3_vm0, %v122_v17  }

// kernel: tile.33
= control target key start
LH: loop header
LB: loop body
LE: loop exit
PB: predicated region body
PF: predicated region fallthrough
CT: control target
= control target key end

     0   :  { %s34_s0 = inlined_call_operand.vmem [shape: f32[6], index: 0, kind: input, shape index: {}]   ;;  %s35_s1 = inlined_call_operand.vmem [shape: f32[18,6], index: 1, kind: output, shape index: {}]  }
   0x1   :  { %v4_v0 = vld [vmem:[%s34_s0] ss:$0 sm:$0xff] }
   0x2   :  { %5 = vst [vmem:[%s35_s1] sm:$0xff] %v4_v0  ;;  %10 = vst [vmem:[%s35_s1 + $0x8] sm:$0xff] %v4_v0 }
   0x3   :  { %11 = vst [vmem:[%s35_s1 + $0x10] sm:$0xff] %v4_v0 }

// kernel: tile.34
= control target key start
LH: loop header
LB: loop body
LE: loop exit
PB: predicated region body
PF: predicated region fallthrough
CT: control target
= control target key end

     0   :  { %s147_s10 = smov 102   ;;  %s148_s11 = smov 90   ;;  %vm3_vm0 = vcmask 48128   ;;  %vm9_vm1 = vcmask 884528   ;;  %vm15_vm2 = vcmask 835328   ;;  %vm21_vm3 = vcmask 786128   ;;  %s231_s0 = inlined_call_operand.vmem [shape: f32[18,6], index: 0, kind: input, shape index: {}]   ;;  %s232_s1 = inlined_call_operand.vmem [shape: f32[108], index: 1, kind: output, shape index: {}]  }
   0x1   :  { %v113_v0 = vld [vmem:[%s231_s0 + $0x11] sm:$0x1]   ;;  %v115_v1 = vld [vmem:[%s231_s0 + $0xf] sm:$0x1]   ;;  %v114_v2 = vld [vmem:[%s231_s0 + $0x10] sm:$0x1]  }
   0x2   :  { %7 = vrot.lane.b32.xlu0 %v113_v0, %s147_s10  ;;  %19 = vrot.lane.b32.xlu1 %v115_v1, %s148_s11  ;;  %v116_v3 = vld [vmem:[%s231_s0 + $0xe] sm:$0x1]   ;;  %s149_s16 = smov 96   ;;  %s150_s17 = smov 84   ;;  %v117_v4 = vld [vmem:[%s231_s0 + $0xd] sm:$0x1]  }
   0x3   :  { %v118_v5 = vld [vmem:[%s231_s0 + $0xc] sm:$0x1]   ;;  %v2_v6 = vld [vmem:[%s231_s0] sm:$0x1]   ;;  %s151_s24 = smov 78   ;;  %s152_s25 = smov 72  }
   0x4   :  { %v119_v7 = vld [vmem:[%s231_s0 + $0xb] sm:$0x1]   ;;  %v120_v8 = vld [vmem:[%s231_s0 + $0xa] sm:$0x1]   ;;  %4 = vst.msk [vmem:[#allocation0] sm:$0x1] %vm3_vm0, %v2_v6  }
   0x5   :  { %s153_s30 = smov 66   ;;  %s154_s2 = smov 60   ;;  %v121_v9 = vld [vmem:[%s231_s0 + $0x9] sm:$0x1]   ;;  %v122_v10 = vld [vmem:[%s231_s0 + $0x8] sm:$0x1]  }
   0x6   :  { %13 = vrot.lane.b32.xlu0 %v114_v2, %s149_s16  ;;  %25 = vrot.lane.b32.xlu1 %v116_v3, %s150_s17  ;;  %s155_s7 = smov 54   ;;  %s156_s8 = smov 48   ;;  %v123_v11 = vld [vmem:[%s231_s0 + $0x7] sm:$0x1]   ;;  %v124_v12 = vld [vmem:[%s231_s0 + $0x6] sm:$0x1]  }
   0x7   :  { %s157_s13 = smov 42   ;;  %s158_s14 = smov 36   ;;  %v125_v13 = vld [vmem:[%s231_s0 + $0x5] sm:$0x1]   ;;  %v126_v14 = vld [vmem:[%s231_s0 + $0x4] sm:$0x1]  }
   0x8   :  { %s159_s19 = smov 30   ;;  %s160_s20 = smov 24   ;;  %v127_v15 = vld [vmem:[%s231_s0 + $0x3] sm:$0x1]   ;;  %v128_v16 = vld [vmem:[%s231_s0 + $0x2] sm:$0x1]  }
   0x9   :  { %s162_s26 = smov 12   ;;  %v129_v17 = vld [vmem:[%s231_s0 + $0x1] sm:$0x1]   ;;  %s163_s0 = smov 6   ;;  %vm27_vm4 = vcmask 736928   ;;  %vm33_vm5 = vcmask 687728  }
   0xa   :  { %31 = vrot.lane.b32.xlu0 %v117_v4, %s151_s24  ;;  %37 = vrot.lane.b32.xlu1 %v118_v5, %s152_s25  ;;  %s161_s25 = smov 18   ;;  %vm39_vm6 = vcmask 638528   ;;  %vm45_vm7 = vcmask 589328   ;;  %vm51_vm8 = vcmask 540128   ;;  %vm57_vm9 = vcmask 490928  }
   0xb   :  { %vm63_vm10 = vcmask 441728   ;;  %vm69_vm11 = vcmask 392528   ;;  %vm75_vm12 = vcmask 343328   ;;  %vm81_vm13 = vcmask 294128  }
   0xc   :  { %vm87_vm14 = vcmask 244928   ;;  %vm93_vm15 = vcmask 195728   ;;  %vm99_vm0 = vcmask 146528  }
   0xe   :  { %43 = vrot.lane.b32.xlu0 %v119_v7, %s153_s30  ;;  %49 = vrot.lane.b32.xlu1 %v120_v8, %s154_s2 }
  0x12   :  { %55 = vrot.lane.b32.xlu0 %v121_v9, %s155_s7  ;;  %61 = vrot.lane.b32.xlu1 %v122_v10, %s156_s8 }
  0x16   :  { %67 = vrot.lane.b32.xlu0 %v123_v11, %s157_s13  ;;  %73 = vrot.lane.b32.xlu1 %v124_v12, %s158_s14 }
  0x1a   :  { %79 = vrot.lane.b32.xlu0 %v125_v13, %s159_s19  ;;  %85 = vrot.lane.b32.xlu1 %v126_v14, %s160_s20 }
  0x1e   :  { %91 = vrot.lane.b32.xlu0 %v127_v15, %s161_s25  ;;  %97 = vrot.lane.b32.xlu1 %v128_v16, %s162_s26 }
  0x22   :  { %103 = vrot.lane.b32.xlu0 %v129_v17, %s163_s0 }
  0x74   :  { %v8_v18 = vpop.permute.xlu0 %7   ;;  %v20_v19 = vpop.permute.xlu1 %19  }
  0x75   :  { %10 = vst.msk [vmem:[#allocation0] sm:$0x1] %vm9_vm1, %v8_v18   ;;  %vm105_vm1 = vcmask 97328  }
  0x78   :  { %v14_v20 = vpop.permute.xlu0 %13   ;;  %v26_v21 = vpop.permute.xlu1 %25  }
  0x79   :  { %16 = vst.msk [vmem:[#allocation0] sm:$0x1] %vm15_vm2, %v14_v20  }
  0x7a   :  { %22 = vst.msk [vmem:[#allocation0] sm:$0x1] %vm21_vm3, %v20_v19  }
  0x7b   :  { %28 = vst.msk [vmem:[#allocation0] sm:$0x1] %vm27_vm4, %v26_v21  }
  0x7c   :  { %v32_v22 = vpop.permute.xlu0 %31   ;;  %v38_v23 = vpop.permute.xlu1 %37  }
  0x7d   :  { %34 = vst.msk [vmem:[#allocation0] sm:$0x1] %vm33_vm5, %v32_v22  }
  0x7e   :  { %40 = vst.msk [vmem:[#allocation0] sm:$0x1] %vm39_vm6, %v38_v23  }
  0x80   :  { %v44_v24 = vpop.permute.xlu0 %43   ;;  %v50_v25 = vpop.permute.xlu1 %49  }
  0x81   :  { %46 = vst.msk [vmem:[#allocation0] sm:$0x1] %vm45_vm7, %v44_v24  }
  0x82   :  { %52 = vst.msk [vmem:[#allocation0] sm:$0x1] %vm51_vm8, %v50_v25  }
  0x84   :  { %v56_v26 = vpop.permute.xlu0 %55   ;;  %v62_v27 = vpop.permute.xlu1 %61  }
  0x85   :  { %58 = vst.msk [vmem:[#allocation0] sm:$0x1] %vm57_vm9, %v56_v26  }
  0x86   :  { %64 = vst.msk [vmem:[#allocation0] sm:$0x1] %vm63_vm10, %v62_v27  }
  0x88   :  { %v68_v28 = vpop.permute.xlu0 %67   ;;  %v74_v29 = vpop.permute.xlu1 %73  }
  0x89   :  { %70 = vst.msk [vmem:[#allocation0] sm:$0x1] %vm69_vm11, %v68_v28  }
  0x8a   :  { %76 = vst.msk [vmem:[#allocation0] sm:$0x1] %vm75_vm12, %v74_v29  }
  0x8c   :  { %v80_v30 = vpop.permute.xlu0 %79   ;;  %v86_v31 = vpop.permute.xlu1 %85  }
  0x8d   :  { %82 = vst.msk [vmem:[#allocation0] sm:$0x1] %vm81_vm13, %v80_v30  }
  0x8e   :  { %88 = vst.msk [vmem:[#allocation0] sm:$0x1] %vm87_vm14, %v86_v31  }
  0x90   :  { %v92_v32 = vpop.permute.xlu0 %91   ;;  %v98_v33 = vpop.permute.xlu1 %97  }
  0x91   :  { %94 = vst.msk [vmem:[#allocation0] sm:$0x1] %vm93_vm15, %v92_v32  }
  0x92   :  { %100 = vst.msk [vmem:[#allocation0] sm:$0x1] %vm99_vm0, %v98_v33  }
  0x94   :  { %v104_v34 = vpop.permute.xlu0 %103  }
  0x95   :  { %106 = vst.msk [vmem:[#allocation0] sm:$0x1] %vm105_vm1, %v104_v34  }
  0x9c   :  { %v110_v35 = vld [vmem:[#allocation0] sm:$0x1] }
  0x9d   :  { %112 = vst [vmem:[%s232_s1] sm:$0x1] %v110_v35 }

// kernel: tile.38
= control target key start
LH: loop header
LB: loop body
LE: loop exit
PB: predicated region body
PF: predicated region fallthrough
CT: control target
= control target key end

     0   :  { %s28_s0 = inlined_call_operand.vmem [shape: f32[16], index: 0, kind: input, shape index: {}]   ;;  %s29_s1 = inlined_call_operand.vmem [shape: f32[13,16], index: 1, kind: output, shape index: {}]  }
   0x1   :  { %v4_v0 = vld [vmem:[%s28_s0] ss:$0 sm:$0xff] }
   0x2   :  { %5 = vst [vmem:[%s29_s1] sm:$0xff] %v4_v0  ;;  %8 = vst [vmem:[%s29_s1 + $0x8] sm:$0xff] %v4_v0 }

// kernel: tile.39
= control target key start
LH: loop header
LB: loop body
LE: loop exit
PB: predicated region body
PF: predicated region fallthrough
CT: control target
= control target key end

     0   :  { %s78_s10 = smov 112   ;;  %s79_s11 = smov 80   ;;  %vm4_vm0 = vcmask 130048   ;;  %vm10_vm1 = vcmask 1048448   ;;  %vm16_vm2 = vcmask 917248   ;;  %vm22_vm3 = vcmask 786048   ;;  %s125_s0 = inlined_call_operand.vmem [shape: f32[13,16], index: 0, kind: input, shape index: {}]   ;;  %s126_s1 = inlined_call_operand.vmem [shape: f32[1,208], index: 1, kind: output, shape index: {}]  }
   0x1   :  { %v63_v0 = vld [vmem:[%s125_s0 + $0x7] sm:$0x1]   ;;  %v65_v1 = vld [vmem:[%s125_s0 + $0x5] sm:$0x1]   ;;  %s25_s12 = smov 3  ;;  %s32_s17 = smov 3 }
   0x2   :  { %8 = vrot.lane.b32.xlu0 %v63_v0, %s78_s10  ;;  %20 = vrot.lane.b32.xlu1 %v65_v1, %s79_s11  ;;  %v64_v2 = vld [vmem:[%s125_s0 + $0x6] sm:$0x1]   ;;  %s39_s18 = smov 3  ;;  %s80_s19 = smov 96   ;;  %vm29_vm4 = vcmask 654848   ;;  %vm36_vm5 = vcmask 523648  }
   0x3   :  { %v66_v3 = vld [vmem:[%s125_s0 + $0x4] ss:$8 sm:%s25_s12]   ;;  %s81_s20 = smov 64   ;;  %v67_v4 = vld [vmem:[%s125_s0 + $0x3] ss:$8 sm:%s32_s17]   ;;  %s2_s23 = smov 3 }
   0x4   :  { %v68_v5 = vld [vmem:[%s125_s0 + $0x2] ss:$8 sm:%s39_s18]   ;;  %v3_v6 = vld [vmem:[%s125_s0] ss:$8 sm:%s2_s23]   ;;  %s46_s28 = smov 3  ;;  %s82_s29 = smov 48  }
   0x5   :  { %5 = vst.msk [vmem:[#allocation0] ss:$8 sm:$0x3] %vm4_vm0, %v3_v6   ;;  %s83_s30 = smov 32   ;;  %v69_v7 = vld [vmem:[%s125_s0 + $0x1] ss:$8 sm:%s46_s28]  }
   0x6   :  { %14 = vrot.lane.b32.xlu0 %v64_v2, %s80_s19  ;;  %27 = vrot.lane.b32.xlu1 %v66_v3, %s81_s20  ;;  %s84_s0 = smov 16   ;;  %vm43_vm6 = vcmask 392448   ;;  %vm50_vm7 = vcmask 261248  }
   0xa   :  { %34 = vrot.lane.b32.xlu0 %v67_v4, %s82_s29  ;;  %41 = vrot.lane.b32.xlu1 %v68_v5, %s83_s30 }
   0xe   :  { %48 = vrot.lane.b32.xlu0 %v69_v7, %s84_s0 }
  0x74   :  { %v9_v8 = vpop.permute.xlu0 %8   ;;  %v21_v9 = vpop.permute.xlu1 %20  }
  0x75   :  { %11 = vst.msk [vmem:[#allocation0] sm:$0x1] %vm10_vm1, %v9_v8  }
  0x78   :  { %v15_v10 = vpop.permute.xlu0 %14   ;;  %v28_v11 = vpop.permute.xlu1 %27  }
  0x79   :  { %17 = vst.msk [vmem:[#allocation0] sm:$0x1] %vm16_vm2, %v15_v10  }
  0x7a   :  { %23 = vst.msk [vmem:[#allocation0] sm:$0x1] %vm22_vm3, %v21_v9  }
  0x7b   :  { %30 = vst.msk [vmem:[#allocation0] ss:$8 sm:$0x3] %vm29_vm4, %v28_v11  }
  0x7c   :  { %v35_v12 = vpop.permute.xlu0 %34   ;;  %v42_v13 = vpop.permute.xlu1 %41  }
  0x7d   :  { %37 = vst.msk [vmem:[#allocation0] ss:$8 sm:$0x3] %vm36_vm5, %v35_v12  }
  0x7e   :  { %44 = vst.msk [vmem:[#allocation0] ss:$8 sm:$0x3] %vm43_vm6, %v42_v13  }
  0x80   :  { %v49_v14 = vpop.permute.xlu0 %48  }
  0x81   :  { %51 = vst.msk [vmem:[#allocation0] ss:$8 sm:$0x3] %vm50_vm7, %v49_v14  }
  0x88   :  { %v55_v15 = vld [vmem:[#allocation0] sm:$0x1]  ;;  %v59_v16 = vld [vmem:[#allocation0 + $0x8] sm:$0x1] }
  0x89   :  { %57 = vst [vmem:[%s126_s1] sm:$0x1] %v55_v15  ;;  %70 = vst [vmem:[%s126_s1 + $0x1] sm:$0x1] %v59_v16 }

// kernel: tile.43
= control target key start
LH: loop header
LB: loop body
LE: loop exit
PB: predicated region body
PF: predicated region fallthrough
CT: control target
= control target key end

     0   :  { %s22_s0 = inlined_call_operand.vmem [shape: f32[120], index: 0, kind: input, shape index: {}]   ;;  %s23_s1 = inlined_call_operand.vmem [shape: f32[3,120], index: 1, kind: output, shape index: {}]  }
   0x1   :  { %v4_v0 = vld [vmem:[%s22_s0] ss:$0 sm:$0xff] }
   0x2   :  { %5 = vst [vmem:[%s23_s1] sm:$0xf] %v4_v0 }

// kernel: tile.44
= control target key start
LH: loop header
LB: loop body
LE: loop exit
PB: predicated region body
PF: predicated region fallthrough
CT: control target
= control target key end

     0   :  { %vm13_vm0 = vcmask 64512   ;;  %vm26_vm1 = vcmask 130048   ;;  %vm7_vm2 = vcmask 982016   ;;  %s59_s8 = smov 112   ;;  %vm17_vm3 = vcmask 916480   ;;  %s82_s0 = inlined_call_operand.vmem [shape: f32[3,120], index: 0, kind: input, shape index: {}]   ;;  %s83_s1 = inlined_call_operand.vmem [shape: f32[1,360], index: 1, kind: output, shape index: {}]  }
   0x1   :  { %v4_v0 = vld [vmem:[%s82_s0] sm:$0xf]  ;;  %s58_s0 = smov 120   ;;  %vm20_vm4 = vcmask 1048512   ;;  %vm30_vm5 = vcmask 850944   ;;  %vm33_vm6 = vcmask 1048448  }
   0x2   :  { %5 = vst [vmem:[#allocation1] sm:$0xf] %v4_v0 }
   0x9   :  { %v10_v1 = vld [vmem:[#allocation1 + $0x1] sm:$0x1]   ;;  %v23_v3 = vld [vmem:[#allocation1 + $0x2] sm:$0x1]   ;;  %v6_v6 = vld [vmem:[#allocation1] sm:$0x1]  }
   0xa   :  { %v12_v2 = vld [vmem:[#allocation1 + $0x1] sm:$0x1]   ;;  %v25_v5 = vld [vmem:[#allocation1 + $0x2] sm:$0x1]   ;;  %8 = vst.msk [vmem:[#allocation0] sm:$0x1] %vm7_vm2, %v6_v6  }
   0xb   :  { %v14_v4 = vsel %vm13_vm0, %v12_v2, %v10_v1  ;;  %v27_v7 = vsel %vm26_vm1, %v25_v5, %v23_v3 }
   0xc   :  { %15 = vrot.lane.b32.xlu0 %v14_v4, %s58_s0 }
  0x10   :  { %28 = vrot.lane.b32.xlu0 %v27_v7, %s59_s8 }
  0x7e   :  { %v16_v8 = vpop.permute.xlu0 %15  }
  0x7f   :  { %19 = vst.msk [vmem:[#allocation0 + $0x8] sm:$0x1] %vm17_vm3, %v16_v8  }
  0x80   :  { %21 = vst.msk [vmem:[#allocation0] sm:$0x1] %vm20_vm4, %v16_v8  }
  0x82   :  { %v29_v9 = vpop.permute.xlu0 %28  }
  0x83   :  { %32 = vst.msk [vmem:[#allocation0 + $0x10] sm:$0x1] %vm30_vm5, %v29_v9  }
  0x84   :  { %35 = vst.msk [vmem:[#allocation0 + $0x8] sm:$0x1] %vm33_vm6, %v29_v9  }
  0x87   :  { %v39_v10 = vld [vmem:[#allocation0] sm:$0x1] }
  0x88   :  { %41 = vst [vmem:[%s83_s1] sm:$0x1] %v39_v10 }
  0x8a   :  { %v48_v12 = vld [vmem:[#allocation0 + $0x10] sm:$0x1] }
  0x8b   :  { %v43_v11 = vld [vmem:[#allocation0 + $0x8] sm:$0x1]  ;;  %55 = vst [vmem:[%s83_s1 + $0x2] sm:$0x1] %v48_v12 }
  0x8c   :  { %54 = vst [vmem:[%s83_s1 + $0x1] sm:$0x1] %v43_v11 }

// kernel: tile.48
= control target key start
LH: loop header
LB: loop body
LE: loop exit
PB: predicated region body
PF: predicated region fallthrough
CT: control target
= control target key end

     0   :  { %s22_s0 = inlined_call_operand.vmem [shape: f32[84], index: 0, kind: input, shape index: {}]   ;;  %s23_s1 = inlined_call_operand.vmem [shape: f32[3,84], index: 1, kind: output, shape index: {}]  }
   0x1   :  { %v4_v0 = vld [vmem:[%s22_s0] ss:$0 sm:$0xff] }
   0x2   :  { %5 = vst [vmem:[%s23_s1] sm:$0xf] %v4_v0 }

// kernel: tile.49
= control target key start
LH: loop header
LB: loop body
LE: loop exit
PB: predicated region body
PF: predicated region fallthrough
CT: control target
= control target key end

     0   :  { %vm13_vm0 = vcmask 359424   ;;  %vm7_vm1 = vcmask 687104   ;;  %s44_s8 = smov 40   ;;  %vm17_vm2 = vcmask 326656   ;;  %vm20_vm3 = vcmask 1048224   ;;  %s64_s0 = inlined_call_operand.vmem [shape: f32[3,84], index: 0, kind: input, shape index: {}]   ;;  %s65_s1 = inlined_call_operand.vmem [shape: f32[1,252], index: 1, kind: output, shape index: {}]  }
   0x1   :  { %v4_v0 = vld [vmem:[%s64_s0] sm:$0xf]  ;;  %s43_s0 = smov 84   ;;  %vm26_vm4 = vcmask 1015104  }
   0x2   :  { %5 = vst [vmem:[#allocation1] sm:$0xf] %v4_v0 }
   0x9   :  { %v10_v1 = vld [vmem:[#allocation1 + $0x1] sm:$0x1]   ;;  %v6_v4 = vld [vmem:[#allocation1] sm:$0x1]   ;;  %v23_v5 = vld [vmem:[#allocation1 + $0x2] sm:$0x1]  }
   0xa   :  { %v12_v2 = vld [vmem:[#allocation1 + $0x1] sm:$0x1]   ;;  %8 = vst.msk [vmem:[#allocation0] sm:$0x1] %vm7_vm1, %v6_v4  }
   0xb   :  { %v14_v3 = vsel %vm13_vm0, %v12_v2, %v10_v1 }
   0xc   :  { %15 = vrot.lane.b32.xlu0 %v14_v3, %s43_s0 }
  0x10   :  { %24 = vrot.lane.b32.xlu0 %v23_v5, %s44_s8 }
  0x7e   :  { %v16_v6 = vpop.permute.xlu0 %15  }
  0x7f   :  { %19 = vst.msk [vmem:[#allocation0 + $0x8] sm:$0x1] %vm17_vm2, %v16_v6  }
  0x80   :  { %21 = vst.msk [vmem:[#allocation0] sm:$0x1] %vm20_vm3, %v16_v6  }
  0x82   :  { %v25_v7 = vpop.permute.xlu0 %24  }
  0x83   :  { %28 = vst.msk [vmem:[#allocation0 + $0x8] sm:$0x1] %vm26_vm4, %v25_v7  }
  0x87   :  { %v32_v8 = vld [vmem:[#allocation0] sm:$0x1] }
  0x88   :  { %34 = vst [vmem:[%s65_s1] sm:$0x1] %v32_v8 }
  0x8a   :  { %v36_v9 = vld [vmem:[#allocation0 + $0x8] sm:$0x1] }
  0x8b   :  { %40 = vst [vmem:[%s65_s1 + $0x1] sm:$0x1] %v36_v9 }

// kernel: net_forward.1
= control target key start
LH: loop header
LB: loop body
LE: loop exit
PB: predicated region body
PF: predicated region fallthrough
CT: control target
= control target key end

     0   :  { %v53_v19 = vlaneseq  ;;  %vm1638_vm0 = vcmask 1046528   ;;  %vm1671_vm1 = vcmask 1044480   ;;  %vm1656_vm2 = vcmask 1045504   ;;  %s4109_s21 = smov 112   ;;  %s7618_s3 = inlined_call_operand.vmem [shape: f32[640,224], index: 3, kind: input, shape index: {}]   ;;  %s7619_s1 = inlined_call_operand.vmem [shape: f32[25,128], index: 1, kind: input, shape index: {}]   ;;  %s7620_s0 = inlined_call_operand.vmem [shape: f32[6,6,48,128], index: 0, kind: input, shape index: {}]   ;;  %s7621_s2 = inlined_call_operand.vmem [shape: f32[1,128], index: 2, kind: input, shape index: {}]   ;;  %s7622_s5 = inlined_call_operand.vmem [shape: f32[208,360], index: 5, kind: input, shape index: {}]   ;;  %s7623_s4 = inlined_call_operand.vmem [shape: f32[1,208], index: 4, kind: input, shape index: {}]   ;;  %s7624_s6 = inlined_call_operand.vmem [shape: f32[208,360], index: 6, kind: input, shape index: {}]   ;;  %s7625_s8 = inlined_call_operand.vmem [shape: f32[360,252], index: 8, kind: input, shape index: {}]   ;;  %s7626_s10 = inlined_call_operand.vmem [shape: f32[252,3], index: 10, kind: input, shape index: {}]   ;;  %s7627_s7 = inlined_call_operand.vmem [shape: f32[1,360], index: 7, kind: input, shape index: {}]   ;;  %s7628_s11 = inlined_call_operand.<no memory space> [shape: f32[1,1], index: 11, kind: input, shape index: {}]   ;;  %s7629_s9 = inlined_call_operand.vmem [shape: f32[1,252], index: 9, kind: input, shape index: {}]   ;;  %s7630_s12 = inlined_call_operand.vmem [shape: f32[6,3], index: 12, kind: output, shape index: {}]  }
   0x1   :  { %v1702_v0 = vld [vmem:[%s7618_s3 + $0x8] sm:$0xff]  ;;  %v1704_v1 = vld [vmem:[%s7618_s3 + $0x18] sm:$0xff]  ;;  %v1701_v2 = vld [vmem:[%s7618_s3] sm:$0xff]  ;;  %vm1686_vm3 = vcmask 1043456   ;;  %vm2152_vm4 = vcmask 916480   ;;  %vm2317_vm5 = vcmask 654336  }
   0x2   :  { %v3605_v3 = vpack.c.bf16 %v1704_v1, %v1702_v0  ;;  %v1703_v4 = vld [vmem:[%s7618_s3 + $0x10] sm:$0xff]  ;;  %v1706_v5 = vld [vmem:[%s7618_s3 + $0x28] sm:$0xff]  ;;  %v1708_v6 = vld [vmem:[%s7618_s3 + $0x38] sm:$0xff]  ;;  %v54_v26 = vshrl.u32 %v53_v19, 7  ;;  %vm2956_vm6 = vcmask 850944   ;;  %vm4111_vm7 = vmmov 1  }
   0x3   :  { %v3607_v7 = vpack.c.bf16 %v1703_v4, %v1701_v2  ;;  %v3609_v8 = vpack.c.bf16 %v1708_v6, %v1706_v5  ;;  %v1705_v9 = vld [vmem:[%s7618_s3 + $0x20] sm:$0xff]  ;;  %v1707_v10 = vld [vmem:[%s7618_s3 + $0x30] sm:$0xff]  ;;  %v1710_v11 = vld [vmem:[%s7618_s3 + $0x48] sm:$0xff]  ;;  %vm3197_vm9 = vcmask 1014784   ;;  %vm3309_vm10 = vcmask 1040384  }
   0x4   :  { %3606 = vmatprep.subr.bf16.mxu0 %v3605_v3  ;;  %v1712_v12 = vld [vmem:[%s7618_s3 + $0x58] sm:$0xff]  ;;  %v3611_v13 = vpack.c.bf16 %v1707_v10, %v1705_v9  ;;  %v1709_v15 = vld [vmem:[%s7618_s3 + $0x40] sm:$0xff]  ;;  %v1711_v16 = vld [vmem:[%s7618_s3 + $0x50] sm:$0xff]  ;;  %v4367_v56 = vsub.s32 0, %v54_v26  ;;  %v4369_v57 = vsub.s32 1, %v54_v26  ;;  %v4371_v58 = vsub.s32 2, %v54_v26 }
   0x5   :  { %3608 = vmatpush1.bf16.msra.mxu0 %v3607_v7  ;;  %v3613_v14 = vpack.c.bf16 %v1712_v12, %v1710_v11  ;;  %v1714_v17 = vld [vmem:[%s7618_s3 + $0x68] sm:$0xff]  ;;  %v1716_v18 = vld [vmem:[%s7618_s3 + $0x78] sm:$0xff]  ;;  %v3615_v20 = vpack.c.bf16 %v1711_v16, %v1709_v15  ;;  %v1713_v22 = vld [vmem:[%s7618_s3 + $0x60] sm:$0xff]  ;;  %v4388_v62 = vsub.s32 3, %v54_v26  ;;  %v4390_v63 = vsub.s32 4, %v54_v26 }
   0x6   :  { %3610 = vmatprep.subr.bf16.mxu0 %v3609_v8  ;;  %v3617_v21 = vpack.c.bf16 %v1716_v18, %v1714_v17  ;;  %v1715_v23 = vld [vmem:[%s7618_s3 + $0x70] sm:$0xff]  ;;  %v1718_v24 = vld [vmem:[%s7618_s3 + $0x88] sm:$0xff]  ;;  %v1720_v25 = vld [vmem:[%s7618_s3 + $0x98] sm:$0xff]  ;;  %7707 = vst [vmem:[#allocation3_spill] sm:$0xff] %v4367_v56  ;;  %v4392_v0 = vsub.s32 5, %v54_v26  ;;  %v4413_v6 = vsub.s32 6, %v54_v26 }
   0x7   :  { %v4235_v27 = vld [vmem:[%s7618_s3 + $0x80] sm:$0xff]  ;;  %v4240_v28 = vld [vmem:[%s7618_s3 + $0x90] sm:$0xff]  ;;  %v4245_v29 = vld [vmem:[%s7618_s3 + $0xa8] sm:$0xff]  ;;  %v3619_v31 = vpack.c.bf16 %v1715_v23, %v1713_v22  ;;  %v3621_v40 = vpack.c.bf16 %v1720_v25, %v1718_v24  ;;  %7708 = vst [vmem:[#allocation4_spill] sm:$0xff] %v4369_v57  ;;  %v4415_v7 = vsub.s32 7, %v54_v26  ;;  %vm3311_vm11 = vcmask 1041408  }
   0x8   :  { %v4250_v30 = vld [vmem:[%s7618_s3 + $0xb8] sm:$0xff]  ;;  %v4255_v32 = vld [vmem:[%s7618_s3 + $0xa0] sm:$0xff]  ;;  %v4260_v33 = vld [vmem:[%s7618_s3 + $0xb0] sm:$0xff]  ;;  %7709 = vst [vmem:[#allocation5_spill] sm:$0xff] %v4371_v58  ;;  %v3623_v1 = vpack.c.bf16 %v4240_v28, %v4235_v27  ;;  %vm3313_vm12 = vcmask 1042432   ;;  %vm3317_vm13 = vcmask 21504  }
   0x9   :  { %3612 = vmatpush1.bf16.msra.mxu0 %v3611_v13  ;;  %v4265_v34 = vld [vmem:[%s7618_s3 + $0xc8] sm:$0xff]  ;;  %v4270_v35 = vld [vmem:[%s7618_s3 + $0xd8] sm:$0xff]  ;;  %v4275_v36 = vld [vmem:[%s7618_s3 + $0xc0] sm:$0xff]  ;;  %7710 = vst [vmem:[#allocation6_spill] sm:$0xff] %v4390_v63  ;;  %v3625_v2 = vpack.c.bf16 %v4250_v30, %v4245_v29  ;;  %v3627_v8 = vpack.c.bf16 %v4260_v33, %v4255_v32 }
   0xa   :  { %3614 = vmatprep.subr.bf16.mxu0 %v3613_v14  ;;  %v4280_v37 = vld [vmem:[%s7618_s3 + $0xd0] sm:$0xff]  ;;  %v4285_v38 = vld [vmem:[%s7618_s3 + $0xe8] sm:$0xff]  ;;  %v4290_v39 = vld [vmem:[%s7618_s3 + $0xf8] sm:$0xff]  ;;  %7711 = vst [vmem:[#allocation7_spill] sm:$0xff] %v4392_v0  ;;  %v3629_v9 = vpack.c.bf16 %v4270_v35, %v4265_v34 }
   0xb   :  { %v4295_v41 = vld [vmem:[%s7618_s3 + $0xe0] sm:$0xff]  ;;  %v4300_v42 = vld [vmem:[%s7618_s3 + $0xf0] sm:$0xff]  ;;  %v4305_v43 = vld [vmem:[%s7618_s3 + $0x108] sm:$0xff]  ;;  %7712 = vst [vmem:[#allocation8_spill] sm:$0xff] %v4413_v6 }
   0xc   :  { %v4310_v44 = vld [vmem:[%s7618_s3 + $0x118] sm:$0xff]  ;;  %v4315_v45 = vld [vmem:[%s7618_s3 + $0x100] sm:$0xff]  ;;  %v4320_v46 = vld [vmem:[%s7618_s3 + $0x110] sm:$0xff] }
   0xd   :  { %3616 = vmatpush1.bf16.msra.mxu0 %v3615_v20  ;;  %v4325_v47 = vld [vmem:[%s7618_s3 + $0x128] sm:$0xff]  ;;  %v4330_v48 = vld [vmem:[%s7618_s3 + $0x138] sm:$0xff]  ;;  %v4335_v49 = vld [vmem:[%s7618_s3 + $0x120] sm:$0xff] }
   0xe   :  { %3618 = vmatprep.subr.bf16.mxu0 %v3617_v21  ;;  %v4340_v50 = vld [vmem:[%s7618_s3 + $0x130] sm:$0xff]  ;;  %v4345_v51 = vld [vmem:[%s7618_s3 + $0x148] sm:$0xff]  ;;  %v4350_v52 = vld [vmem:[%s7618_s3 + $0x158] sm:$0xff] }
   0xf   :  { %v4355_v53 = vld [vmem:[%s7618_s3 + $0x140] sm:$0xff]  ;;  %v4360_v54 = vld [vmem:[%s7618_s3 + $0x150] sm:$0xff]  ;;  %v4365_v55 = vld [vmem:[%s7618_s3 + $0x168] sm:$0xff] }
  0x10   :  { %v4376_v59 = vld [vmem:[%s7618_s3 + $0x178] sm:$0xff]  ;;  %v4381_v60 = vld [vmem:[%s7618_s3 + $0x160] sm:$0xff]  ;;  %v4386_v61 = vld [vmem:[%s7618_s3 + $0x170] sm:$0xff] }
  0x11   :  { %3620 = vmatpush1.bf16.msra.mxu0 %v3619_v31  ;;  %v4401_v3 = vld [vmem:[%s7618_s3 + $0x188] sm:$0xff]  ;;  %v4406_v4 = vld [vmem:[%s7618_s3 + $0x198] sm:$0xff]  ;;  %v4411_v5 = vld [vmem:[%s7618_s3 + $0x180] sm:$0xff] }
  0x12   :  { %3622 = vmatprep.subr.bf16.mxu0 %v3621_v40  ;;  %v4428_v12 = vld [vmem:[%s7618_s3 + $0x190] sm:$0xff]  ;;  %v4433_v13 = vld [vmem:[%s7618_s3 + $0x1a8] sm:$0xff]  ;;  %v4438_v14 = vld [vmem:[%s7618_s3 + $0x1b8] sm:$0xff] }
  0x13   :  { %v4451_v19 = vld [vmem:[%s7618_s3 + $0x1a0] sm:$0xff]  ;;  %v4456_v20 = vld [vmem:[%s7618_s3 + $0x1b0] sm:$0xff]  ;;  %v4461_v21 = vld [vmem:[%s7618_s3 + $0x1c8] sm:$0xff] }
  0x14   :  { %7713 = vst [vmem:[#allocation9_spill] sm:$0xff] %v4451_v19  ;;  %7714 = vst [vmem:[#allocation10_spill] sm:$0xff] %v4456_v20  ;;  %v4474_v26 = vld [vmem:[%s7618_s3 + $0x1d8] sm:$0xff]  ;;  %v4479_v27 = vld [vmem:[%s7618_s3 + $0x1c0] sm:$0xff] }
  0x15   :  { %7715 = vst [vmem:[#allocation11_spill] sm:$0xff] %v4461_v21  ;;  %7716 = vst [vmem:[#allocation12_spill] sm:$0xff] %v4474_v26  ;;  %v4484_v28 = vld [vmem:[%s7618_s3 + $0x1d0] sm:$0xff]  ;;  %3624 = vmatpush1.bf16.msra.mxu0 %v3623_v1  ;;  %v4497_v33 = vld [vmem:[%s7618_s3 + $0x1e8] sm:$0xff] }
  0x16   :  { %7717 = vst [vmem:[#allocation13_spill] sm:$0xff] %v4479_v27  ;;  %7718 = vst [vmem:[#allocation14_spill] sm:$0xff] %v4484_v28  ;;  %v4502_v34 = vld [vmem:[%s7618_s3 + $0x1f8] sm:$0xff]  ;;  %v4507_v35 = vld [vmem:[%s7618_s3 + $0x1e0] sm:$0xff]  ;;  %3626 = vmatprep.subr.bf16.mxu0 %v3625_v2 }
  0x17   :  { %7719 = vst [vmem:[#allocation15_spill] sm:$0xff] %v4497_v33  ;;  %7720 = vst [vmem:[#allocation16_spill] sm:$0xff] %v4502_v34  ;;  %v4520_v30 = vld [vmem:[%s7618_s3 + $0x1f0] sm:$0xff]  ;;  %v4525_v2 = vld [vmem:[%s7619_s1] sm:$0xff] }
  0x18   :  { %7721 = vst [vmem:[#allocation17_spill] sm:$0xff] %v4507_v35  ;;  %7722 = vst [vmem:[#allocation18_spill] sm:$0xff] %v4520_v30  ;;  %v47_v32 = vld [vmem:[%s7620_s0] sm:$0xff]  ;;  %v4534_v31 = vrot.slane %v4525_v2, %v4367_v56  ;;  %v4538_v1 = vrot.slane %v4525_v2, %v4369_v57  ;;  %v4542_v29 = vrot.slane %v4525_v2, %v4371_v58  ;;  %v48_v40 = vld [vmem:[%s7620_s0 + $0x8] sm:$0xff] }
  0x19   :  { %v3323_v25 = vld [vmem:[%s7620_s0 + $0x30] sm:$0xff]  ;;  %v3324_v24 = vld [vmem:[%s7620_s0 + $0x38] sm:$0xff]  ;;  %v4555_v23 = vrot.slane %v4525_v2, %v4388_v62  ;;  %v4559_v22 = vrot.slane %v4525_v2, %v4390_v63  ;;  %v4563_v18 = vrot.slane %v4525_v2, %v4392_v0  ;;  %v4567_v17 = vrot.slane %v4525_v2, %v4413_v6  ;;  %3628 = vmatpush1.bf16.msra.mxu0 %v3627_v8  ;;  %v3329_v35 = vld [vmem:[%s7620_s0 + $0x60] sm:$0xff] }
  0x1a   :  { %v57_v16 = vmul.f32 %v4534_v31, %v47_v32  ;;  %v58_v15 = vmul.f32 %v4534_v31, %v48_v40  ;;  %v80_v11 = vmul.f32 %v3323_v25, %v4538_v1  ;;  %v81_v10 = vmul.f32 %v3324_v24, %v4538_v1  ;;  %v3330_v30 = vld [vmem:[%s7620_s0 + $0x68] sm:$0xff]  ;;  %v3335_v8 = vld [vmem:[%s7620_s0 + $0x90] sm:$0xff]  ;;  %3630 = vmatprep.subr.bf16.mxu0 %v3629_v9  ;;  %v3336_v33 = vld [vmem:[%s7620_s0 + $0x98] sm:$0xff] }
  0x1b   :  { %v92_v32 = vmul.f32 %v3323_v25, %v4534_v31  ;;  %v93_v40 = vmul.f32 %v3324_v24, %v4534_v31  ;;  %v115_v6 = vmul.f32 %v3329_v35, %v4542_v29  ;;  %v116_v0 = vmul.f32 %v3330_v30, %v4542_v29  ;;  %v3341_v9 = vld [vmem:[%s7620_s0 + $0xc0] sm:$0xff]  ;;  %v3342_v24 = vld [vmem:[%s7620_s0 + $0xc8] sm:$0xff]  ;;  %v3347_v19 = vld [vmem:[%s7620_s0 + $0xf0] sm:$0xff] }
  0x1c   :  { %v86_v34 = vadd.f32 %v80_v11, %v57_v16  ;;  %v87_v27 = vadd.f32 %v81_v10, %v58_v15  ;;  %v127_v28 = vmul.f32 %v3329_v35, %v4538_v1  ;;  %v128_v63 = vmul.f32 %v3330_v30, %v4538_v1  ;;  %v3348_v20 = vld [vmem:[%s7620_s0 + $0xf8] sm:$0xff]  ;;  %vm4064_vm8 = vmpackc.low %vm1686_vm3, %vm4111_vm7 }
  0x1d   :  { %v150_v25 = vmul.f32 %v3335_v8, %v4555_v23  ;;  %v151_v21 = vmul.f32 %v3336_v33, %v4555_v23  ;;  %v162_v26 = vmul.f32 %v3335_v8, %v4542_v29  ;;  %v163_v10 = vmul.f32 %v3336_v33, %v4542_v29 }
  0x1e   :  { %v7723_v11 = vpack.c.bf16 %v4280_v37, %v4275_v36  ;;  %v121_v15 = vadd.f32 %v115_v6, %v86_v34  ;;  %v122_v16 = vadd.f32 %v116_v0, %v87_v27  ;;  %v133_v30 = vadd.f32 %v127_v28, %v92_v32  ;;  %v3353_v34 = vld [vmem:[%s7620_s0 + $0x120] sm:$0xff] }
  0x1f   :  { %v134_v35 = vadd.f32 %v128_v63, %v93_v40  ;;  %v7724_v8 = vpack.c.bf16 %v4290_v39, %v4285_v38  ;;  %v185_v33 = vmul.f32 %v3341_v9, %v4559_v22  ;;  %v186_v36 = vmul.f32 %v3342_v24, %v4559_v22  ;;  %v3354_v38 = vld [vmem:[%s7620_s0 + $0x128] sm:$0xff] }
  0x20   :  { %3632 = vmatpush1.bf16.msra.mxu0 %v7723_v11  ;;  %v197_v37 = vmul.f32 %v3341_v9, %v4555_v23  ;;  %v198_v63 = vmul.f32 %v3342_v24, %v4555_v23  ;;  %v156_v0 = vadd.f32 %v150_v25, %v121_v15  ;;  %v157_v6 = vadd.f32 %v151_v21, %v122_v16  ;;  %v3359_v11 = vld [vmem:[%s7620_s0 + $0x150] sm:$0xff] }
  0x21   :  { %3634 = vmatprep.subr.bf16.mxu0 %v7724_v8  ;;  %v168_v27 = vadd.f32 %v162_v26, %v133_v30  ;;  %v169_v28 = vadd.f32 %v163_v10, %v134_v35  ;;  %v216_v39 = vmul.f32 %v3347_v19, %v4559_v22  ;;  %v217_v32 = vmul.f32 %v3348_v20, %v4559_v22  ;;  %v3360_v19 = vld [vmem:[%s7620_s0 + $0x158] sm:$0xff] }
  0x22   :  { %v239_v40 = vmul.f32 %v3353_v34, %v4563_v18  ;;  %v240_v9 = vmul.f32 %v3354_v38, %v4563_v18  ;;  %v7725_v21 = vpack.c.bf16 %v4300_v42, %v4295_v41  ;;  %v191_v26 = vadd.f32 %v185_v33, %v156_v0  ;;  %v4653_v0 = vld [vmem:[%s7619_s1 + $0x8] sm:$0xff] }
  0x23   :  { %v192_v24 = vadd.f32 %v186_v36, %v157_v6  ;;  %v203_v25 = vadd.f32 %v197_v37, %v168_v27  ;;  %v204_v10 = vadd.f32 %v198_v63, %v169_v28  ;;  %v7726_v20 = vpack.c.bf16 %v4310_v44, %v4305_v43 }
  0x24   :  { %3636 = vmatpush1.bf16.msra.mxu0 %v7725_v21  ;;  %v251_v15 = vmul.f32 %v3353_v34, %v4534_v31  ;;  %v252_v41 = vmul.f32 %v3354_v38, %v4534_v31  ;;  %v274_v42 = vmul.f32 %v3359_v11, %v4567_v17  ;;  %v275_v16 = vmul.f32 %v3360_v19, %v4567_v17  ;;  %v3365_v38 = vld [vmem:[%s7620_s0 + $0x180] sm:$0xff] }
  0x25   :  { %3638 = vmatprep.subr.bf16.mxu0 %v7726_v20  ;;  %v222_v30 = vadd.f32 %v216_v39, %v203_v25  ;;  %v223_v35 = vadd.f32 %v217_v32, %v204_v10  ;;  %v245_v8 = vadd.f32 %v239_v40, %v191_v26  ;;  %v246_v33 = vadd.f32 %v240_v9, %v192_v24 }
  0x26   :  { %v286_v36 = vmul.f32 %v3359_v11, %v4563_v18  ;;  %v287_v37 = vmul.f32 %v3360_v19, %v4563_v18  ;;  %v298_v63 = vmul.f32 %v3359_v11, %v4538_v1  ;;  %v299_v43 = vmul.f32 %v3360_v19, %v4538_v1 }
  0x27   :  { %v7727_v44 = vpack.c.bf16 %v4320_v46, %v4315_v45  ;;  %v280_v6 = vadd.f32 %v274_v42, %v245_v8  ;;  %v281_v27 = vadd.f32 %v275_v16, %v246_v33  ;;  %v310_v28 = vmul.f32 %v3359_v11, %v4534_v31  ;;  %v3366_v45 = vld [vmem:[%s7620_s0 + $0x188] sm:$0xff]  ;;  %v3371_v33 = vld [vmem:[%s7620_s0 + $0x1b0] sm:$0xff] }
  0x28   :  { %v311_v34 = vmul.f32 %v3360_v19, %v4534_v31  ;;  %v7728_v46 = vpack.c.bf16 %v4330_v48, %v4325_v47  ;;  %v292_v39 = vadd.f32 %v286_v36, %v222_v30  ;;  %v293_v32 = vadd.f32 %v287_v37, %v223_v35 }
  0x29   :  { %3640 = vmatpush1.bf16.msra.mxu0 %v7727_v44  ;;  %v304_v40 = vadd.f32 %v298_v63, %v251_v15  ;;  %v305_v9 = vadd.f32 %v299_v43, %v252_v41  ;;  %v4668_v21 = vrot.slane %v4525_v2, %v4415_v7  ;;  %v345_v26 = vmul.f32 %v3365_v38, %v4567_v17 }
  0x2a   :  { %3642 = vmatprep.subr.bf16.mxu0 %v7728_v46  ;;  %v346_v24 = vmul.f32 %v3366_v45, %v4567_v17  ;;  %v357_v25 = vmul.f32 %v3365_v38, %v4542_v29  ;;  %v358_v10 = vmul.f32 %v3366_v45, %v4542_v29  ;;  %v369_v11 = vmul.f32 %v3365_v38, %v4538_v1 }
  0x2b   :  { %v370_v47 = vmul.f32 %v3366_v45, %v4538_v1  ;;  %v4678_v48 = vrot.slane %v4653_v0, %v4367_v56  ;;  %v7729_v2 = vpack.c.bf16 %v4340_v50, %v4335_v49  ;;  %v333_v19 = vmul.f32 %v3365_v38, %v4668_v21  ;;  %v3372_v49 = vld [vmem:[%s7620_s0 + $0x1b8] sm:$0xff] }
  0x2c   :  { %v334_v20 = vmul.f32 %v3366_v45, %v4668_v21  ;;  %v351_v15 = vadd.f32 %v345_v26, %v292_v39  ;;  %v352_v41 = vadd.f32 %v346_v24, %v293_v32  ;;  %v7730_v42 = vpack.c.bf16 %v4350_v52, %v4345_v51  ;;  %v3377_v45 = vld [vmem:[%s7620_s0 + $0x1e0] sm:$0xff] }
  0x2d   :  { %3644 = vmatpush1.bf16.msra.mxu0 %v7729_v2  ;;  %v363_v16 = vadd.f32 %v357_v25, %v304_v40  ;;  %v364_v30 = vadd.f32 %v358_v10, %v305_v9  ;;  %v375_v35 = vadd.f32 %v369_v11, %v310_v28  ;;  %v376_v8 = vadd.f32 %v370_v47, %v311_v34 }
  0x2e   :  { %3646 = vmatprep.subr.bf16.mxu0 %v7730_v42  ;;  %v339_v50 = vadd.f32 %v333_v19, %v280_v6  ;;  %v340_v36 = vadd.f32 %v334_v20, %v281_v27  ;;  %v392_v37 = vmul.f32 %v3371_v33, %v4678_v48  ;;  %v393_v63 = vmul.f32 %v3372_v49, %v4678_v48  ;;  %v3384_v42 = vld [vmem:[%s7620_s0 + $0x218] sm:$0xff] }
  0x2f   :  { %v404_v51 = vmul.f32 %v3371_v33, %v4668_v21  ;;  %v405_v52 = vmul.f32 %v3372_v49, %v4668_v21  ;;  %v416_v43 = vmul.f32 %v3371_v33, %v4555_v23  ;;  %v417_v44 = vmul.f32 %v3372_v49, %v4555_v23 }
  0x30   :  { %v7731_v28 = vpack.c.bf16 %v4360_v54, %v4355_v53  ;;  %v398_v34 = vadd.f32 %v392_v37, %v339_v50  ;;  %v399_v38 = vadd.f32 %v393_v63, %v340_v36  ;;  %v428_v6 = vmul.f32 %v3371_v33, %v4542_v29  ;;  %v3378_v53 = vld [vmem:[%s7620_s0 + $0x1e8] sm:$0xff] }
  0x31   :  { %v429_v27 = vmul.f32 %v3372_v49, %v4542_v29  ;;  %v7732_v46 = vpack.c.bf16 %v4376_v59, %v4365_v55  ;;  %v410_v39 = vadd.f32 %v404_v51, %v351_v15  ;;  %v411_v32 = vadd.f32 %v405_v52, %v352_v41  ;;  %v3383_v41 = vld [vmem:[%s7620_s0 + $0x210] sm:$0xff]  ;;  %v3390_v33 = vld [vmem:[%s7620_s0 + $0x248] sm:$0xff] }
  0x32   :  { %3648 = vmatpush1.bf16.msra.mxu0 %v7731_v28  ;;  %v422_v40 = vadd.f32 %v416_v43, %v363_v16  ;;  %v423_v9 = vadd.f32 %v417_v44, %v364_v30  ;;  %v434_v54 = vadd.f32 %v428_v6, %v375_v35  ;;  %v4716_v24 = vrot.slane %v4653_v0, %v4369_v57 }
  0x33   :  { %3650 = vmatprep.subr.bf16.mxu0 %v7732_v46  ;;  %v435_v26 = vadd.f32 %v429_v27, %v376_v8  ;;  %v463_v25 = vmul.f32 %v3377_v45, %v4678_v48  ;;  %v464_v10 = vmul.f32 %v3378_v53, %v4678_v48  ;;  %v475_v55 = vmul.f32 %v3377_v45, %v4559_v22  ;;  %v3389_v8 = vld [vmem:[%s7620_s0 + $0x240] sm:$0xff] }
  0x34   :  { %v476_v59 = vmul.f32 %v3378_v53, %v4559_v22  ;;  %v487_v11 = vmul.f32 %v3377_v45, %v4555_v23  ;;  %v7733_v47 = vpack.c.bf16 %v4386_v61, %v4381_v60  ;;  %v451_v2 = vmul.f32 %v3377_v45, %v4716_v24 }
  0x35   :  { %v452_v19 = vmul.f32 %v3378_v53, %v4716_v24  ;;  %v469_v20 = vadd.f32 %v463_v25, %v410_v39  ;;  %v488_v15 = vmul.f32 %v3378_v53, %v4555_v23  ;;  %v7734_v16 = vpack.c.bf16 %v4406_v4, %v4401_v3  ;;  %v7738_v25 = vld [vmem:[#allocation9_spill] sm:$0xff] }
  0x36   :  { %3652 = vmatpush1.bf16.msra.mxu0 %v7733_v47  ;;  %v470_v60 = vadd.f32 %v464_v10, %v411_v32  ;;  %v481_v61 = vadd.f32 %v475_v55, %v422_v40  ;;  %v482_v30 = vadd.f32 %v476_v59, %v423_v9  ;;  %v493_v35 = vadd.f32 %v487_v11, %v434_v54  ;;  %v3396_v40 = vld [vmem:[%s7620_s0 + $0x278] sm:$0xff] }
  0x37   :  { %3654 = vmatprep.subr.bf16.mxu0 %v7734_v16  ;;  %v457_v49 = vadd.f32 %v451_v2, %v398_v34  ;;  %v458_v50 = vadd.f32 %v452_v19, %v399_v38  ;;  %v494_v36 = vadd.f32 %v488_v15, %v435_v26  ;;  %v506_v37 = vmul.f32 %v3383_v41, %v4716_v24  ;;  %v7737_v26 = vld [vmem:[#allocation10_spill] sm:$0xff]  ;;  %v7740_v2 = vld [vmem:[#allocation12_spill] sm:$0xff]  ;;  %v7741_v19 = vld [vmem:[#allocation11_spill] sm:$0xff] }
  0x38   :  { %v507_v3 = vmul.f32 %v3384_v42, %v4716_v24  ;;  %v518_v4 = vmul.f32 %v3383_v41, %v4559_v22  ;;  %v519_v63 = vmul.f32 %v3384_v42, %v4559_v22  ;;  %v4750_v51 = vrot.slane %v4653_v0, %v4371_v58 }
  0x39   :  { %v7735_v52 = vpack.c.bf16 %v4428_v12, %v4411_v5  ;;  %v512_v43 = vadd.f32 %v506_v37, %v469_v20  ;;  %v553_v44 = vmul.f32 %v3389_v8, %v4563_v18  ;;  %v554_v28 = vmul.f32 %v3390_v33, %v4563_v18  ;;  %v3395_v5 = vld [vmem:[%s7620_s0 + $0x270] sm:$0xff] }
  0x3a   :  { %v4759_v34 = vrot.slane %v4653_v0, %v4388_v62  ;;  %v7736_v38 = vpack.c.bf16 %v4438_v14, %v4433_v13  ;;  %v513_v6 = vadd.f32 %v507_v3, %v470_v60  ;;  %v524_v27 = vadd.f32 %v518_v4, %v493_v35  ;;  %v3401_v60 = vld [vmem:[%s7620_s0 + $0x2a0] sm:$0xff] }
  0x3b   :  { %3656 = vmatpush1.bf16.msra.mxu0 %v7735_v52  ;;  %v525_v45 = vadd.f32 %v519_v63, %v494_v36  ;;  %v541_v46 = vmul.f32 %v3389_v8, %v4750_v51  ;;  %v542_v12 = vmul.f32 %v3390_v33, %v4750_v51  ;;  %v559_v39 = vadd.f32 %v553_v44, %v481_v61  ;;  %v3402_v61 = vld [vmem:[%s7620_s0 + $0x2a8] sm:$0xff]  ;;  %v7744_v4 = vld [vmem:[#allocation14_spill] sm:$0xff]  ;;  %v7745_v63 = vld [vmem:[#allocation13_spill] sm:$0xff] }
  0x3c   :  { %3658 = vmatprep.subr.bf16.mxu0 %v7736_v38  ;;  %v560_v32 = vadd.f32 %v554_v28, %v482_v30  ;;  %v576_v13 = vmul.f32 %v3395_v5, %v4759_v34  ;;  %v577_v9 = vmul.f32 %v3396_v40, %v4759_v34  ;;  %v588_v53 = vmul.f32 %v3395_v5, %v4750_v51 }
  0x3d   :  { %v547_v14 = vadd.f32 %v541_v46, %v457_v49  ;;  %v589_v54 = vmul.f32 %v3396_v40, %v4750_v51  ;;  %v7739_v10 = vpack.c.bf16 %v7737_v26, %v7738_v25  ;;  %v548_v55 = vadd.f32 %v542_v12, %v458_v50  ;;  %v7743_v50 = vld [vmem:[#allocation6_spill] sm:$0xff]  ;;  %v7750_v25 = vld [vmem:[#allocation7_spill] sm:$0xff] }
  0x3e   :  { %v600_v59 = vmul.f32 %v3395_v5, %v4567_v17  ;;  %v601_v11 = vmul.f32 %v3396_v40, %v4567_v17  ;;  %v612_v47 = vmul.f32 %v3395_v5, %v4563_v18  ;;  %v7742_v20 = vpack.c.bf16 %v7740_v2, %v7741_v19 }
  0x3f   :  { %3660 = vmatpush1.bf16.msra.mxu0 %v7739_v10  ;;  %v582_v15 = vadd.f32 %v576_v13, %v547_v14  ;;  %v594_v41 = vadd.f32 %v588_v53, %v512_v43  ;;  %v595_v42 = vadd.f32 %v589_v54, %v513_v6  ;;  %v613_v16 = vmul.f32 %v3396_v40, %v4563_v18  ;;  %v7747_v6 = vld [vmem:[#allocation16_spill] sm:$0xff]  ;;  %v3408_v53 = vld [vmem:[%s7620_s0 + $0x2d8] sm:$0xff] }
  0x40   :  { %3662 = vmatprep.subr.bf16.mxu0 %v7742_v20  ;;  %v583_v30 = vadd.f32 %v577_v9, %v548_v55  ;;  %v606_v35 = vadd.f32 %v600_v59, %v559_v39  ;;  %v607_v8 = vadd.f32 %v601_v11, %v560_v32  ;;  %v618_v33 = vadd.f32 %v612_v47, %v524_v27  ;;  %v7748_v27 = vld [vmem:[#allocation15_spill] sm:$0xff]  ;;  %v3407_v32 = vld [vmem:[%s7620_s0 + $0x2d0] sm:$0xff]  ;;  %v7752_v59 = vld [vmem:[#allocation18_spill] sm:$0xff] }
  0x41   :  { %v619_v49 = vadd.f32 %v613_v16, %v525_v45  ;;  %v4794_v36 = vrot.slane %v4653_v0, %v7743_v50  ;;  %v647_v37 = vmul.f32 %v3401_v60, %v4759_v34  ;;  %v648_v3 = vmul.f32 %v3402_v61, %v4759_v34  ;;  %v7753_v11 = vld [vmem:[#allocation17_spill] sm:$0xff] }
  0x42   :  { %v7746_v52 = vpack.c.bf16 %v7744_v4, %v7745_v63  ;;  %v659_v43 = vmul.f32 %v3401_v60, %v4668_v21  ;;  %v660_v44 = vmul.f32 %v3402_v61, %v4668_v21  ;;  %v671_v28 = vmul.f32 %v3401_v60, %v4567_v17  ;;  %v7755_v63 = vld [vmem:[#allocation8_spill] sm:$0xff] }
  0x43   :  { %v672_v38 = vmul.f32 %v3402_v61, %v4567_v17  ;;  %v7749_v45 = vpack.c.bf16 %v7747_v6, %v7748_v27  ;;  %v635_v46 = vmul.f32 %v3401_v60, %v4794_v36  ;;  %v636_v5 = vmul.f32 %v3402_v61, %v4794_v36 }
  0x44   :  { %3664 = vmatpush1.bf16.msra.mxu0 %v7746_v52  ;;  %v653_v12 = vadd.f32 %v647_v37, %v594_v41  ;;  %v654_v39 = vadd.f32 %v648_v3, %v595_v42  ;;  %v665_v40 = vadd.f32 %v659_v43, %v606_v35  ;;  %v666_v13 = vadd.f32 %v660_v44, %v607_v8 }
  0x45   :  { %3666 = vmatprep.subr.bf16.mxu0 %v7749_v45  ;;  %v677_v14 = vadd.f32 %v671_v28, %v618_v33  ;;  %v678_v9 = vadd.f32 %v672_v38, %v619_v49  ;;  %v641_v54 = vadd.f32 %v635_v46, %v582_v15  ;;  %v642_v26 = vadd.f32 %v636_v5, %v583_v30  ;;  %v3413_v33 = vld [vmem:[%s7620_s0 + $0x300] sm:$0xff]  ;;  %v3414_v49 = vld [vmem:[%s7620_s0 + $0x308] sm:$0xff]  ;;  %v3419_v5 = vld [vmem:[%s7620_s0 + $0x330] sm:$0xff] }
  0x46   :  { %v4818_v10 = vrot.slane %v4653_v0, %v7750_v25  ;;  %v706_v55 = vmul.f32 %v3407_v32, %v4794_v36  ;;  %v7754_v47 = vpack.c.bf16 %v7752_v59, %v7753_v11  ;;  %v707_v2 = vmul.f32 %v3408_v53, %v4794_v36 }
  0x47   :  { %v718_v19 = vmul.f32 %v3407_v32, %v4678_v48  ;;  %v719_v20 = vmul.f32 %v3408_v53, %v4678_v48  ;;  %v730_v41 = vmul.f32 %v3407_v32, %v4668_v21  ;;  %v731_v60 = vmul.f32 %v3408_v53, %v4668_v21 }
  0x48   :  { %7751 = vst [vmem:[#allocation10_spill] sm:$0xff] %v4818_v10  ;;  %3668 = vmatpush1.bf16.msra.mxu0 %v7754_v47  ;;  %v694_v15 = vmul.f32 %v3407_v32, %v4818_v10  ;;  %v695_v42 = vmul.f32 %v3408_v53, %v4818_v10  ;;  %v712_v16 = vadd.f32 %v706_v55, %v653_v12  ;;  %v3420_v12 = vld [vmem:[%s7620_s0 + $0x338] sm:$0xff]  ;;  %v3426_v53 = vld [vmem:[%s7620_s0 + $0x368] sm:$0xff] }
  0x49   :  { %v713_v61 = vadd.f32 %v707_v2, %v654_v39  ;;  %v724_v30 = vadd.f32 %v718_v19, %v665_v40  ;;  %v725_v35 = vadd.f32 %v719_v20, %v666_v13  ;;  %v736_v8 = vadd.f32 %v730_v41, %v677_v14  ;;  %v4858_v39 = vld [vmem:[%s7619_s1 + $0x10] sm:$0xff] }
  0x4a   :  { %v700_v37 = vadd.f32 %v694_v15, %v641_v54  ;;  %v701_v3 = vadd.f32 %v695_v42, %v642_v26  ;;  %v737_v4 = vadd.f32 %v731_v60, %v678_v9  ;;  %v4839_v52 = vrot.slane %v4653_v0, %v7755_v63  ;;  %v3425_v9 = vld [vmem:[%s7620_s0 + $0x360] sm:$0xff] }
  0x4b   :  { %v765_v43 = vmul.f32 %v3413_v33, %v4818_v10  ;;  %v766_v44 = vmul.f32 %v3414_v49, %v4818_v10  ;;  %v777_v28 = vmul.f32 %v3413_v33, %v4716_v24  ;;  %v778_v38 = vmul.f32 %v3414_v49, %v4716_v24 }
  0x4c   :  { %7756 = vst [vmem:[#allocation9_spill] sm:$0xff] %v4839_v52  ;;  %v753_v6 = vmul.f32 %v3413_v33, %v4839_v52  ;;  %v754_v27 = vmul.f32 %v3414_v49, %v4839_v52  ;;  %v789_v45 = vmul.f32 %v3413_v33, %v4678_v48  ;;  %v790_v46 = vmul.f32 %v3414_v49, %v4678_v48 }
  0x4d   :  { %v771_v32 = vadd.f32 %v765_v43, %v712_v16  ;;  %v772_v40 = vadd.f32 %v766_v44, %v713_v61  ;;  %v783_v13 = vadd.f32 %v777_v28, %v724_v30  ;;  %v784_v14 = vadd.f32 %v778_v38, %v725_v35 }
  0x4e   :  { %v759_v54 = vadd.f32 %v753_v6, %v700_v37  ;;  %v760_v26 = vadd.f32 %v754_v27, %v701_v3  ;;  %v795_v55 = vadd.f32 %v789_v45, %v736_v8  ;;  %v796_v59 = vadd.f32 %v790_v46, %v737_v4  ;;  %v3432_v37 = vld [vmem:[%s7620_s0 + $0x398] sm:$0xff] }
  0x4f   :  { %v808_v11 = vmul.f32 %v3419_v5, %v4839_v52  ;;  %v809_v47 = vmul.f32 %v3420_v12, %v4839_v52  ;;  %v820_v2 = vmul.f32 %v3419_v5, %v4716_v24  ;;  %v821_v19 = vmul.f32 %v3420_v12, %v4716_v24 }
  0x50   :  { %v4872_v20 = vrot.slane %v4653_v0, %v4415_v7  ;;  %v855_v41 = vmul.f32 %v3425_v9, %v4750_v51  ;;  %v856_v15 = vmul.f32 %v3426_v53, %v4750_v51  ;;  %v4878_v42 = vrot.slane %v4858_v39, %v4367_v56  ;;  %v3431_v0 = vld [vmem:[%s7620_s0 + $0x390] sm:$0xff]  ;;  %v5216_v56 = vld [vmem:[%s7618_s3 + $0x280] sm:$0xff] }
  0x51   :  { %v814_v16 = vadd.f32 %v808_v11, %v771_v32  ;;  %v815_v60 = vadd.f32 %v809_v47, %v772_v40  ;;  %v826_v61 = vadd.f32 %v820_v2, %v795_v55  ;;  %v827_v30 = vadd.f32 %v821_v19, %v796_v59  ;;  %v3437_v32 = vld [vmem:[%s7620_s0 + $0x3c0] sm:$0xff] }
  0x52   :  { %7757 = vst [vmem:[#allocation12_spill] sm:$0xff] %v4872_v20  ;;  %7758 = vst [vmem:[#allocation11_spill] sm:$0xff] %v4878_v42  ;;  %v843_v35 = vmul.f32 %v3425_v9, %v4872_v20  ;;  %v844_v8 = vmul.f32 %v3426_v53, %v4872_v20  ;;  %v861_v33 = vadd.f32 %v855_v41, %v783_v13  ;;  %v3438_v53 = vld [vmem:[%s7620_s0 + $0x3c8] sm:$0xff] }
  0x53   :  { %v862_v49 = vadd.f32 %v856_v15, %v784_v14  ;;  %v878_v3 = vmul.f32 %v3431_v0, %v4878_v42  ;;  %v879_v4 = vmul.f32 %v3432_v37, %v4878_v42  ;;  %v890_v43 = vmul.f32 %v3431_v0, %v4872_v20 }
  0x54   :  { %v891_v44 = vmul.f32 %v3432_v37, %v4872_v20  ;;  %v849_v28 = vadd.f32 %v843_v35, %v759_v54  ;;  %v850_v38 = vadd.f32 %v844_v8, %v760_v26  ;;  %v902_v6 = vmul.f32 %v3431_v0, %v4759_v34 }
  0x55   :  { %v903_v27 = vmul.f32 %v3432_v37, %v4759_v34  ;;  %v896_v45 = vadd.f32 %v890_v43, %v814_v16  ;;  %v914_v5 = vmul.f32 %v3431_v0, %v4750_v51  ;;  %v915_v12 = vmul.f32 %v3432_v37, %v4750_v51 }
  0x56   :  { %v897_v46 = vadd.f32 %v891_v44, %v815_v60  ;;  %v884_v40 = vadd.f32 %v878_v3, %v849_v28  ;;  %v885_v13 = vadd.f32 %v879_v4, %v850_v38  ;;  %v908_v14 = vadd.f32 %v902_v6, %v861_v33  ;;  %v3443_v33 = vld [vmem:[%s7620_s0 + $0x3f0] sm:$0xff] }
  0x57   :  { %v909_v9 = vadd.f32 %v903_v27, %v862_v49  ;;  %v920_v54 = vadd.f32 %v914_v5, %v826_v61  ;;  %v921_v26 = vadd.f32 %v915_v12, %v827_v30  ;;  %v4904_v55 = vrot.slane %v4858_v39, %v4369_v57  ;;  %v3444_v49 = vld [vmem:[%s7620_s0 + $0x3f8] sm:$0xff]  ;;  %v5221_v57 = vld [vmem:[%s7618_s3 + $0x290] sm:$0xff] }
  0x58   :  { %v949_v59 = vmul.f32 %v3437_v32, %v4878_v42  ;;  %v950_v11 = vmul.f32 %v3438_v53, %v4878_v42  ;;  %v961_v47 = vmul.f32 %v3437_v32, %v4794_v36  ;;  %v962_v2 = vmul.f32 %v3438_v53, %v4794_v36 }
  0x59   :  { %7759 = vst [vmem:[#allocation6_spill] sm:$0xff] %v4904_v55  ;;  %v973_v19 = vmul.f32 %v3437_v32, %v4759_v34  ;;  %v937_v41 = vmul.f32 %v3437_v32, %v4904_v55  ;;  %v938_v15 = vmul.f32 %v3438_v53, %v4904_v55  ;;  %v974_v60 = vmul.f32 %v3438_v53, %v4759_v34 }
  0x5a   :  { %v955_v16 = vadd.f32 %v949_v59, %v896_v45  ;;  %v956_v61 = vadd.f32 %v950_v11, %v897_v46  ;;  %v967_v30 = vadd.f32 %v961_v47, %v908_v14  ;;  %v968_v35 = vadd.f32 %v962_v2, %v909_v9  ;;  %v3450_v14 = vld [vmem:[%s7620_s0 + $0x428] sm:$0xff]  ;;  %v3455_v9 = vld [vmem:[%s7620_s0 + $0x450] sm:$0xff] }
  0x5b   :  { %v979_v8 = vadd.f32 %v973_v19, %v920_v54  ;;  %v943_v0 = vadd.f32 %v937_v41, %v884_v40  ;;  %v944_v37 = vadd.f32 %v938_v15, %v885_v13  ;;  %v980_v3 = vadd.f32 %v974_v60, %v921_v26  ;;  %v3449_v13 = vld [vmem:[%s7620_s0 + $0x420] sm:$0xff] }
  0x5c   :  { %v4922_v4 = vrot.slane %v4858_v39, %v4371_v58  ;;  %v1008_v43 = vmul.f32 %v3443_v33, %v4904_v55  ;;  %v1009_v44 = vmul.f32 %v3444_v49, %v4904_v55  ;;  %v1020_v28 = vmul.f32 %v3443_v33, %v4818_v10  ;;  %v5192_v58 = vld [vmem:[%s7618_s3 + $0x260] sm:$0xff] }
  0x5d   :  { %v1021_v38 = vmul.f32 %v3444_v49, %v4818_v10  ;;  %v1032_v45 = vmul.f32 %v3443_v33, %v4794_v36  ;;  %v1033_v46 = vmul.f32 %v3444_v49, %v4794_v36  ;;  %v4943_v11 = vrot.slane %v4858_v39, %v4388_v62 }
  0x5e   :  { %7760 = vst [vmem:[#allocation14_spill] sm:$0xff] %v4922_v4  ;;  %v996_v6 = vmul.f32 %v3443_v33, %v4922_v4  ;;  %v997_v27 = vmul.f32 %v3444_v49, %v4922_v4  ;;  %v1014_v5 = vadd.f32 %v1008_v43, %v955_v16  ;;  %v1015_v12 = vadd.f32 %v1009_v44, %v956_v61  ;;  %v3461_v33 = vld [vmem:[%s7620_s0 + $0x480] sm:$0xff]  ;;  %v3462_v43 = vld [vmem:[%s7620_s0 + $0x488] sm:$0xff] }
  0x5f   :  { %v1026_v32 = vadd.f32 %v1020_v28, %v967_v30  ;;  %v1027_v40 = vadd.f32 %v1021_v38, %v968_v35  ;;  %v1038_v26 = vadd.f32 %v1032_v45, %v979_v8  ;;  %v1039_v59 = vadd.f32 %v1033_v46, %v980_v3  ;;  %7761 = vst [vmem:[#allocation13_spill] sm:$0xff] %v4943_v11  ;;  %v3456_v8 = vld [vmem:[%s7620_s0 + $0x458] sm:$0xff] }
  0x60   :  { %v1002_v53 = vadd.f32 %v996_v6, %v943_v0  ;;  %v1003_v54 = vadd.f32 %v997_v27, %v944_v37  ;;  %v1067_v47 = vmul.f32 %v3449_v13, %v4922_v4  ;;  %v1068_v2 = vmul.f32 %v3450_v14, %v4922_v4 }
  0x61   :  { %v1079_v19 = vmul.f32 %v3449_v13, %v4839_v52  ;;  %v1080_v41 = vmul.f32 %v3450_v14, %v4839_v52  ;;  %v1091_v15 = vmul.f32 %v3449_v13, %v4818_v10  ;;  %v1092_v16 = vmul.f32 %v3450_v14, %v4818_v10  ;;  %v3331_v10 = vld [vmem:[%s7620_s0 + $0x70] sm:$0xff] }
  0x62   :  { %v1122_v60 = vmul.f32 %v3455_v9, %v4839_v52  ;;  %v1055_v61 = vmul.f32 %v3449_v13, %v4943_v11  ;;  %v1056_v30 = vmul.f32 %v3450_v14, %v4943_v11  ;;  %v1073_v62 = vadd.f32 %v1067_v47, %v1014_v5 }
  0x63   :  { %v1074_v35 = vadd.f32 %v1068_v2, %v1015_v12  ;;  %v1085_v49 = vadd.f32 %v1079_v19, %v1026_v32  ;;  %v1086_v0 = vadd.f32 %v1080_v41, %v1027_v40  ;;  %v1097_v37 = vadd.f32 %v1091_v15, %v1038_v26  ;;  %v3468_v26 = vld [vmem:[%s7620_s0 + $0x4b8] sm:$0xff] }
  0x64   :  { %v1098_v3 = vadd.f32 %v1092_v16, %v1039_v59  ;;  %v1061_v44 = vadd.f32 %v1055_v61, %v1002_v53  ;;  %v1062_v28 = vadd.f32 %v1056_v30, %v1003_v54  ;;  %v1110_v38 = vmul.f32 %v3455_v9, %v4943_v11 }
  0x65   :  { %v1111_v6 = vmul.f32 %v3456_v8, %v4943_v11  ;;  %v1123_v27 = vmul.f32 %v3456_v8, %v4839_v52  ;;  %v1128_v45 = vadd.f32 %v1122_v60, %v1097_v37  ;;  %v4968_v46 = vrot.slane %v4858_v39, %v7743_v50  ;;  %v3467_v50 = vld [vmem:[%s7620_s0 + $0x4b0] sm:$0xff]  ;;  %v3474_v37 = vld [vmem:[%s7620_s0 + $0x4e8] sm:$0xff]  ;;  %v3337_v52 = vld [vmem:[%s7620_s0 + $0xa0] sm:$0xff] }
  0x66   :  { %v1157_v5 = vmul.f32 %v3461_v33, %v4872_v20  ;;  %v1116_v12 = vadd.f32 %v1110_v38, %v1073_v62  ;;  %v1158_v40 = vmul.f32 %v3462_v43, %v4872_v20  ;;  %v4974_v13 = vrot.slane %v4858_v39, %v7750_v25 }
  0x67   :  { %7762 = vst [vmem:[#allocation16_spill] sm:$0xff] %v4968_v46  ;;  %v1117_v32 = vadd.f32 %v1111_v6, %v1074_v35  ;;  %v1129_v14 = vadd.f32 %v1123_v27, %v1098_v3  ;;  %v1145_v9 = vmul.f32 %v3461_v33, %v4968_v46  ;;  %v1146_v53 = vmul.f32 %v3462_v43, %v4968_v46 }
  0x68   :  { %7763 = vst [vmem:[#allocation15_spill] sm:$0xff] %v4974_v13  ;;  %v1163_v54 = vadd.f32 %v1157_v5, %v1085_v49  ;;  %v1164_v59 = vadd.f32 %v1158_v40, %v1086_v0  ;;  %v1180_v47 = vmul.f32 %v3467_v50, %v4974_v13  ;;  %v1181_v25 = vmul.f32 %v3468_v26, %v4974_v13  ;;  %v3473_v0 = vld [vmem:[%s7620_s0 + $0x4e0] sm:$0xff] }
  0x69   :  { %v1192_v2 = vmul.f32 %v3467_v50, %v4968_v46  ;;  %v1151_v19 = vadd.f32 %v1145_v9, %v1061_v44  ;;  %v1152_v41 = vadd.f32 %v1146_v53, %v1062_v28  ;;  %v1193_v15 = vmul.f32 %v3468_v26, %v4968_v46 }
  0x6a   :  { %v1204_v16 = vmul.f32 %v3467_v50, %v4878_v42  ;;  %v1205_v61 = vmul.f32 %v3468_v26, %v4878_v42  ;;  %v1216_v30 = vmul.f32 %v3467_v50, %v4872_v20  ;;  %v1217_v62 = vmul.f32 %v3468_v26, %v4872_v20  ;;  %v3479_v50 = vld [vmem:[%s7620_s0 + $0x510] sm:$0xff]  ;;  %v3480_v26 = vld [vmem:[%s7620_s0 + $0x518] sm:$0xff] }
  0x6b   :  { %v1198_v60 = vadd.f32 %v1192_v2, %v1116_v12  ;;  %v1186_v35 = vadd.f32 %v1180_v47, %v1151_v19  ;;  %v1187_v8 = vadd.f32 %v1181_v25, %v1152_v41  ;;  %v1199_v33 = vadd.f32 %v1193_v15, %v1117_v32  ;;  %v5325_v20 = vld [vmem:[%s7618_s3 + $0x338] sm:$0xff] }
  0x6c   :  { %v1210_v49 = vadd.f32 %v1204_v16, %v1163_v54  ;;  %v1211_v3 = vadd.f32 %v1205_v61, %v1164_v59  ;;  %v1222_v43 = vadd.f32 %v1216_v30, %v1128_v45  ;;  %v1223_v44 = vadd.f32 %v1217_v62, %v1129_v14 }
  0x6d   :  { %v5000_v28 = vrot.slane %v4858_v39, %v7755_v63  ;;  %v1251_v38 = vmul.f32 %v3473_v0, %v4974_v13  ;;  %v1252_v6 = vmul.f32 %v3474_v37, %v4974_v13  ;;  %v1263_v27 = vmul.f32 %v3473_v0, %v4904_v55  ;;  %v5013_v63 = vld [vmem:[%s7619_s1 + $0x18] ss:$0 sm:$0xff] }
  0x6e   :  { %v1264_v5 = vmul.f32 %v3474_v37, %v4904_v55  ;;  %v1275_v40 = vmul.f32 %v3473_v0, %v4878_v42  ;;  %v1276_v45 = vmul.f32 %v3474_v37, %v4878_v42  ;;  %7765 = vst [vmem:[#allocation18_spill] sm:$0xff] %v5013_v63  ;;  %v5023_v19 = vrot.slane %v4858_v39, %v4415_v7  ;;  %v5320_v42 = vld [vmem:[%s7618_s3 + $0x328] sm:$0xff] }
  0x6f   :  { %7764 = vst [vmem:[#allocation7_spill] sm:$0xff] %v5000_v28  ;;  %v1239_v12 = vmul.f32 %v3473_v0, %v5000_v28  ;;  %v1240_v32 = vmul.f32 %v3474_v37, %v5000_v28  ;;  %v1257_v14 = vadd.f32 %v1251_v38, %v1198_v60  ;;  %v1258_v9 = vadd.f32 %v1252_v6, %v1199_v33  ;;  %v3485_v60 = vld [vmem:[%s7620_s0 + $0x540] sm:$0xff] }
  0x70   :  { %v1269_v53 = vadd.f32 %v1263_v27, %v1210_v49  ;;  %v1270_v54 = vadd.f32 %v1264_v5, %v1211_v3  ;;  %v1281_v25 = vadd.f32 %v1275_v40, %v1222_v43  ;;  %v1282_v2 = vadd.f32 %v1276_v45, %v1223_v44  ;;  %7766 = vst [vmem:[#allocation17_spill] sm:$0xff] %v5023_v19  ;;  %v3486_v43 = vld [vmem:[%s7620_s0 + $0x548] sm:$0xff]  ;;  %v3492_v45 = vld [vmem:[%s7620_s0 + $0x570] sm:$0xff] }
  0x71   :  { %v1245_v59 = vadd.f32 %v1239_v12, %v1186_v35  ;;  %v1246_v47 = vadd.f32 %v1240_v32, %v1187_v8  ;;  %v1310_v41 = vmul.f32 %v3479_v50, %v5000_v28  ;;  %v1311_v15 = vmul.f32 %v3480_v26, %v5000_v28 }
  0x72   :  { %v1322_v16 = vmul.f32 %v3479_v50, %v4922_v4  ;;  %v1323_v61 = vmul.f32 %v3480_v26, %v4922_v4  ;;  %v1334_v30 = vmul.f32 %v3479_v50, %v4904_v55  ;;  %v1335_v62 = vmul.f32 %v3480_v26, %v4904_v55  ;;  %v5340_v55 = vld [vmem:[%s7618_s3 + $0x348] sm:$0xff] }
  0x73   :  { %v1357_v35 = vmul.f32 %v5013_v63, %v3485_v60  ;;  %v1298_v7 = vmul.f32 %v3479_v50, %v5023_v19  ;;  %v1299_v39 = vmul.f32 %v3480_v26, %v5023_v19  ;;  %v1316_v8 = vadd.f32 %v1310_v41, %v1257_v14  ;;  %v3493_v50 = vld [vmem:[%s7620_s0 + $0x578] sm:$0xff]  ;;  %v3498_v26 = vld [vmem:[%s7620_s0 + $0x5a0] sm:$0xff]  ;;  %7780 = vst [vmem:[#allocation31_spill] sm:$0xff] %v5340_v55 }
  0x74   :  { %v1317_v33 = vadd.f32 %v1311_v15, %v1258_v9  ;;  %v1328_v49 = vadd.f32 %v1322_v16, %v1269_v53  ;;  %v1329_v0 = vadd.f32 %v1323_v61, %v1270_v54  ;;  %v1340_v37 = vadd.f32 %v1334_v30, %v1281_v25  ;;  %v3504_v30 = vld [vmem:[%s7620_s0 + $0x5d0] sm:$0xff] }
  0x75   :  { %v1341_v3 = vadd.f32 %v1335_v62, %v1282_v2  ;;  %v1304_v44 = vadd.f32 %v1298_v7, %v1245_v59  ;;  %v1305_v38 = vadd.f32 %v1299_v39, %v1246_v47  ;;  %v1358_v6 = vmul.f32 %v5013_v63, %v3486_v43  ;;  %v3499_v59 = vld [vmem:[%s7620_s0 + $0x5a8] sm:$0xff]  ;;  %v3505_v39 = vld [vmem:[%s7620_s0 + $0x5d8] sm:$0xff] }
  0x76   :  { %v1369_v27 = vmul.f32 %v3485_v60, %v5023_v19  ;;  %v1370_v5 = vmul.f32 %v3486_v43, %v5023_v19  ;;  %v1381_v12 = vmul.f32 %v3485_v60, %v4943_v11  ;;  %v1382_v32 = vmul.f32 %v3486_v43, %v4943_v11 }
  0x77   :  { %v1393_v40 = vmul.f32 %v3485_v60, %v4922_v4  ;;  %v5049_v14 = vadd.f32 %v1357_v35, %v1304_v44  ;;  %v5051_v9 = vadd.f32 %v1358_v6, %v1305_v38  ;;  %v1394_v54 = vmul.f32 %v3486_v43, %v4922_v4  ;;  %v3511_v43 = vld [vmem:[%s7620_s0 + $0x608] sm:$0xff] }
  0x78   :  { %v1375_v53 = vadd.f32 %v1369_v27, %v1316_v8  ;;  %v1376_v47 = vadd.f32 %v1370_v5, %v1317_v33  ;;  %v1387_v25 = vadd.f32 %v1381_v12, %v1328_v49  ;;  %v1388_v2 = vadd.f32 %v1382_v32, %v1329_v0  ;;  %v3510_v33 = vld [vmem:[%s7620_s0 + $0x600] sm:$0xff]  ;;  %v3516_v5 = vld [vmem:[%s7620_s0 + $0x630] sm:$0xff] }
  0x79   :  { %v1399_v41 = vadd.f32 %v1393_v40, %v1340_v37  ;;  %v1400_v15 = vadd.f32 %v1394_v54, %v1341_v3  ;;  %v1412_v16 = vmul.f32 %v3492_v45, %v5013_v63  ;;  %v1413_v60 = vmul.f32 %v3493_v50, %v5013_v63 }
  0x7a   :  { %v1424_v61 = vmul.f32 %v3492_v45, %v4943_v11  ;;  %v1425_v62 = vmul.f32 %v3493_v50, %v4943_v11  ;;  %v1443_v35 = vmul.f32 %v3498_v26, %v4968_v46  ;;  %v1444_v7 = vmul.f32 %v3499_v59, %v4968_v46  ;;  %v5289_v11 = vld [vmem:[%s7618_s3 + $0x2f0] sm:$0xff] }
  0x7b   :  { %v1462_v8 = vmul.f32 %v3504_v30, %v4974_v13  ;;  %v5079_v49 = vadd.f32 %v1412_v16, %v1375_v53  ;;  %v5081_v0 = vadd.f32 %v1413_v60, %v1376_v47  ;;  %v1463_v3 = vmul.f32 %v3505_v39, %v4974_v13  ;;  %v3517_v53 = vld [vmem:[%s7620_s0 + $0x638] sm:$0xff]  ;;  %v3522_v47 = vld [vmem:[%s7620_s0 + $0x660] sm:$0xff]  ;;  %v3523_v16 = vld [vmem:[%s7620_s0 + $0x668] sm:$0xff] }
  0x7c   :  { %v1430_v37 = vadd.f32 %v1424_v61, %v1399_v41  ;;  %v1431_v44 = vadd.f32 %v1425_v62, %v1400_v15  ;;  %v1449_v38 = vadd.f32 %v1443_v35, %v1387_v25  ;;  %v1450_v6 = vadd.f32 %v1444_v7, %v1388_v2  ;;  %v3528_v60 = vld [vmem:[%s7620_s0 + $0x690] sm:$0xff]  ;;  %v3529_v61 = vld [vmem:[%s7620_s0 + $0x698] sm:$0xff] }
  0x7d   :  { %v1474_v27 = vmul.f32 %v3504_v30, %v4968_v46  ;;  %v1475_v12 = vmul.f32 %v3505_v39, %v4968_v46  ;;  %v1493_v32 = vmul.f32 %v3510_v33, %v5000_v28  ;;  %v1494_v40 = vmul.f32 %v3511_v43, %v5000_v28  ;;  %v5118_v39 = vld [vmem:[%s7618_s3 + $0x208] sm:$0xff]  ;;  %v5258_v46 = vld [vmem:[%s7618_s3 + $0x2c0] sm:$0xff] }
  0x7e   :  { %v1505_v45 = vmul.f32 %v3510_v33, %v4974_v13  ;;  %v1468_v54 = vadd.f32 %v1462_v8, %v1449_v38  ;;  %v1469_v50 = vadd.f32 %v1463_v3, %v1450_v6  ;;  %v1506_v59 = vmul.f32 %v3511_v43, %v4974_v13  ;;  %v5123_v8 = vld [vmem:[%s7618_s3 + $0x218] sm:$0xff]  ;;  %v5128_v33 = vld [vmem:[%s7618_s3 + $0x200] sm:$0xff]  ;;  %v5138_v3 = vld [vmem:[%s7618_s3 + $0x228] sm:$0xff] }
  0x7f   :  { %v1480_v26 = vadd.f32 %v1474_v27, %v1430_v37  ;;  %v1481_v25 = vadd.f32 %v1475_v12, %v1431_v44  ;;  %v1524_v2 = vmul.f32 %v3516_v5, %v5023_v19  ;;  %v1525_v41 = vmul.f32 %v3517_v53, %v5023_v19  ;;  %v5133_v37 = vld [vmem:[%s7618_s3 + $0x210] sm:$0xff]  ;;  %v5143_v43 = vld [vmem:[%s7618_s3 + $0x238] sm:$0xff] }
  0x80   :  { %v1536_v15 = vmul.f32 %v3516_v5, %v5000_v28  ;;  %v1499_v30 = vadd.f32 %v1493_v32, %v1468_v54  ;;  %v1500_v62 = vadd.f32 %v1494_v40, %v1469_v50  ;;  %v1537_v7 = vmul.f32 %v3517_v53, %v5000_v28  ;;  %v5151_v5 = vld [vmem:[%s7618_s3 + $0x220] sm:$0xff]  ;;  %v5156_v12 = vld [vmem:[%s7618_s3 + $0x230] sm:$0xff]  ;;  %v5161_v32 = vld [vmem:[%s7618_s3 + $0x248] sm:$0xff] }
  0x81   :  { %v1511_v35 = vadd.f32 %v1505_v45, %v1480_v26  ;;  %v1512_v44 = vadd.f32 %v1506_v59, %v1481_v25  ;;  %v1555_v38 = vmul.f32 %v3522_v47, %v5013_v63  ;;  %v1556_v6 = vmul.f32 %v3523_v16, %v5013_v63  ;;  %v5166_v40 = vld [vmem:[%s7618_s3 + $0x258] sm:$0xff]  ;;  %v5171_v45 = vld [vmem:[%s7618_s3 + $0x240] sm:$0xff]  ;;  %v5176_v53 = vld [vmem:[%s7618_s3 + $0x250] sm:$0xff] }
  0x82   :  { %v1567_v27 = vmul.f32 %v3522_v47, %v5023_v19  ;;  %7767 = vst [vmem:[#allocation8_spill] sm:$0xff] %v5171_v45  ;;  %7768 = vst [vmem:[#allocation19_spill] sm:$0xff] %v5176_v53  ;;  %v1530_v54 = vadd.f32 %v1524_v2, %v1499_v30  ;;  %v1531_v50 = vadd.f32 %v1525_v41, %v1500_v62  ;;  %v5182_v47 = vld [vmem:[%s7618_s3 + $0x268] sm:$0xff]  ;;  %v5187_v25 = vld [vmem:[%s7618_s3 + $0x278] sm:$0xff] }
  0x83   :  { %v1542_v26 = vadd.f32 %v1536_v15, %v1511_v35  ;;  %v1568_v59 = vmul.f32 %v3523_v16, %v5023_v19  ;;  %v5197_v2 = vld [vmem:[%s7618_s3 + $0x270] sm:$0xff]  ;;  %v5202_v41 = vld [vmem:[%s7618_s3 + $0x288] sm:$0xff]  ;;  %v5207_v15 = vld [vmem:[%s7618_s3 + $0x298] sm:$0xff]  ;;  %v1543_v16 = vadd.f32 %v1537_v7, %v1512_v44  ;;  %v1586_v30 = vmul.f32 %v3528_v60, %v5013_v63 }
  0x84   :  { %7769 = vst [vmem:[#allocation20_spill] sm:$0xff] %v5202_v41  ;;  %7770 = vst [vmem:[#allocation21_spill] sm:$0xff] %v5207_v15  ;;  %v1587_v62 = vmul.f32 %v3529_v61, %v5013_v63  ;;  %v1598_v35 = vmax.f32 %v5049_v14, %v5079_v49  ;;  %v5226_v7 = vld [vmem:[%s7618_s3 + $0x2a8] sm:$0xff]  ;;  %v5231_v60 = vld [vmem:[%s7618_s3 + $0x2b8] sm:$0xff]  ;;  %v1561_v61 = vadd.f32 %v1555_v38, %v1530_v54 }
  0x85   :  { %v5236_v14 = vld [vmem:[%s7618_s3 + $0x2a0] sm:$0xff]  ;;  %v5241_v49 = vld [vmem:[%s7618_s3 + $0x2b0] sm:$0xff]  ;;  %v1562_v44 = vadd.f32 %v1556_v6, %v1531_v50  ;;  %v1573_v63 = vadd.f32 %v1567_v27, %v1542_v26  ;;  %v1599_v19 = vmax.f32 %v5051_v9, %v5081_v0  ;;  %v5248_v28 = vld [vmem:[%s7618_s3 + $0x2c8] sm:$0xff]  ;;  %v1574_v6 = vadd.f32 %v1568_v59, %v1543_v16 }
  0x86   :  { %7771 = vst [vmem:[#allocation22_spill] sm:$0xff] %v5236_v14  ;;  %7772 = vst [vmem:[#allocation23_spill] sm:$0xff] %v5241_v49  ;;  %v5253_v13 = vld [vmem:[%s7618_s3 + $0x2d8] sm:$0xff]  ;;  %v5263_v38 = vld [vmem:[%s7618_s3 + $0x2d0] sm:$0xff]  ;;  %v3669_v27 = vpack.c.bf16 %v5123_v8, %v5118_v39 }
  0x87   :  { %v5268_v9 = vld [vmem:[%s7618_s3 + $0x2e8] sm:$0xff]  ;;  %v5273_v0 = vld [vmem:[%s7618_s3 + $0x2f8] sm:$0xff]  ;;  %v5284_v26 = vld [vmem:[%s7618_s3 + $0x2e0] sm:$0xff]  ;;  %v1592_v50 = vadd.f32 %v1586_v30, %v1573_v63  ;;  %v1593_v4 = vadd.f32 %v1587_v62, %v1574_v6 }
  0x88   :  { %7773 = vst [vmem:[#allocation24_spill] sm:$0xff] %v5268_v9  ;;  %7774 = vst [vmem:[#allocation25_spill] sm:$0xff] %v5273_v0  ;;  %v5294_v39 = vld [vmem:[%s7618_s3 + $0x308] sm:$0xff]  ;;  %v5299_v8 = vld [vmem:[%s7618_s3 + $0x318] sm:$0xff]  ;;  %3670 = vmatprep.subr.bf16.mxu0 %v3669_v27 }
  0x89   :  { %7775 = vst [vmem:[#allocation26_spill] sm:$0xff] %v5294_v39  ;;  %v5304_v59 = vld [vmem:[%s7618_s3 + $0x300] sm:$0xff]  ;;  %v5309_v16 = vld [vmem:[%s7618_s3 + $0x310] sm:$0xff]  ;;  %v5356_v53 = vld [vmem:[%s7618_s3 + $0x358] sm:$0xff]  ;;  %v1604_v27 = vmax.f32 %v1561_v61, %v1592_v50  ;;  %v1605_v50 = vmax.f32 %v1562_v44, %v1593_v4  ;;  %v152_v39 = vmul.f32 %v3337_v52, %v4555_v23 }
  0x8a   :  { %7776 = vst [vmem:[#allocation27_spill] sm:$0xff] %v5304_v59  ;;  %7777 = vst [vmem:[#allocation28_spill] sm:$0xff] %v5309_v16  ;;  %v5330_v63 = vld [vmem:[%s7618_s3 + $0x320] sm:$0xff]  ;;  %v5335_v30 = vld [vmem:[%s7618_s3 + $0x330] sm:$0xff] }
  0x8b   :  { %7778 = vst [vmem:[#allocation29_spill] sm:$0xff] %v5330_v63  ;;  %7779 = vst [vmem:[#allocation30_spill] sm:$0xff] %v5335_v30  ;;  %v5345_v54 = vld [vmem:[%s7621_s2] ss:$0 sm:$0xff]  ;;  %v5366_v6 = vld [vmem:[%s7618_s3 + $0x350] sm:$0xff]  ;;  %v1610_v44 = vmax.f32 %v1598_v35, %v1604_v27  ;;  %v1611_v27 = vmax.f32 %v1599_v19, %v1605_v50 }
  0x8c   :  { %7781 = vst [vmem:[#allocation32_spill] sm:$0xff] %v5345_v54  ;;  %7782 = vst [vmem:[#allocation33_spill] sm:$0xff] %v5356_v53  ;;  %v5361_v62 = vld [vmem:[%s7618_s3 + $0x340] sm:$0xff]  ;;  %v5377_v41 = vld [vmem:[%s7618_s3 + $0x368] sm:$0xff] }
  0x8d   :  { %7783 = vst [vmem:[#allocation34_spill] sm:$0xff] %v5361_v62  ;;  %7784 = vst [vmem:[#allocation35_spill] sm:$0xff] %v5366_v6  ;;  %v5382_v15 = vld [vmem:[%s7618_s3 + $0x378] sm:$0xff]  ;;  %v5387_v61 = vld [vmem:[%s7618_s3 + $0x360] sm:$0xff]  ;;  %v1623_v16 = vadd.f32 %v5345_v54, %v1610_v44  ;;  %v1624_v45 = vadd.f32 %v5345_v54, %v1611_v27  ;;  %v117_v27 = vmul.f32 %v3331_v10, %v4542_v29 }
  0x8e   :  { %7785 = vst [vmem:[#allocation36_spill] sm:$0xff] %v5377_v41  ;;  %7786 = vst [vmem:[#allocation37_spill] sm:$0xff] %v5382_v15  ;;  %v5398_v14 = vld [vmem:[%s7618_s3 + $0x370] sm:$0xff]  ;;  %v5403_v49 = vld [vmem:[%s7618_s3 + $0x388] sm:$0xff] }
  0x8f   :  { %7787 = vst [vmem:[#allocation38_spill] sm:$0xff] %v5387_v61  ;;  %7788 = vst [vmem:[#allocation39_spill] sm:$0xff] %v5398_v14  ;;  %v5408_v4 = vld [vmem:[%s7618_s3 + $0x398] sm:$0xff]  ;;  %v5419_v9 = vld [vmem:[%s7618_s3 + $0x380] sm:$0xff]  ;;  %v5460_v61 = vmax.f32 %v1623_v16, 0.0  ;;  %v5468_v54 = vmax.f32 %v1624_v45, 0.0 }
  0x90   :  { %7789 = vst [vmem:[#allocation40_spill] sm:$0xff] %v5403_v49  ;;  %7790 = vst [vmem:[#allocation41_spill] sm:$0xff] %v5408_v4  ;;  %v5424_v0 = vld [vmem:[%s7618_s3 + $0x390] sm:$0xff]  ;;  %v3325_v59 = vld [vmem:[%s7620_s0 + $0x40] sm:$0xff] }
  0x91   :  { %7791 = vst [vmem:[#allocation42_spill] sm:$0xff] %v5419_v9  ;;  %7792 = vst [vmem:[#allocation43_spill] sm:$0xff] %v5424_v0  ;;  %v49_v35 = vld [vmem:[%s7620_s0 + $0x10] sm:$0xff]  ;;  %v82_v14 = vmul.f32 %v3325_v59, %v4538_v1  ;;  %v94_v41 = vmul.f32 %v3325_v59, %v4534_v31  ;;  %v3349_v44 = vld [vmem:[%s7620_s0 + $0x100] sm:$0xff]  ;;  %v164_v9 = vmul.f32 %v3337_v52, %v4542_v29  ;;  %v1639_v59 = vrot.slane %v5460_v61, 1 }
  0x92   :  { %v59_v19 = vmul.f32 %v4534_v31, %v49_v35  ;;  %v3343_v50 = vld [vmem:[%s7620_s0 + $0xd0] sm:$0xff]  ;;  %7793 = vst [vmem:[#allocation44_spill] sm:$0xff] %v5460_v61  ;;  %7794 = vst [vmem:[#allocation45_spill] sm:$0xff] %v5468_v54  ;;  %v129_v35 = vmul.f32 %v3331_v10, %v4538_v1  ;;  %v3361_v45 = vld [vmem:[%s7620_s0 + $0x160] sm:$0xff]  ;;  %v7702_v10 = vrot.slane %v5468_v54, 1  ;;  %v218_v52 = vmul.f32 %v3349_v44, %v4559_v22 }
  0x93   :  { %v3355_v16 = vld [vmem:[%s7620_s0 + $0x130] sm:$0xff]  ;;  %v187_v49 = vmul.f32 %v3343_v50, %v4559_v22  ;;  %v199_v4 = vmul.f32 %v3343_v50, %v4555_v23  ;;  %v300_v44 = vmul.f32 %v3361_v45, %v4538_v1 }
  0x94   :  { %v88_v0 = vadd.f32 %v82_v14, %v59_v19  ;;  %v135_v15 = vadd.f32 %v129_v35, %v94_v41  ;;  %v241_v62 = vmul.f32 %v3355_v16, %v4563_v18  ;;  %v253_v55 = vmul.f32 %v3355_v16, %v4534_v31  ;;  %v3367_v50 = vld [vmem:[%s7620_s0 + $0x190] sm:$0xff] }
  0x95   :  { %v276_v14 = vmul.f32 %v3361_v45, %v4567_v17  ;;  %v288_v19 = vmul.f32 %v3361_v45, %v4563_v18  ;;  %v1641_v53 = vsel %vm1638_vm0, %v1639_v59, %v7702_v10  ;;  %v312_v35 = vmul.f32 %v3361_v45, %v4534_v31  ;;  %v3379_v10 = vld [vmem:[%s7620_s0 + $0x1f0] sm:$0xff] }
  0x96   :  { %v123_v6 = vadd.f32 %v117_v27, %v88_v0  ;;  %v170_v41 = vadd.f32 %v164_v9, %v135_v15  ;;  %v3373_v0 = vld [vmem:[%s7620_s0 + $0x1c0] sm:$0xff]  ;;  %1925 = vmatprep.mubr.f32.mxu0 %v1641_v53  ;;  %v335_v16 = vmul.f32 %v3367_v50, %v4668_v21  ;;  %v347_v63 = vmul.f32 %v3367_v50, %v4567_v17 }
  0x97   :  { %v359_v30 = vmul.f32 %v3367_v50, %v4542_v29  ;;  %1926 = vmatmul.mubr.f32.vlgmr.msra.gmra.mrb[0].mxu0 %v5460_v61  ;;  %v306_v15 = vadd.f32 %v300_v44, %v253_v55  ;;  %v371_v9 = vmul.f32 %v3367_v50, %v4538_v1  ;;  %v394_v45 = vmul.f32 %v3373_v0, %v4678_v48 }
  0x98   :  { %v158_v27 = vadd.f32 %v152_v39, %v123_v6  ;;  %v205_v59 = vadd.f32 %v199_v4, %v170_v41  ;;  %v7795_v53 = vpack.c.bf16 %v5133_v37, %v5128_v33  ;;  %v406_v6 = vmul.f32 %v3373_v0, %v4668_v21  ;;  %v3385_v33 = vld [vmem:[%s7620_s0 + $0x220] sm:$0xff]  ;;  %v3391_v37 = vld [vmem:[%s7620_s0 + $0x250] sm:$0xff] }
  0x99   :  { %v418_v54 = vmul.f32 %v3373_v0, %v4555_v23  ;;  %v430_v4 = vmul.f32 %v3373_v0, %v4542_v29  ;;  %v7796_v55 = vpack.c.bf16 %v5143_v43, %v5138_v3  ;;  %v365_v41 = vadd.f32 %v359_v30, %v306_v15 }
  0x9a   :  { %3672 = vmatpush1.bf16.msra.mxu0 %v7795_v53  ;;  %v193_v39 = vadd.f32 %v187_v49, %v158_v27  ;;  %v224_v50 = vadd.f32 %v218_v52, %v205_v59  ;;  %v377_v44 = vadd.f32 %v371_v9, %v312_v35  ;;  %v453_v61 = vmul.f32 %v3379_v10, %v4716_v24  ;;  %v3397_v59 = vld [vmem:[%s7620_s0 + $0x280] sm:$0xff] }
  0x9b   :  { %3674 = vmatprep.subr.bf16.mxu0 %v7796_v55  ;;  %v465_v0 = vmul.f32 %v3379_v10, %v4678_v48  ;;  %v477_v27 = vmul.f32 %v3379_v10, %v4559_v22  ;;  %v489_v3 = vmul.f32 %v3379_v10, %v4555_v23  ;;  %v424_v30 = vadd.f32 %v418_v54, %v365_v41 }
  0x9c   :  { %v247_v49 = vadd.f32 %v241_v62, %v193_v39  ;;  %v294_v43 = vadd.f32 %v288_v19, %v224_v50  ;;  %v436_v52 = vadd.f32 %v430_v4, %v377_v44  ;;  %v508_v35 = vmul.f32 %v3385_v33, %v4716_v24 }
  0x9d   :  { %v7797_v15 = vpack.c.bf16 %v5156_v12, %v5151_v5  ;;  %v520_v9 = vmul.f32 %v3385_v33, %v4559_v22  ;;  %v543_v53 = vmul.f32 %v3391_v37, %v4750_v51  ;;  %v555_v10 = vmul.f32 %v3391_v37, %v4563_v18  ;;  %v3403_v5 = vld [vmem:[%s7620_s0 + $0x2b0] sm:$0xff]  ;;  %v7799_v37 = vld [vmem:[#allocation19_spill] sm:$0xff] }
  0x9e   :  { %v282_v62 = vadd.f32 %v276_v14, %v247_v49  ;;  %v7798_v54 = vpack.c.bf16 %v5166_v40, %v5161_v32  ;;  %v353_v19 = vadd.f32 %v347_v63, %v294_v43  ;;  %v483_v39 = vadd.f32 %v477_v27, %v424_v30  ;;  %v3409_v63 = vld [vmem:[%s7620_s0 + $0x2e0] sm:$0xff]  ;;  %v7800_v49 = vld [vmem:[#allocation8_spill] sm:$0xff] }
  0x9f   :  { %3676 = vmatpush1.bf16.msra.mxu0 %v7797_v15  ;;  %v495_v4 = vadd.f32 %v489_v3, %v436_v52  ;;  %v578_v55 = vmul.f32 %v3397_v59, %v4759_v34  ;;  %v590_v14 = vmul.f32 %v3397_v59, %v4750_v51  ;;  %v602_v50 = vmul.f32 %v3397_v59, %v4567_v17 }
  0xa0   :  { %3678 = vmatprep.subr.bf16.mxu0 %v7798_v54  ;;  %v341_v12 = vadd.f32 %v335_v16, %v282_v62  ;;  %v614_v41 = vmul.f32 %v3397_v59, %v4563_v18  ;;  %v412_v44 = vadd.f32 %v406_v6, %v353_v19  ;;  %v561_v32 = vadd.f32 %v555_v10, %v483_v39  ;;  %v7803_v62 = vld [vmem:[#allocation10_spill] sm:$0xff]  ;;  %v3415_v10 = vld [vmem:[%s7620_s0 + $0x310] sm:$0xff] }
  0xa1   :  { %v526_v33 = vadd.f32 %v520_v9, %v495_v4  ;;  %v637_v40 = vmul.f32 %v3403_v5, %v4794_v36  ;;  %v7801_v27 = vpack.c.bf16 %v7799_v37, %v7800_v49  ;;  %v649_v3 = vmul.f32 %v3403_v5, %v4759_v34 }
  0xa2   :  { %v400_v16 = vadd.f32 %v394_v45, %v341_v12  ;;  %v661_v43 = vmul.f32 %v3403_v5, %v4668_v21  ;;  %v673_v30 = vmul.f32 %v3403_v5, %v4567_v17  ;;  %v7802_v6 = vpack.c.bf16 %v5187_v25, %v5182_v47  ;;  %v7804_v25 = vld [vmem:[#allocation9_spill] sm:$0xff]  ;;  %v3421_v12 = vld [vmem:[%s7620_s0 + $0x340] sm:$0xff] }
  0xa3   :  { %3680 = vmatpush1.bf16.msra.mxu0 %v7801_v27  ;;  %v471_v52 = vadd.f32 %v465_v0, %v412_v44  ;;  %v608_v59 = vadd.f32 %v602_v50, %v561_v32  ;;  %v620_v15 = vadd.f32 %v614_v41, %v526_v33  ;;  %v696_v9 = vmul.f32 %v3409_v63, %v7803_v62  ;;  %v3427_v50 = vld [vmem:[%s7620_s0 + $0x370] sm:$0xff] }
  0xa4   :  { %3682 = vmatprep.subr.bf16.mxu0 %v7802_v6  ;;  %v459_v45 = vadd.f32 %v453_v61, %v400_v16  ;;  %v708_v54 = vmul.f32 %v3409_v63, %v4794_v36  ;;  %v720_v19 = vmul.f32 %v3409_v63, %v4678_v48  ;;  %v732_v39 = vmul.f32 %v3409_v63, %v4668_v21  ;;  %v7806_v32 = vld [vmem:[#allocation21_spill] sm:$0xff]  ;;  %v7807_v63 = vld [vmem:[#allocation20_spill] sm:$0xff] }
  0xa5   :  { %v514_v4 = vadd.f32 %v508_v35, %v471_v52  ;;  %v667_v5 = vadd.f32 %v661_v43, %v608_v59  ;;  %v679_v47 = vadd.f32 %v673_v30, %v620_v15  ;;  %v755_v0 = vmul.f32 %v3415_v10, %v7804_v25  ;;  %v7809_v30 = vld [vmem:[#allocation12_spill] sm:$0xff] }
  0xa6   :  { %v7805_v61 = vpack.c.bf16 %v5197_v2, %v5192_v58  ;;  %v549_v41 = vadd.f32 %v543_v53, %v459_v45  ;;  %v767_v44 = vmul.f32 %v3415_v10, %v7803_v62  ;;  %v779_v35 = vmul.f32 %v3415_v10, %v4716_v24  ;;  %v3433_v58 = vld [vmem:[%s7620_s0 + $0x3a0] sm:$0xff] }
  0xa7   :  { %v791_v33 = vmul.f32 %v3415_v10, %v4678_v48  ;;  %v7808_v37 = vpack.c.bf16 %v7806_v32, %v7807_v63  ;;  %v596_v49 = vadd.f32 %v590_v14, %v514_v4  ;;  %v726_v27 = vadd.f32 %v720_v19, %v667_v5  ;;  %v7810_v45 = vld [vmem:[#allocation11_spill] sm:$0xff]  ;;  %v3439_v19 = vld [vmem:[%s7620_s0 + $0x3d0] sm:$0xff] }
  0xa8   :  { %3684 = vmatpush1.bf16.msra.mxu0 %v7805_v61  ;;  %v738_v16 = vadd.f32 %v732_v39, %v679_v47  ;;  %v810_v43 = vmul.f32 %v3421_v12, %v7804_v25  ;;  %v584_v2 = vadd.f32 %v578_v55, %v549_v41  ;;  %v822_v53 = vmul.f32 %v3421_v12, %v4716_v24  ;;  %v7813_v41 = vld [vmem:[#allocation6_spill] sm:$0xff] }
  0xa9   :  { %3686 = vmatprep.subr.bf16.mxu0 %v7808_v37  ;;  %v845_v6 = vmul.f32 %v3427_v50, %v7809_v30  ;;  %v857_v52 = vmul.f32 %v3427_v50, %v4750_v51  ;;  %v655_v59 = vadd.f32 %v649_v3, %v596_v49  ;;  %v785_v15 = vadd.f32 %v779_v35, %v726_v27  ;;  %v3451_v49 = vld [vmem:[%s7620_s0 + $0x430] sm:$0xff]  ;;  %v7815_v27 = vld [vmem:[#allocation23_spill] sm:$0xff] }
  0xaa   :  { %v797_v10 = vadd.f32 %v791_v33, %v738_v16  ;;  %v880_v14 = vmul.f32 %v3433_v58, %v7810_v45  ;;  %v7811_v39 = vpack.c.bf16 %v5221_v57, %v5216_v56  ;;  %v643_v55 = vadd.f32 %v637_v40, %v584_v2  ;;  %v3445_v56 = vld [vmem:[%s7620_s0 + $0x400] sm:$0xff] }
  0xab   :  { %v892_v4 = vmul.f32 %v3433_v58, %v7809_v30  ;;  %v904_v5 = vmul.f32 %v3433_v58, %v4759_v34  ;;  %v916_v47 = vmul.f32 %v3433_v58, %v4750_v51  ;;  %v7812_v3 = vpack.c.bf16 %v5231_v60, %v5226_v7  ;;  %v7814_v60 = vld [vmem:[#allocation14_spill] sm:$0xff] }
  0xac   :  { %3688 = vmatpush1.bf16.msra.mxu0 %v7811_v39  ;;  %v714_v12 = vadd.f32 %v708_v54, %v655_v59  ;;  %v828_v50 = vadd.f32 %v822_v53, %v797_v10  ;;  %v863_v61 = vadd.f32 %v857_v52, %v785_v15  ;;  %v939_v35 = vmul.f32 %v3439_v19, %v7813_v41  ;;  %v7816_v16 = vld [vmem:[#allocation22_spill] sm:$0xff] }
  0xad   :  { %3690 = vmatprep.subr.bf16.mxu0 %v7812_v3  ;;  %v702_v57 = vadd.f32 %v696_v9, %v643_v55  ;;  %v951_v40 = vmul.f32 %v3439_v19, %v7810_v45  ;;  %v963_v33 = vmul.f32 %v3439_v19, %v4794_v36  ;;  %v975_v32 = vmul.f32 %v3439_v19, %v4759_v34  ;;  %v7819_v19 = vld [vmem:[#allocation13_spill] sm:$0xff]  ;;  %v3457_v55 = vld [vmem:[%s7620_s0 + $0x460] sm:$0xff] }
  0xae   :  { %v773_v63 = vadd.f32 %v767_v44, %v714_v12  ;;  %v910_v37 = vadd.f32 %v904_v5, %v863_v61  ;;  %v922_v7 = vadd.f32 %v916_v47, %v828_v50  ;;  %v998_v54 = vmul.f32 %v3445_v56, %v7814_v60  ;;  %v3469_v61 = vld [vmem:[%s7620_s0 + $0x4c0] sm:$0xff] }
  0xaf   :  { %v7817_v58 = vpack.c.bf16 %v7815_v27, %v7816_v16  ;;  %v761_v9 = vadd.f32 %v755_v0, %v702_v57  ;;  %v1010_v2 = vmul.f32 %v3445_v56, %v7813_v41  ;;  %v1022_v53 = vmul.f32 %v3445_v56, %v7803_v62  ;;  %v3463_v0 = vld [vmem:[%s7620_s0 + $0x490] sm:$0xff] }
  0xb0   :  { %v1034_v52 = vmul.f32 %v3445_v56, %v4794_v36  ;;  %v7818_v44 = vpack.c.bf16 %v5253_v13, %v5248_v28  ;;  %v816_v59 = vadd.f32 %v810_v43, %v773_v63  ;;  %v969_v15 = vadd.f32 %v963_v33, %v910_v37  ;;  %v7821_v33 = vld [vmem:[#allocation16_spill] sm:$0xff] }
  0xb1   :  { %3692 = vmatpush1.bf16.msra.mxu0 %v7817_v58  ;;  %v981_v10 = vadd.f32 %v975_v32, %v922_v7  ;;  %v1057_v39 = vmul.f32 %v3451_v49, %v7819_v19  ;;  %v851_v5 = vadd.f32 %v845_v6, %v761_v9  ;;  %v1069_v47 = vmul.f32 %v3451_v49, %v7814_v60  ;;  %v7823_v37 = vld [vmem:[#allocation24_spill] sm:$0xff]  ;;  %v7825_v58 = vld [vmem:[#allocation15_spill] sm:$0xff] }
  0xb2   :  { %3694 = vmatprep.subr.bf16.mxu0 %v7818_v44  ;;  %v1081_v3 = vmul.f32 %v3451_v49, %v7804_v25  ;;  %v1093_v13 = vmul.f32 %v3451_v49, %v7803_v62  ;;  %v898_v28 = vadd.f32 %v892_v4, %v816_v59  ;;  %v1028_v43 = vadd.f32 %v1022_v53, %v969_v15  ;;  %v7822_v4 = vld [vmem:[#allocation25_spill] sm:$0xff] }
  0xb3   :  { %v1040_v12 = vadd.f32 %v1034_v52, %v981_v10  ;;  %v1112_v50 = vmul.f32 %v3457_v55, %v7819_v19  ;;  %v7820_v56 = vpack.c.bf16 %v5263_v38, %v5258_v46  ;;  %v886_v6 = vadd.f32 %v880_v14, %v851_v5  ;;  %v3475_v46 = vld [vmem:[%s7620_s0 + $0x4f0] sm:$0xff]  ;;  %v7826_v10 = vld [vmem:[#allocation7_spill] sm:$0xff] }
  0xb4   :  { %v1124_v57 = vmul.f32 %v3457_v55, %v7804_v25  ;;  %v1147_v32 = vmul.f32 %v3463_v0, %v7821_v33  ;;  %v1159_v63 = vmul.f32 %v3463_v0, %v7809_v30  ;;  %v7824_v7 = vpack.c.bf16 %v7822_v4, %v7823_v37  ;;  %v3481_v55 = vld [vmem:[%s7620_s0 + $0x520] sm:$0xff] }
  0xb5   :  { %3696 = vmatpush1.bf16.msra.mxu0 %v7820_v56  ;;  %v957_v49 = vadd.f32 %v951_v40, %v898_v28  ;;  %v1087_v27 = vadd.f32 %v1081_v3, %v1028_v43  ;;  %v1099_v16 = vadd.f32 %v1093_v13, %v1040_v12  ;;  %v1182_v9 = vmul.f32 %v3469_v61, %v7825_v58  ;;  %v7830_v56 = vld [vmem:[#allocation17_spill] sm:$0xff] }
  0xb6   :  { %3698 = vmatprep.subr.bf16.mxu0 %v7824_v7  ;;  %v945_v38 = vadd.f32 %v939_v35, %v886_v6  ;;  %v1194_v14 = vmul.f32 %v3469_v61, %v7821_v33  ;;  %v1206_v53 = vmul.f32 %v3469_v61, %v7810_v45  ;;  %v1218_v52 = vmul.f32 %v3469_v61, %v7809_v30  ;;  %v7831_v7 = vld [vmem:[#allocation18_spill] sm:$0xff] }
  0xb7   :  { %v1016_v44 = vadd.f32 %v1010_v2, %v957_v49  ;;  %v1130_v59 = vadd.f32 %v1124_v57, %v1099_v16  ;;  %v1165_v15 = vadd.f32 %v1159_v63, %v1087_v27  ;;  %v1241_v40 = vmul.f32 %v3475_v46, %v7826_v10  ;;  %v7828_v2 = vld [vmem:[#allocation26_spill] sm:$0xff]  ;;  %v3500_v27 = vld [vmem:[%s7620_s0 + $0x5b0] sm:$0xff]  ;;  %v7833_v16 = vld [vmem:[#allocation27_spill] sm:$0xff] }
  0xb8   :  { %v7827_v0 = vpack.c.bf16 %v5289_v11, %v5284_v26  ;;  %v1004_v35 = vadd.f32 %v998_v54, %v945_v38  ;;  %v1253_v5 = vmul.f32 %v3475_v46, %v7825_v58  ;;  %v1265_v3 = vmul.f32 %v3475_v46, %v7813_v41  ;;  %v3487_v11 = vld [vmem:[%s7620_s0 + $0x550] sm:$0xff]  ;;  %v3494_v49 = vld [vmem:[%s7620_s0 + $0x580] sm:$0xff] }
  0xb9   :  { %v1277_v13 = vmul.f32 %v3475_v46, %v7810_v45  ;;  %v7829_v28 = vpack.c.bf16 %v5299_v8, %v7828_v2  ;;  %v1075_v43 = vadd.f32 %v1069_v47, %v1016_v44  ;;  %v1212_v12 = vadd.f32 %v1206_v53, %v1165_v15  ;;  %v3506_v44 = vld [vmem:[%s7620_s0 + $0x5e0] sm:$0xff] }
  0xba   :  { %3700 = vmatpush1.bf16.msra.mxu0 %v7827_v0  ;;  %v1224_v61 = vadd.f32 %v1218_v52, %v1130_v59  ;;  %v1300_v6 = vmul.f32 %v3481_v55, %v7830_v56  ;;  %v1063_v26 = vadd.f32 %v1057_v39, %v1004_v35  ;;  %v1312_v54 = vmul.f32 %v3481_v55, %v7826_v10  ;;  %v7832_v39 = vld [vmem:[#allocation28_spill] sm:$0xff] }
  0xbb   :  { %3702 = vmatprep.subr.bf16.mxu0 %v7829_v28  ;;  %v1324_v57 = vmul.f32 %v3481_v55, %v7814_v60  ;;  %v1336_v63 = vmul.f32 %v3481_v55, %v7813_v41  ;;  %v1118_v4 = vadd.f32 %v1112_v50, %v1075_v43  ;;  %v1271_v37 = vadd.f32 %v1265_v3, %v1212_v12 }
  0xbc   :  { %v1283_v8 = vadd.f32 %v1277_v13, %v1224_v61  ;;  %v1359_v47 = vmul.f32 %v7831_v7, %v3487_v11  ;;  %v7834_v46 = vpack.c.bf16 %v7832_v39, %v7833_v16  ;;  %v1153_v38 = vadd.f32 %v1147_v32, %v1063_v26  ;;  %v3512_v32 = vld [vmem:[%s7620_s0 + $0x610] sm:$0xff]  ;;  %v7840_v39 = vld [vmem:[#allocation31_spill] sm:$0xff] }
  0xbd   :  { %v1371_v53 = vmul.f32 %v3487_v11, %v7830_v56  ;;  %v1383_v50 = vmul.f32 %v3487_v11, %v7819_v19  ;;  %v1395_v52 = vmul.f32 %v3487_v11, %v7814_v60  ;;  %v7835_v59 = vpack.c.bf16 %v5325_v20, %v5320_v42  ;;  %v3518_v20 = vld [vmem:[%s7620_s0 + $0x640] sm:$0xff]  ;;  %v3524_v61 = vld [vmem:[%s7620_s0 + $0x670] sm:$0xff] }
  0xbe   :  { %3704 = vmatpush1.bf16.msra.mxu0 %v7834_v46  ;;  %v1200_v15 = vadd.f32 %v1194_v14, %v1118_v4  ;;  %v1330_v55 = vadd.f32 %v1324_v57, %v1271_v37  ;;  %v1342_v0 = vadd.f32 %v1336_v63, %v1283_v8  ;;  %v1414_v35 = vmul.f32 %v3494_v49, %v7831_v7  ;;  %v7836_v11 = vld [vmem:[#allocation30_spill] sm:$0xff]  ;;  %v7837_v26 = vld [vmem:[#allocation29_spill] sm:$0xff]  ;;  %v5718_v8 = vld [vmem:[%s7618_s3 + $0x3a8] sm:$0xff] }
  0xbf   :  { %3706 = vmatprep.subr.bf16.mxu0 %v7835_v59  ;;  %v1188_v3 = vadd.f32 %v1182_v9, %v1153_v38  ;;  %v1426_v13 = vmul.f32 %v3494_v49, %v7819_v19  ;;  %v1445_v2 = vmul.f32 %v3500_v27, %v7821_v33  ;;  %v1464_v28 = vmul.f32 %v3506_v44, %v7825_v58  ;;  %v3530_v9 = vld [vmem:[%s7620_s0 + $0x6a0] sm:$0xff]  ;;  %v5723_v49 = vld [vmem:[%s7618_s3 + $0x3b8] sm:$0xff] }
  0xc0   :  { %v1259_v42 = vadd.f32 %v1253_v5, %v1200_v15  ;;  %v1389_v14 = vadd.f32 %v1383_v50, %v1330_v55  ;;  %v1401_v43 = vadd.f32 %v1395_v52, %v1342_v0  ;;  %v1476_v12 = vmul.f32 %v3506_v44, %v7821_v33  ;;  %v7839_v27 = vld [vmem:[#allocation33_spill] sm:$0xff]  ;;  %v51_v15 = vld [vmem:[%s7620_s0 + $0x20] sm:$0xff] }
  0xc1   :  { %v7838_v57 = vpack.c.bf16 %v7836_v11, %v7837_v26  ;;  %v1247_v63 = vadd.f32 %v1241_v40, %v1188_v3  ;;  %v1495_v4 = vmul.f32 %v3512_v32, %v7826_v10  ;;  %v1507_v5 = vmul.f32 %v3512_v32, %v7825_v58  ;;  %v5728_v40 = vld [vmem:[%s7618_s3 + $0x3a0] sm:$0xff]  ;;  %v5737_v44 = vld [vmem:[%s7618_s3 + $0x3b0] sm:$0xff]  ;;  %v50_v59 = vld [vmem:[%s7620_s0 + $0x18] sm:$0xff] }
  0xc2   :  { %v1526_v37 = vmul.f32 %v3518_v20, %v7830_v56  ;;  %v7841_v16 = vpack.c.bf16 %v7839_v27, %v7840_v39  ;;  %v1318_v46 = vadd.f32 %v1312_v54, %v1259_v42  ;;  %v1432_v38 = vadd.f32 %v1426_v13, %v1401_v43  ;;  %v3326_v3 = vld [vmem:[%s7620_s0 + $0x48] sm:$0xff]  ;;  %v7843_v43 = vld [vmem:[#allocation34_spill] sm:$0xff] }
  0xc3   :  { %3708 = vmatpush1.bf16.msra.mxu0 %v7838_v57  ;;  %v1451_v50 = vadd.f32 %v1445_v2, %v1389_v14  ;;  %v1538_v52 = vmul.f32 %v3518_v20, %v7826_v10  ;;  %v1306_v55 = vadd.f32 %v1300_v6, %v1247_v63  ;;  %v1557_v54 = vmul.f32 %v3524_v61, %v7831_v7  ;;  %v3327_v6 = vld [vmem:[%s7620_s0 + $0x50] sm:$0xff]  ;;  %v7842_v14 = vld [vmem:[#allocation35_spill] sm:$0xff] }
  0xc4   :  { %3710 = vmatprep.subr.bf16.mxu0 %v7841_v16  ;;  %v1569_v0 = vmul.f32 %v3524_v61, %v7830_v56  ;;  %v1588_v32 = vmul.f32 %v3530_v9, %v7831_v7  ;;  %v1377_v13 = vadd.f32 %v1371_v53, %v1318_v46  ;;  %v1482_v20 = vadd.f32 %v1476_v12, %v1432_v38  ;;  %v7846_v12 = vld [vmem:[#allocation36_spill] sm:$0xff] }
  0xc5   :  { %v1470_v2 = vadd.f32 %v1464_v28, %v1451_v50  ;;  %v3721_v42 = vpack.c.bf16 %v5723_v49, %v5718_v8  ;;  %v7844_v11 = vpack.c.bf16 %v7842_v14, %v7843_v43  ;;  %v1365_v61 = vadd.f32 %v1359_v47, %v1306_v55  ;;  %v7845_v28 = vld [vmem:[#allocation37_spill] sm:$0xff]  ;;  %v7848_v50 = vld [vmem:[#allocation39_spill] sm:$0xff] }
  0xc6   :  { %v3723_v7 = vpack.c.bf16 %v5737_v44, %v5728_v40  ;;  %v60_v9 = vmul.f32 %v4534_v31, %v50_v59  ;;  %v61_v53 = vmul.f32 %v4534_v31, %v51_v15  ;;  %v7847_v26 = vpack.c.bf16 %v7845_v28, %v7846_v12  ;;  %v3332_v47 = vld [vmem:[%s7620_s0 + $0x78] sm:$0xff]  ;;  %v3333_v40 = vld [vmem:[%s7620_s0 + $0x80] sm:$0xff] }
  0xc7   :  { %3712 = vmatpush1.bf16.msra.mxu0 %v7844_v11  ;;  %v1420_v57 = vadd.f32 %v1414_v35, %v1377_v13  ;;  %v1501_v63 = vadd.f32 %v1495_v4, %v1470_v2  ;;  %v1513_v8 = vadd.f32 %v1507_v5, %v1482_v20  ;;  %v83_v49 = vmul.f32 %v3326_v3, %v4538_v1  ;;  %v7849_v44 = vld [vmem:[#allocation38_spill] sm:$0xff]  ;;  %v7852_v20 = vld [vmem:[#allocation40_spill] sm:$0xff] }
  0xc8   :  { %3714 = vmatprep.subr.bf16.mxu0 %v7847_v26  ;;  %v84_v27 = vmul.f32 %v3327_v6, %v4538_v1  ;;  %v95_v39 = vmul.f32 %v3326_v3, %v4534_v31  ;;  %v96_v16 = vmul.f32 %v3327_v6, %v4534_v31  ;;  %v118_v35 = vmul.f32 %v3332_v47, %v4542_v29  ;;  %v3338_v3 = vld [vmem:[%s7620_s0 + $0xa8] sm:$0xff] }
  0xc9   :  { %v1532_v4 = vadd.f32 %v1526_v37, %v1501_v63  ;;  %v1544_v5 = vadd.f32 %v1538_v52, %v1513_v8  ;;  %v1600_v46 = vmax.f32 %v1365_v61, %v1420_v57  ;;  %v89_v38 = vadd.f32 %v83_v49, %v60_v9  ;;  %v3339_v37 = vld [vmem:[%s7620_s0 + $0xb0] sm:$0xff]  ;;  %v3344_v9 = vld [vmem:[%s7620_s0 + $0xd8] sm:$0xff]  ;;  %v3345_v57 = vld [vmem:[%s7620_s0 + $0xe0] sm:$0xff] }
  0xca   :  { %v7850_v59 = vpack.c.bf16 %v7848_v50, %v7849_v44  ;;  %v90_v15 = vadd.f32 %v84_v27, %v61_v53  ;;  %v119_v55 = vmul.f32 %v3333_v40, %v4542_v29  ;;  %v130_v13 = vmul.f32 %v3332_v47, %v4538_v1  ;;  %v7851_v52 = vld [vmem:[#allocation41_spill] sm:$0xff]  ;;  %v3350_v49 = vld [vmem:[%s7620_s0 + $0x108] sm:$0xff]  ;;  %v7855_v27 = vld [vmem:[#allocation42_spill] sm:$0xff] }
  0xcb   :  { %v131_v2 = vmul.f32 %v3333_v40, %v4538_v1  ;;  %v7853_v6 = vpack.c.bf16 %v7851_v52, %v7852_v20  ;;  %v1563_v14 = vadd.f32 %v1557_v54, %v1532_v4  ;;  %v1575_v43 = vadd.f32 %v1569_v0, %v1544_v5  ;;  %v3351_v47 = vld [vmem:[%s7620_s0 + $0x110] sm:$0xff]  ;;  %v7854_v40 = vld [vmem:[#allocation43_spill] sm:$0xff] }
  0xcc   :  { %3716 = vmatpush1.bf16.msra.mxu0 %v7850_v59  ;;  %v124_v11 = vadd.f32 %v118_v35, %v89_v38  ;;  %v153_v61 = vmul.f32 %v3338_v3, %v4555_v23  ;;  %v125_v53 = vadd.f32 %v119_v55, %v90_v15  ;;  %v136_v28 = vadd.f32 %v130_v13, %v95_v39  ;;  %v3356_v59 = vld [vmem:[%s7620_s0 + $0x138] sm:$0xff]  ;;  %v3357_v15 = vld [vmem:[%s7620_s0 + $0x140] sm:$0xff] }
  0xcd   :  { %3718 = vmatprep.subr.bf16.mxu0 %v7853_v6  ;;  %v137_v12 = vadd.f32 %v131_v2, %v96_v16  ;;  %v154_v26 = vmul.f32 %v3339_v37, %v4555_v23  ;;  %v1594_v63 = vadd.f32 %v1588_v32, %v1575_v43  ;;  %v165_v54 = vmul.f32 %v3338_v3, %v4542_v29  ;;  %v3362_v6 = vld [vmem:[%s7620_s0 + $0x168] sm:$0xff] }
  0xce   :  { %v159_v8 = vadd.f32 %v153_v61, %v124_v11  ;;  %v166_v0 = vmul.f32 %v3339_v37, %v4542_v29  ;;  %v7856_v39 = vpack.c.bf16 %v7854_v40, %v7855_v27  ;;  %v188_v32 = vmul.f32 %v3344_v9, %v4559_v22  ;;  %v3363_v61 = vld [vmem:[%s7620_s0 + $0x170] sm:$0xff] }
  0xcf   :  { %v160_v16 = vadd.f32 %v154_v26, %v125_v53  ;;  %v189_v35 = vmul.f32 %v3345_v57, %v4559_v22  ;;  %v200_v4 = vmul.f32 %v3344_v9, %v4555_v23  ;;  %v1606_v5 = vmax.f32 %v1563_v14, %v1594_v63  ;;  %v7857_v9 = vld [vmem:[#allocation32_spill] sm:$0xff] }
  0xd0   :  { %3720 = vmatpush1.bf16.msra.mxu0 %v7856_v39  ;;  %v171_v38 = vadd.f32 %v165_v54, %v136_v28  ;;  %v172_v50 = vadd.f32 %v166_v0, %v137_v12  ;;  %v201_v44 = vmul.f32 %v3345_v57, %v4555_v23  ;;  %v194_v55 = vadd.f32 %v188_v32, %v159_v8  ;;  %v3368_v32 = vld [vmem:[%s7620_s0 + $0x198] sm:$0xff] }
  0xd1   :  { %3722 = vmatprep.subr.bf16.mxu0 %v3721_v42  ;;  %v195_v13 = vadd.f32 %v189_v35, %v160_v16  ;;  %v219_v2 = vmul.f32 %v3350_v49, %v4559_v22  ;;  %v220_v3 = vmul.f32 %v3351_v47, %v4559_v22  ;;  %v1612_v37 = vmax.f32 %v1600_v46, %v1606_v5 }
  0xd2   :  { %v206_v42 = vadd.f32 %v200_v4, %v171_v38  ;;  %v207_v52 = vadd.f32 %v201_v44, %v172_v50  ;;  %v242_v20 = vmul.f32 %v3356_v59, %v4563_v18  ;;  %v243_v14 = vmul.f32 %v3357_v15, %v4563_v18  ;;  %v3369_v50 = vld [vmem:[%s7620_s0 + $0x1a0] sm:$0xff] }
  0xd3   :  { %v254_v43 = vmul.f32 %v3356_v59, %v4534_v31  ;;  %v255_v11 = vmul.f32 %v3357_v15, %v4534_v31  ;;  %v277_v46 = vmul.f32 %v3362_v6, %v4567_v17  ;;  %v1625_v53 = vadd.f32 %v7857_v9, %v1612_v37 }
  0xd4   :  { %3724 = vmatpush1.bf16.msra.mxu0 %v3723_v7  ;;  %v225_v28 = vadd.f32 %v219_v2, %v206_v42  ;;  %v226_v12 = vadd.f32 %v220_v3, %v207_v52  ;;  %v248_v26 = vadd.f32 %v242_v20, %v194_v55  ;;  %v249_v57 = vadd.f32 %v243_v14, %v195_v13  ;;  %v7858_v13 = vld [vmem:[#allocation45_spill] sm:$0xff] }
  0xd5   :  { %v278_v7 = vmul.f32 %v3363_v61, %v4567_v17  ;;  %v289_v63 = vmul.f32 %v3362_v6, %v4563_v18  ;;  %v290_v8 = vmul.f32 %v3363_v61, %v4563_v18  ;;  %v5838_v54 = vmax.f32 %v1625_v53, 0.0 }
  0xd6   :  { %v283_v0 = vadd.f32 %v277_v46, %v248_v26  ;;  %v301_v49 = vmul.f32 %v3362_v6, %v4538_v1  ;;  %v302_v47 = vmul.f32 %v3363_v61, %v4538_v1  ;;  %v313_v16 = vmul.f32 %v3362_v6, %v4534_v31 }
  0xd7   :  { %v284_v40 = vadd.f32 %v278_v7, %v249_v57  ;;  %v295_v27 = vadd.f32 %v289_v63, %v225_v28  ;;  %v296_v39 = vadd.f32 %v290_v8, %v226_v12  ;;  %v1642_v35 = vrot.slane %v5838_v54, 1  ;;  %v3375_v28 = vld [vmem:[%s7620_s0 + $0x1d0] sm:$0xff] }
  0xd8   :  { %v307_v4 = vadd.f32 %v301_v49, %v254_v43  ;;  %v308_v5 = vadd.f32 %v302_v47, %v255_v11  ;;  %v314_v38 = vmul.f32 %v3363_v61, %v4534_v31  ;;  %v336_v44 = vmul.f32 %v3368_v32, %v4668_v21  ;;  %v3374_v11 = vld [vmem:[%s7620_s0 + $0x1c8] sm:$0xff] }
  0xd9   :  { %v337_v59 = vmul.f32 %v3369_v50, %v4668_v21  ;;  %v348_v15 = vmul.f32 %v3368_v32, %v4567_v17  ;;  %v349_v55 = vmul.f32 %v3369_v50, %v4567_v17  ;;  %v7859_v2 = vrot.slane %v7858_v13, 1 }
  0xda   :  { %v360_v37 = vmul.f32 %v3368_v32, %v4542_v29  ;;  %v361_v42 = vmul.f32 %v3369_v50, %v4542_v29  ;;  %v372_v52 = vmul.f32 %v3368_v32, %v4538_v1  ;;  %v342_v20 = vadd.f32 %v336_v44, %v283_v0 }
  0xdb   :  { %v1643_v3 = vsel %vm1638_vm0, %v7859_v2, %v1642_v35  ;;  %v343_v6 = vadd.f32 %v337_v59, %v284_v40  ;;  %v354_v14 = vadd.f32 %v348_v15, %v295_v27  ;;  %v355_v43 = vadd.f32 %v349_v55, %v296_v39 }
  0xdc   :  { %1931 = vmatprep.mubr.f32.mxu0 %v1643_v3  ;;  %v366_v61 = vadd.f32 %v360_v37, %v307_v4  ;;  %v367_v46 = vadd.f32 %v361_v42, %v308_v5  ;;  %v373_v9 = vmul.f32 %v3369_v50, %v4538_v1  ;;  %v378_v53 = vadd.f32 %v372_v52, %v313_v16  ;;  %v3380_v16 = vld [vmem:[%s7620_s0 + $0x1f8] sm:$0xff]  ;;  %v3386_v42 = vld [vmem:[%s7620_s0 + $0x228] sm:$0xff]  ;;  %v3387_v52 = vld [vmem:[%s7620_s0 + $0x230] sm:$0xff] }
  0xdd   :  { %1932 = vmatmul.mubr.f32.gmra.mrb[2].mxu0 %v7858_v13  ;;  %v395_v12 = vmul.f32 %v3374_v11, %v4678_v48  ;;  %v396_v26 = vmul.f32 %v3375_v28, %v4678_v48  ;;  %v407_v57 = vmul.f32 %v3374_v11, %v4668_v21  ;;  %v408_v7 = vmul.f32 %v3375_v28, %v4668_v21 }
  0xde   :  { %v379_v63 = vadd.f32 %v373_v9, %v314_v38  ;;  %v419_v8 = vmul.f32 %v3374_v11, %v4555_v23  ;;  %v420_v0 = vmul.f32 %v3375_v28, %v4555_v23  ;;  %v431_v49 = vmul.f32 %v3374_v11, %v4542_v29  ;;  %v3381_v38 = vld [vmem:[%s7620_s0 + $0x200] sm:$0xff]  ;;  %v3392_v11 = vld [vmem:[%s7620_s0 + $0x258] sm:$0xff] }
  0xdf   :  { %v401_v47 = vadd.f32 %v395_v12, %v342_v20  ;;  %v402_v40 = vadd.f32 %v396_v26, %v343_v6  ;;  %v413_v27 = vadd.f32 %v407_v57, %v354_v14  ;;  %v414_v39 = vadd.f32 %v408_v7, %v355_v43 }
  0xe0   :  { %v425_v32 = vadd.f32 %v419_v8, %v366_v61  ;;  %v426_v35 = vadd.f32 %v420_v0, %v367_v46  ;;  %v432_v4 = vmul.f32 %v3375_v28, %v4542_v29  ;;  %v437_v5 = vadd.f32 %v431_v49, %v378_v53  ;;  %v3393_v28 = vld [vmem:[%s7620_s0 + $0x260] sm:$0xff] }
  0xe1   :  { %v454_v50 = vmul.f32 %v3380_v16, %v4716_v24  ;;  %v455_v44 = vmul.f32 %v3381_v38, %v4716_v24  ;;  %v466_v59 = vmul.f32 %v3380_v16, %v4678_v48  ;;  %v467_v15 = vmul.f32 %v3381_v38, %v4678_v48 }
  0xe2   :  { %v438_v55 = vadd.f32 %v432_v4, %v379_v63  ;;  %v478_v2 = vmul.f32 %v3380_v16, %v4559_v22  ;;  %v479_v3 = vmul.f32 %v3381_v38, %v4559_v22  ;;  %v490_v37 = vmul.f32 %v3380_v16, %v4555_v23  ;;  %v3398_v16 = vld [vmem:[%s7620_s0 + $0x288] sm:$0xff] }
  0xe3   :  { %v460_v20 = vadd.f32 %v454_v50, %v401_v47  ;;  %v461_v6 = vadd.f32 %v455_v44, %v402_v40  ;;  %v472_v14 = vadd.f32 %v466_v59, %v413_v27  ;;  %v473_v43 = vadd.f32 %v467_v15, %v414_v39 }
  0xe4   :  { %v484_v61 = vadd.f32 %v478_v2, %v425_v32  ;;  %v485_v46 = vadd.f32 %v479_v3, %v426_v35  ;;  %v491_v9 = vmul.f32 %v3381_v38, %v4555_v23  ;;  %v496_v53 = vadd.f32 %v490_v37, %v437_v5  ;;  %v3399_v38 = vld [vmem:[%s7620_s0 + $0x290] sm:$0xff] }
  0xe5   :  { %v509_v12 = vmul.f32 %v3386_v42, %v4716_v24  ;;  %v510_v26 = vmul.f32 %v3387_v52, %v4716_v24  ;;  %v521_v57 = vmul.f32 %v3386_v42, %v4559_v22  ;;  %v522_v7 = vmul.f32 %v3387_v52, %v4559_v22 }
  0xe6   :  { %v497_v63 = vadd.f32 %v491_v9, %v438_v55  ;;  %v544_v8 = vmul.f32 %v3392_v11, %v4750_v51  ;;  %v545_v0 = vmul.f32 %v3393_v28, %v4750_v51  ;;  %v556_v49 = vmul.f32 %v3392_v11, %v4563_v18  ;;  %v3405_v9 = vld [vmem:[%s7620_s0 + $0x2c0] sm:$0xff] }
  0xe7   :  { %v515_v47 = vadd.f32 %v509_v12, %v472_v14  ;;  %v516_v40 = vadd.f32 %v510_v26, %v473_v43  ;;  %v527_v27 = vadd.f32 %v521_v57, %v496_v53  ;;  %v557_v39 = vmul.f32 %v3393_v28, %v4563_v18  ;;  %v3404_v14 = vld [vmem:[%s7620_s0 + $0x2b8] sm:$0xff] }
  0xe8   :  { %v528_v32 = vadd.f32 %v522_v7, %v497_v63  ;;  %v550_v35 = vadd.f32 %v544_v8, %v460_v20  ;;  %v551_v4 = vadd.f32 %v545_v0, %v461_v6  ;;  %v562_v5 = vadd.f32 %v556_v49, %v484_v61 }
  0xe9   :  { %v563_v50 = vadd.f32 %v557_v39, %v485_v46  ;;  %v579_v44 = vmul.f32 %v3398_v16, %v4759_v34  ;;  %v580_v59 = vmul.f32 %v3399_v38, %v4759_v34  ;;  %v591_v15 = vmul.f32 %v3398_v16, %v4750_v51 }
  0xea   :  { %v592_v55 = vmul.f32 %v3399_v38, %v4750_v51  ;;  %v603_v2 = vmul.f32 %v3398_v16, %v4567_v17  ;;  %v604_v3 = vmul.f32 %v3399_v38, %v4567_v17  ;;  %v615_v37 = vmul.f32 %v3398_v16, %v4563_v18 }
  0xeb   :  { %v585_v42 = vadd.f32 %v579_v44, %v550_v35  ;;  %v586_v52 = vadd.f32 %v580_v59, %v551_v4  ;;  %v597_v20 = vadd.f32 %v591_v15, %v515_v47  ;;  %v616_v6 = vmul.f32 %v3399_v38, %v4563_v18  ;;  %v3411_v4 = vld [vmem:[%s7620_s0 + $0x2f0] sm:$0xff] }
  0xec   :  { %v598_v43 = vadd.f32 %v592_v55, %v516_v40  ;;  %v609_v11 = vadd.f32 %v603_v2, %v562_v5  ;;  %v610_v61 = vadd.f32 %v604_v3, %v563_v50  ;;  %v621_v46 = vadd.f32 %v615_v37, %v527_v27  ;;  %v3410_v27 = vld [vmem:[%s7620_s0 + $0x2e8] sm:$0xff] }
  0xed   :  { %v622_v53 = vadd.f32 %v616_v6, %v528_v32  ;;  %v638_v28 = vmul.f32 %v3404_v14, %v4794_v36  ;;  %v639_v12 = vmul.f32 %v3405_v9, %v4794_v36  ;;  %v650_v26 = vmul.f32 %v3404_v14, %v4759_v34 }
  0xee   :  { %v651_v57 = vmul.f32 %v3405_v9, %v4759_v34  ;;  %v662_v7 = vmul.f32 %v3404_v14, %v4668_v21  ;;  %v663_v63 = vmul.f32 %v3405_v9, %v4668_v21  ;;  %v674_v8 = vmul.f32 %v3404_v14, %v4567_v17 }
  0xef   :  { %v644_v0 = vadd.f32 %v638_v28, %v585_v42  ;;  %v645_v49 = vadd.f32 %v639_v12, %v586_v52  ;;  %v656_v47 = vadd.f32 %v650_v26, %v597_v20  ;;  %v675_v40 = vmul.f32 %v3405_v9, %v4567_v17  ;;  %v3416_v20 = vld [vmem:[%s7620_s0 + $0x318] sm:$0xff] }
  0xf0   :  { %v657_v39 = vadd.f32 %v651_v57, %v598_v43  ;;  %v668_v16 = vadd.f32 %v662_v7, %v609_v11  ;;  %v669_v32 = vadd.f32 %v663_v63, %v610_v61  ;;  %v680_v35 = vadd.f32 %v674_v8, %v621_v46  ;;  %v3417_v61 = vld [vmem:[%s7620_s0 + $0x320] sm:$0xff]  ;;  %v3422_v63 = vld [vmem:[%s7620_s0 + $0x348] sm:$0xff] }
  0xf1   :  { %v681_v5 = vadd.f32 %v675_v40, %v622_v53  ;;  %v697_v38 = vmul.f32 %v3410_v27, %v7803_v62  ;;  %v698_v50 = vmul.f32 %v3411_v4, %v7803_v62  ;;  %v709_v44 = vmul.f32 %v3410_v27, %v4794_v36  ;;  %v3423_v40 = vld [vmem:[%s7620_s0 + $0x350] sm:$0xff] }
  0xf2   :  { %v710_v59 = vmul.f32 %v3411_v4, %v4794_v36  ;;  %v721_v15 = vmul.f32 %v3410_v27, %v4678_v48  ;;  %v722_v55 = vmul.f32 %v3411_v4, %v4678_v48  ;;  %v733_v2 = vmul.f32 %v3410_v27, %v4668_v21  ;;  %v3428_v27 = vld [vmem:[%s7620_s0 + $0x378] sm:$0xff] }
  0xf3   :  { %v703_v3 = vadd.f32 %v697_v38, %v644_v0  ;;  %v704_v37 = vadd.f32 %v698_v50, %v645_v49  ;;  %v715_v42 = vadd.f32 %v709_v44, %v656_v47  ;;  %v734_v52 = vmul.f32 %v3411_v4, %v4668_v21  ;;  %v3429_v4 = vld [vmem:[%s7620_s0 + $0x380] sm:$0xff] }
  0xf4   :  { %v716_v6 = vadd.f32 %v710_v59, %v657_v39  ;;  %v727_v14 = vadd.f32 %v721_v15, %v668_v16  ;;  %v728_v43 = vadd.f32 %v722_v55, %v669_v32  ;;  %v739_v11 = vadd.f32 %v733_v2, %v680_v35 }
  0xf5   :  { %v740_v46 = vadd.f32 %v734_v52, %v681_v5  ;;  %v756_v9 = vmul.f32 %v3416_v20, %v7804_v25  ;;  %v757_v53 = vmul.f32 %v3417_v61, %v7804_v25  ;;  %v768_v28 = vmul.f32 %v3416_v20, %v7803_v62 }
  0xf6   :  { %v769_v12 = vmul.f32 %v3417_v61, %v7803_v62  ;;  %v780_v26 = vmul.f32 %v3416_v20, %v4716_v24  ;;  %v781_v57 = vmul.f32 %v3417_v61, %v4716_v24  ;;  %v792_v7 = vmul.f32 %v3416_v20, %v4678_v48  ;;  %v3434_v20 = vld [vmem:[%s7620_s0 + $0x3a8] sm:$0xff] }
  0xf7   :  { %v762_v8 = vadd.f32 %v756_v9, %v703_v3  ;;  %v763_v0 = vadd.f32 %v757_v53, %v704_v37  ;;  %v774_v49 = vadd.f32 %v768_v28, %v715_v42  ;;  %v793_v47 = vmul.f32 %v3417_v61, %v4678_v48  ;;  %v3435_v61 = vld [vmem:[%s7620_s0 + $0x3b0] sm:$0xff] }
  0xf8   :  { %v775_v39 = vadd.f32 %v769_v12, %v716_v6  ;;  %v786_v16 = vadd.f32 %v780_v26, %v727_v14  ;;  %v787_v32 = vadd.f32 %v781_v57, %v728_v43  ;;  %v798_v35 = vadd.f32 %v792_v7, %v739_v11 }
  0xf9   :  { %v799_v5 = vadd.f32 %v793_v47, %v740_v46  ;;  %v811_v38 = vmul.f32 %v3422_v63, %v7804_v25  ;;  %v812_v50 = vmul.f32 %v3423_v40, %v7804_v25  ;;  %v823_v44 = vmul.f32 %v3422_v63, %v4716_v24  ;;  %v3440_v47 = vld [vmem:[%s7620_s0 + $0x3d8] sm:$0xff] }
  0xfa   :  { %v824_v59 = vmul.f32 %v3423_v40, %v4716_v24  ;;  %v846_v15 = vmul.f32 %v3428_v27, %v7809_v30  ;;  %v847_v55 = vmul.f32 %v3429_v4, %v7809_v30  ;;  %v858_v2 = vmul.f32 %v3428_v27, %v4750_v51 }
  0xfb   :  { %v817_v3 = vadd.f32 %v811_v38, %v774_v49  ;;  %v818_v37 = vadd.f32 %v812_v50, %v775_v39  ;;  %v829_v42 = vadd.f32 %v823_v44, %v798_v35  ;;  %v859_v52 = vmul.f32 %v3429_v4, %v4750_v51 }
  0xfc   :  { %v830_v6 = vadd.f32 %v824_v59, %v799_v5  ;;  %v852_v14 = vadd.f32 %v846_v15, %v762_v8  ;;  %v853_v43 = vadd.f32 %v847_v55, %v763_v0  ;;  %v864_v11 = vadd.f32 %v858_v2, %v786_v16 }
  0xfd   :  { %v865_v46 = vadd.f32 %v859_v52, %v787_v32  ;;  %v881_v9 = vmul.f32 %v3434_v20, %v7810_v45  ;;  %v882_v53 = vmul.f32 %v3435_v61, %v7810_v45  ;;  %v893_v28 = vmul.f32 %v3434_v20, %v7809_v30  ;;  %v3441_v32 = vld [vmem:[%s7620_s0 + $0x3e0] sm:$0xff] }
  0xfe   :  { %v894_v12 = vmul.f32 %v3435_v61, %v7809_v30  ;;  %v905_v26 = vmul.f32 %v3434_v20, %v4759_v34  ;;  %v906_v57 = vmul.f32 %v3435_v61, %v4759_v34  ;;  %v917_v7 = vmul.f32 %v3434_v20, %v4750_v51 }
  0xff   :  { %v887_v63 = vadd.f32 %v881_v9, %v852_v14  ;;  %v888_v8 = vadd.f32 %v882_v53, %v853_v43  ;;  %v899_v0 = vadd.f32 %v893_v28, %v817_v3  ;;  %v918_v49 = vmul.f32 %v3435_v61, %v4750_v51  ;;  %v3447_v43 = vld [vmem:[%s7620_s0 + $0x410] sm:$0xff] }
 0x100   :  { %v900_v40 = vadd.f32 %v894_v12, %v818_v37  ;;  %v911_v27 = vadd.f32 %v905_v26, %v864_v11  ;;  %v912_v39 = vadd.f32 %v906_v57, %v865_v46  ;;  %v923_v16 = vadd.f32 %v917_v7, %v829_v42  ;;  %v3446_v42 = vld [vmem:[%s7620_s0 + $0x408] sm:$0xff] }
 0x101   :  { %v924_v35 = vadd.f32 %v918_v49, %v830_v6  ;;  %v940_v4 = vmul.f32 %v3440_v47, %v7813_v41  ;;  %v941_v5 = vmul.f32 %v3441_v32, %v7813_v41  ;;  %v952_v38 = vmul.f32 %v3440_v47, %v7810_v45 }
 0x102   :  { %v953_v50 = vmul.f32 %v3441_v32, %v7810_v45  ;;  %v964_v44 = vmul.f32 %v3440_v47, %v4794_v36  ;;  %v965_v59 = vmul.f32 %v3441_v32, %v4794_v36  ;;  %v976_v15 = vmul.f32 %v3440_v47, %v4759_v34 }
 0x103   :  { %v946_v55 = vadd.f32 %v940_v4, %v887_v63  ;;  %v947_v2 = vadd.f32 %v941_v5, %v888_v8  ;;  %v958_v3 = vadd.f32 %v952_v38, %v899_v0  ;;  %v977_v37 = vmul.f32 %v3441_v32, %v4759_v34  ;;  %v3452_v0 = vld [vmem:[%s7620_s0 + $0x438] sm:$0xff] }
 0x104   :  { %v959_v52 = vadd.f32 %v953_v50, %v900_v40  ;;  %v970_v20 = vadd.f32 %v964_v44, %v911_v27  ;;  %v971_v6 = vadd.f32 %v965_v59, %v912_v39  ;;  %v982_v14 = vadd.f32 %v976_v15, %v923_v16  ;;  %v3453_v39 = vld [vmem:[%s7620_s0 + $0x440] sm:$0xff]  ;;  %v3458_v59 = vld [vmem:[%s7620_s0 + $0x468] sm:$0xff] }
 0x105   :  { %v983_v11 = vadd.f32 %v977_v37, %v924_v35  ;;  %v999_v61 = vmul.f32 %v3446_v42, %v7814_v60  ;;  %v1000_v46 = vmul.f32 %v3447_v43, %v7814_v60  ;;  %v1011_v9 = vmul.f32 %v3446_v42, %v7813_v41  ;;  %v3459_v37 = vld [vmem:[%s7620_s0 + $0x470] sm:$0xff] }
 0x106   :  { %v1012_v53 = vmul.f32 %v3447_v43, %v7813_v41  ;;  %v1023_v28 = vmul.f32 %v3446_v42, %v7803_v62  ;;  %v1024_v12 = vmul.f32 %v3447_v43, %v7803_v62  ;;  %v1035_v26 = vmul.f32 %v3446_v42, %v4794_v36  ;;  %v3464_v42 = vld [vmem:[%s7620_s0 + $0x498] sm:$0xff] }
 0x107   :  { %v1005_v57 = vadd.f32 %v999_v61, %v946_v55  ;;  %v1006_v7 = vadd.f32 %v1000_v46, %v947_v2  ;;  %v1017_v63 = vadd.f32 %v1011_v9, %v958_v3  ;;  %v1036_v8 = vmul.f32 %v3447_v43, %v4794_v36  ;;  %v3465_v43 = vld [vmem:[%s7620_s0 + $0x4a0] sm:$0xff] }
 0x108   :  { %v1018_v49 = vadd.f32 %v1012_v53, %v959_v52  ;;  %v1029_v47 = vadd.f32 %v1023_v28, %v970_v20  ;;  %v1030_v40 = vadd.f32 %v1024_v12, %v971_v6  ;;  %v1041_v27 = vadd.f32 %v1035_v26, %v982_v14 }
 0x109   :  { %v1042_v16 = vadd.f32 %v1036_v8, %v983_v11  ;;  %v1058_v32 = vmul.f32 %v3452_v0, %v7819_v19  ;;  %v1059_v35 = vmul.f32 %v3453_v39, %v7819_v19  ;;  %v1070_v4 = vmul.f32 %v3452_v0, %v7814_v60 }
 0x10a   :  { %v1071_v5 = vmul.f32 %v3453_v39, %v7814_v60  ;;  %v1082_v38 = vmul.f32 %v3452_v0, %v7804_v25  ;;  %v1083_v50 = vmul.f32 %v3453_v39, %v7804_v25  ;;  %v1094_v44 = vmul.f32 %v3452_v0, %v7803_v62  ;;  %v3470_v0 = vld [vmem:[%s7620_s0 + $0x4c8] sm:$0xff] }
 0x10b   :  { %v1064_v15 = vadd.f32 %v1058_v32, %v1005_v57  ;;  %v1065_v55 = vadd.f32 %v1059_v35, %v1006_v7  ;;  %v1076_v2 = vadd.f32 %v1070_v4, %v1017_v63  ;;  %v1095_v3 = vmul.f32 %v3453_v39, %v7803_v62  ;;  %v3471_v39 = vld [vmem:[%s7620_s0 + $0x4d0] sm:$0xff] }
 0x10c   :  { %v1077_v52 = vadd.f32 %v1071_v5, %v1018_v49  ;;  %v1088_v20 = vadd.f32 %v1082_v38, %v1029_v47  ;;  %v1089_v6 = vadd.f32 %v1083_v50, %v1030_v40  ;;  %v1100_v14 = vadd.f32 %v1094_v44, %v1041_v27 }
 0x10d   :  { %v1101_v11 = vadd.f32 %v1095_v3, %v1042_v16  ;;  %v1113_v61 = vmul.f32 %v3458_v59, %v7819_v19  ;;  %v1114_v46 = vmul.f32 %v3459_v37, %v7819_v19  ;;  %v1125_v9 = vmul.f32 %v3458_v59, %v7804_v25  ;;  %v3476_v3 = vld [vmem:[%s7620_s0 + $0x4f8] sm:$0xff] }
 0x10e   :  { %v1126_v53 = vmul.f32 %v3459_v37, %v7804_v25  ;;  %v1148_v28 = vmul.f32 %v3464_v42, %v7821_v33  ;;  %v1149_v12 = vmul.f32 %v3465_v43, %v7821_v33  ;;  %v1160_v26 = vmul.f32 %v3464_v42, %v7809_v30 }
 0x10f   :  { %v1119_v57 = vadd.f32 %v1113_v61, %v1076_v2  ;;  %v1120_v7 = vadd.f32 %v1114_v46, %v1077_v52  ;;  %v1131_v63 = vadd.f32 %v1125_v9, %v1100_v14  ;;  %v1161_v8 = vmul.f32 %v3465_v43, %v7809_v30 }
 0x110   :  { %v1132_v49 = vadd.f32 %v1126_v53, %v1101_v11  ;;  %v1154_v47 = vadd.f32 %v1148_v28, %v1064_v15  ;;  %v1155_v40 = vadd.f32 %v1149_v12, %v1065_v55  ;;  %v1166_v27 = vadd.f32 %v1160_v26, %v1088_v20 }
 0x111   :  { %v1167_v16 = vadd.f32 %v1161_v8, %v1089_v6  ;;  %v1183_v32 = vmul.f32 %v3470_v0, %v7825_v58  ;;  %v1184_v35 = vmul.f32 %v3471_v39, %v7825_v58  ;;  %v1195_v4 = vmul.f32 %v3470_v0, %v7821_v33  ;;  %v3477_v6 = vld [vmem:[%s7620_s0 + $0x500] sm:$0xff] }
 0x112   :  { %v1196_v5 = vmul.f32 %v3471_v39, %v7821_v33  ;;  %v1207_v38 = vmul.f32 %v3470_v0, %v7810_v45  ;;  %v1208_v50 = vmul.f32 %v3471_v39, %v7810_v45  ;;  %v1219_v44 = vmul.f32 %v3470_v0, %v7809_v30 }
 0x113   :  { %v1189_v59 = vadd.f32 %v1183_v32, %v1154_v47  ;;  %v1190_v15 = vadd.f32 %v1184_v35, %v1155_v40  ;;  %v1201_v55 = vadd.f32 %v1195_v4, %v1119_v57  ;;  %v1220_v2 = vmul.f32 %v3471_v39, %v7809_v30  ;;  %v3483_v40 = vld [vmem:[%s7620_s0 + $0x530] sm:$0xff] }
 0x114   :  { %v1202_v37 = vadd.f32 %v1196_v5, %v1120_v7  ;;  %v1213_v42 = vadd.f32 %v1207_v38, %v1166_v27  ;;  %v1214_v52 = vadd.f32 %v1208_v50, %v1167_v16  ;;  %v1225_v20 = vadd.f32 %v1219_v44, %v1131_v63  ;;  %v3482_v63 = vld [vmem:[%s7620_s0 + $0x528] sm:$0xff] }
 0x115   :  { %v1226_v14 = vadd.f32 %v1220_v2, %v1132_v49  ;;  %v1242_v43 = vmul.f32 %v3476_v3, %v7826_v10  ;;  %v1243_v11 = vmul.f32 %v3477_v6, %v7826_v10  ;;  %v1254_v61 = vmul.f32 %v3476_v3, %v7825_v58 }
 0x116   :  { %v1255_v46 = vmul.f32 %v3477_v6, %v7825_v58  ;;  %v1266_v9 = vmul.f32 %v3476_v3, %v7813_v41  ;;  %v1267_v53 = vmul.f32 %v3477_v6, %v7813_v41  ;;  %v1278_v28 = vmul.f32 %v3476_v3, %v7810_v45 }
 0x117   :  { %v1248_v12 = vadd.f32 %v1242_v43, %v1189_v59  ;;  %v1249_v26 = vadd.f32 %v1243_v11, %v1190_v15  ;;  %v1260_v57 = vadd.f32 %v1254_v61, %v1201_v55  ;;  %v1279_v7 = vmul.f32 %v3477_v6, %v7810_v45  ;;  %v3488_v55 = vld [vmem:[%s7620_s0 + $0x558] sm:$0xff] }
 0x118   :  { %v1261_v8 = vadd.f32 %v1255_v46, %v1202_v37  ;;  %v1272_v0 = vadd.f32 %v1266_v9, %v1213_v42  ;;  %v1273_v49 = vadd.f32 %v1267_v53, %v1214_v52  ;;  %v1284_v47 = vadd.f32 %v1278_v28, %v1225_v20  ;;  %v3489_v52 = vld [vmem:[%s7620_s0 + $0x560] sm:$0xff]  ;;  %v6114_v6 = vld [vmem:[%s7619_s1 + $0x18] ss:$0 sm:$0xff]  ;;  %v3495_v28 = vld [vmem:[%s7620_s0 + $0x588] sm:$0xff] }
 0x119   :  { %v1285_v27 = vadd.f32 %v1279_v7, %v1226_v14  ;;  %v1301_v39 = vmul.f32 %v3482_v63, %v7830_v56  ;;  %v1302_v16 = vmul.f32 %v3483_v40, %v7830_v56  ;;  %v1313_v32 = vmul.f32 %v3482_v63, %v7826_v10  ;;  %v3496_v7 = vld [vmem:[%s7620_s0 + $0x590] sm:$0xff] }
 0x11a   :  { %v1314_v35 = vmul.f32 %v3483_v40, %v7826_v10  ;;  %v1325_v4 = vmul.f32 %v3482_v63, %v7814_v60  ;;  %v1326_v5 = vmul.f32 %v3483_v40, %v7814_v60  ;;  %v1337_v38 = vmul.f32 %v3482_v63, %v7813_v41  ;;  %v3501_v63 = vld [vmem:[%s7620_s0 + $0x5b8] sm:$0xff] }
 0x11b   :  { %v1307_v50 = vadd.f32 %v1301_v39, %v1248_v12  ;;  %v1308_v44 = vadd.f32 %v1302_v16, %v1249_v26  ;;  %v1319_v59 = vadd.f32 %v1313_v32, %v1260_v57  ;;  %v1338_v15 = vmul.f32 %v3483_v40, %v7813_v41 }
 0x11c   :  { %v1320_v2 = vadd.f32 %v1314_v35, %v1261_v8  ;;  %v1331_v3 = vadd.f32 %v1325_v4, %v1272_v0  ;;  %v1332_v37 = vadd.f32 %v1326_v5, %v1273_v49  ;;  %v1343_v42 = vadd.f32 %v1337_v38, %v1284_v47  ;;  %v3502_v8 = vld [vmem:[%s7620_s0 + $0x5c0] sm:$0xff]  ;;  %v3507_v35 = vld [vmem:[%s7620_s0 + $0x5e8] sm:$0xff] }
 0x11d   :  { %v1344_v20 = vadd.f32 %v1338_v15, %v1285_v27  ;;  %v1360_v14 = vmul.f32 %v6114_v6, %v3488_v55  ;;  %v1361_v43 = vmul.f32 %v6114_v6, %v3489_v52  ;;  %v1372_v11 = vmul.f32 %v3488_v55, %v7830_v56 }
 0x11e   :  { %v1373_v61 = vmul.f32 %v3489_v52, %v7830_v56  ;;  %v1384_v46 = vmul.f32 %v3488_v55, %v7819_v19  ;;  %v1385_v9 = vmul.f32 %v3489_v52, %v7819_v19  ;;  %v1396_v53 = vmul.f32 %v3488_v55, %v7814_v60 }
 0x11f   :  { %v6126_v12 = vadd.f32 %v1360_v14, %v1307_v50  ;;  %v1378_v26 = vadd.f32 %v1372_v11, %v1319_v59  ;;  %v1397_v57 = vmul.f32 %v3489_v52, %v7814_v60  ;;  %v6138_v0 = vadd.f32 %v1361_v43, %v1308_v44  ;;  %v3508_v50 = vld [vmem:[%s7620_s0 + $0x5f0] sm:$0xff]  ;;  %v3513_v59 = vld [vmem:[%s7620_s0 + $0x618] sm:$0xff]  ;;  %v3519_v43 = vld [vmem:[%s7620_s0 + $0x648] sm:$0xff] }
 0x120   :  { %v1390_v49 = vadd.f32 %v1384_v46, %v1331_v3  ;;  %v1391_v47 = vadd.f32 %v1385_v9, %v1332_v37  ;;  %v1402_v40 = vadd.f32 %v1396_v53, %v1343_v42  ;;  %v1379_v27 = vadd.f32 %v1373_v61, %v1320_v2  ;;  %v3514_v37 = vld [vmem:[%s7620_s0 + $0x620] sm:$0xff]  ;;  %v3520_v53 = vld [vmem:[%s7620_s0 + $0x650] sm:$0xff] }
 0x121   :  { %v1403_v39 = vadd.f32 %v1397_v57, %v1344_v20  ;;  %v1415_v16 = vmul.f32 %v6114_v6, %v3495_v28  ;;  %v1427_v32 = vmul.f32 %v3495_v28, %v7819_v19  ;;  %v1428_v4 = vmul.f32 %v3496_v7, %v7819_v19 }
 0x122   :  { %v1446_v5 = vmul.f32 %v3501_v63, %v7821_v33  ;;  %v1447_v38 = vmul.f32 %v3502_v8, %v7821_v33  ;;  %v1465_v44 = vmul.f32 %v3507_v35, %v7825_v58  ;;  %v1416_v15 = vmul.f32 %v6114_v6, %v3496_v7  ;;  %v3525_v63 = vld [vmem:[%s7620_s0 + $0x678] sm:$0xff] }
 0x123   :  { %v6156_v55 = vadd.f32 %v1415_v16, %v1378_v26  ;;  %v1433_v2 = vadd.f32 %v1427_v32, %v1402_v40  ;;  %v1466_v3 = vmul.f32 %v3508_v50, %v7825_v58  ;;  %v1434_v42 = vadd.f32 %v1428_v4, %v1403_v39  ;;  %v3526_v39 = vld [vmem:[%s7620_s0 + $0x680] sm:$0xff] }
 0x124   :  { %v1452_v52 = vadd.f32 %v1446_v5, %v1390_v49  ;;  %v1453_v20 = vadd.f32 %v1447_v38, %v1391_v47  ;;  %v1477_v14 = vmul.f32 %v3507_v35, %v7821_v33  ;;  %v1478_v11 = vmul.f32 %v3508_v50, %v7821_v33  ;;  %v3531_v5 = vld [vmem:[%s7620_s0 + $0x6a8] sm:$0xff]  ;;  %v3532_v38 = vld [vmem:[%s7620_s0 + $0x6b0] sm:$0xff] }
 0x125   :  { %v1496_v61 = vmul.f32 %v3513_v59, %v7826_v10  ;;  %v1497_v46 = vmul.f32 %v3514_v37, %v7826_v10  ;;  %v1508_v9 = vmul.f32 %v3513_v59, %v7825_v58  ;;  %v1509_v7 = vmul.f32 %v3514_v37, %v7825_v58  ;;  %v52_v37 = vld [vmem:[%s7620_s0 + $0x28] sm:$0xff] }
 0x126   :  { %v1471_v28 = vadd.f32 %v1465_v44, %v1452_v52  ;;  %v1472_v26 = vadd.f32 %v1466_v3, %v1453_v20  ;;  %v1483_v57 = vadd.f32 %v1477_v14, %v1433_v2  ;;  %v1484_v8 = vadd.f32 %v1478_v11, %v1434_v42  ;;  %v1822_v3 = vld [vmem:[%s7618_s3 + $0x3c8] sm:$0xff]  ;;  %v1821_v11 = vld [vmem:[%s7618_s3 + $0x3c0] sm:$0xff] }
 0x127   :  { %v1527_v49 = vmul.f32 %v3519_v43, %v7830_v56  ;;  %v1528_v47 = vmul.f32 %v3520_v53, %v7830_v56  ;;  %v1539_v40 = vmul.f32 %v3519_v43, %v7826_v10  ;;  %v1540_v4 = vmul.f32 %v3520_v53, %v7826_v10  ;;  %v1824_v43 = vld [vmem:[%s7618_s3 + $0x3d8] sm:$0xff] }
 0x128   :  { %v1502_v16 = vadd.f32 %v1496_v61, %v1471_v28  ;;  %v1503_v32 = vadd.f32 %v1497_v46, %v1472_v26  ;;  %v1514_v35 = vadd.f32 %v1508_v9, %v1483_v57  ;;  %v1515_v50 = vadd.f32 %v1509_v7, %v1484_v8  ;;  %v1823_v61 = vld [vmem:[%s7618_s3 + $0x3d0] sm:$0xff]  ;;  %v3328_v26 = vld [vmem:[%s7620_s0 + $0x58] sm:$0xff] }
 0x129   :  { %v1558_v44 = vmul.f32 %v6114_v6, %v3525_v63  ;;  %v1559_v59 = vmul.f32 %v6114_v6, %v3526_v39  ;;  %v1570_v2 = vmul.f32 %v3525_v63, %v7830_v56  ;;  %v1571_v14 = vmul.f32 %v3526_v39, %v7830_v56 }
 0x12a   :  { %v1533_v42 = vadd.f32 %v1527_v49, %v1502_v16  ;;  %v1534_v52 = vadd.f32 %v1528_v47, %v1503_v32  ;;  %v1545_v20 = vadd.f32 %v1539_v40, %v1514_v35  ;;  %v1422_v46 = vadd.f32 %v1416_v15, %v1379_v27  ;;  %v3334_v49 = vld [vmem:[%s7620_s0 + $0x88] sm:$0xff]  ;;  %v3340_v27 = vld [vmem:[%s7620_s0 + $0xb8] sm:$0xff] }
 0x12b   :  { %v1546_v9 = vadd.f32 %v1540_v4, %v1515_v50  ;;  %v1589_v53 = vmul.f32 %v6114_v6, %v3531_v5  ;;  %v1590_v28 = vmul.f32 %v6114_v6, %v3532_v38  ;;  %v1601_v8 = vmax.f32 %v6126_v12, %v6156_v55  ;;  %v3346_v55 = vld [vmem:[%s7620_s0 + $0xe8] sm:$0xff]  ;;  %v3352_v4 = vld [vmem:[%s7620_s0 + $0x118] sm:$0xff] }
 0x12c   :  { %v1564_v57 = vadd.f32 %v1558_v44, %v1533_v42  ;;  %v1565_v7 = vadd.f32 %v1559_v59, %v1534_v52  ;;  %v1576_v63 = vadd.f32 %v1570_v2, %v1545_v20  ;;  %v3725_v47 = vpack.c.bf16 %v1824_v43, %v1822_v3  ;;  %v3358_v59 = vld [vmem:[%s7620_s0 + $0x148] sm:$0xff] }
 0x12d   :  { %v1577_v15 = vadd.f32 %v1571_v14, %v1546_v9  ;;  %v3727_v40 = vpack.c.bf16 %v1823_v61, %v1821_v11  ;;  %v62_v39 = vmul.f32 %v4534_v31, %v52_v37  ;;  %v85_v32 = vmul.f32 %v3328_v26, %v4538_v1 }
 0x12e   :  { %v1595_v16 = vadd.f32 %v1589_v53, %v1576_v63  ;;  %v97_v35 = vmul.f32 %v3328_v26, %v4534_v31  ;;  %v120_v12 = vmul.f32 %v3334_v49, %v4542_v29  ;;  %v1602_v38 = vmax.f32 %v6138_v0, %v1422_v46  ;;  %3726 = vmatprep.subr.bf16.mxu0 %v3725_v47  ;;  %v3364_v0 = vld [vmem:[%s7620_s0 + $0x178] sm:$0xff]  ;;  %v6255_v63 = vld [vmem:[%s7621_s2] ss:$0 sm:$0xff] }
 0x12f   :  { %v1596_v5 = vadd.f32 %v1590_v28, %v1577_v15  ;;  %v132_v50 = vmul.f32 %v3334_v49, %v4538_v1  ;;  %v167_v44 = vmul.f32 %v3340_v27, %v4542_v29  ;;  %3728 = vmatpush1.bf16.msra.mxu0 %v3727_v40  ;;  %v91_v3 = vadd.f32 %v85_v32, %v62_v39 }
 0x130   :  { %v1607_v2 = vmax.f32 %v1564_v57, %v1595_v16  ;;  %v155_v37 = vmul.f32 %v3340_v27, %v4555_v23  ;;  %v190_v42 = vmul.f32 %v3346_v55, %v4559_v22  ;;  %v202_v14 = vmul.f32 %v3346_v55, %v4555_v23 }
 0x131   :  { %v1608_v52 = vmax.f32 %v1565_v7, %v1596_v5  ;;  %v138_v20 = vadd.f32 %v132_v50, %v97_v35  ;;  %v221_v43 = vmul.f32 %v3352_v4, %v4559_v22  ;;  %v126_v61 = vadd.f32 %v120_v12, %v91_v3  ;;  %v3370_v7 = vld [vmem:[%s7620_s0 + $0x1a8] sm:$0xff]  ;;  %v3376_v4 = vld [vmem:[%s7620_s0 + $0x1d8] sm:$0xff] }
 0x132   :  { %v1613_v11 = vmax.f32 %v1601_v8, %v1607_v2  ;;  %v244_v46 = vmul.f32 %v3358_v59, %v4563_v18  ;;  %v256_v9 = vmul.f32 %v3358_v59, %v4534_v31  ;;  %v279_v26 = vmul.f32 %v3364_v0, %v4567_v17 }
 0x133   :  { %v1614_v53 = vmax.f32 %v1602_v38, %v1608_v52  ;;  %v173_v28 = vadd.f32 %v167_v44, %v138_v20  ;;  %v303_v57 = vmul.f32 %v3364_v0, %v4538_v1  ;;  %v161_v49 = vadd.f32 %v155_v37, %v126_v61  ;;  %v3382_v52 = vld [vmem:[%s7620_s0 + $0x208] sm:$0xff]  ;;  %v3388_v20 = vld [vmem:[%s7620_s0 + $0x238] sm:$0xff] }
 0x134   :  { %v1626_v8 = vadd.f32 %v6255_v63, %v1613_v11  ;;  %v291_v27 = vmul.f32 %v3364_v0, %v4563_v18  ;;  %v315_v15 = vmul.f32 %v3364_v0, %v4534_v31  ;;  %v338_v16 = vmul.f32 %v3370_v7, %v4668_v21 }
 0x135   :  { %v1627_v47 = vadd.f32 %v6255_v63, %v1614_v53  ;;  %v208_v40 = vadd.f32 %v202_v14, %v173_v28  ;;  %v309_v39 = vadd.f32 %v303_v57, %v256_v9  ;;  %v196_v35 = vadd.f32 %v190_v42, %v161_v49  ;;  %v3400_v49 = vld [vmem:[%s7620_s0 + $0x298] sm:$0xff] }
 0x136   :  { %v6262_v32 = vmax.f32 %v1626_v8, 0.0  ;;  %v362_v12 = vmul.f32 %v3370_v7, %v4542_v29  ;;  %v374_v55 = vmul.f32 %v3370_v7, %v4538_v1  ;;  %v350_v38 = vmul.f32 %v3370_v7, %v4567_v17 }
 0x137   :  { %v6269_v5 = vmax.f32 %v1627_v47, 0.0  ;;  %v227_v31 = vadd.f32 %v221_v43, %v208_v40  ;;  %v409_v50 = vmul.f32 %v3376_v4, %v4668_v21  ;;  %v250_v59 = vadd.f32 %v244_v46, %v196_v35  ;;  %v3394_v46 = vld [vmem:[%s7620_s0 + $0x268] sm:$0xff] }
 0x138   :  { %v1649_v44 = vrot.slane %v6262_v32, 1  ;;  %v368_v2 = vadd.f32 %v362_v12, %v309_v39  ;;  %v380_v3 = vadd.f32 %v374_v55, %v315_v15  ;;  %v421_v1 = vmul.f32 %v3376_v4, %v4555_v23 }
 0x139   :  { %v1650_v37 = vrot.slane %v6269_v5, 1  ;;  %v297_v42 = vadd.f32 %v291_v27, %v227_v31  ;;  %v433_v0 = vmul.f32 %v3376_v4, %v4542_v29  ;;  %v285_v14 = vadd.f32 %v279_v26, %v250_v59 }
 0x13a   :  { %v397_v43 = vmul.f32 %v3376_v4, %v4678_v48  ;;  %v468_v11 = vmul.f32 %v3382_v52, %v4678_v48  ;;  %v480_v61 = vmul.f32 %v3382_v52, %v4559_v22  ;;  %v427_v53 = vadd.f32 %v421_v1, %v368_v2  ;;  %v3412_v2 = vld [vmem:[%s7620_s0 + $0x2f8] sm:$0xff] }
 0x13b   :  { %v1651_v29 = vsel %vm1638_vm0, %v1649_v44, %v1650_v37  ;;  %v356_v9 = vadd.f32 %v350_v38, %v297_v42  ;;  %v439_v28 = vadd.f32 %v433_v0, %v380_v3  ;;  %v344_v57 = vadd.f32 %v338_v16, %v285_v14 }
 0x13c   :  { %1937 = vmatprep.mubr.f32.mxu0 %v1651_v29  ;;  %v456_v26 = vmul.f32 %v3382_v52, %v4716_v24  ;;  %v492_v7 = vmul.f32 %v3382_v52, %v4555_v23  ;;  %v523_v8 = vmul.f32 %v3388_v20, %v4559_v22  ;;  %v486_v15 = vadd.f32 %v480_v61, %v427_v53  ;;  %v3406_v22 = vld [vmem:[%s7620_s0 + $0x2c8] sm:$0xff] }
 0x13d   :  { %1938 = vmatmul.mubr.f32.gmra.mrb[4].mxu0 %v6262_v32  ;;  %v415_v27 = vadd.f32 %v409_v50, %v356_v9  ;;  %v511_v47 = vmul.f32 %v3388_v20, %v4716_v24  ;;  %v558_v40 = vmul.f32 %v3394_v46, %v4563_v18  ;;  %v403_v39 = vadd.f32 %v397_v43, %v344_v57  ;;  %v3418_v43 = vld [vmem:[%s7620_s0 + $0x328] sm:$0xff] }
 0x13e   :  { %v498_v16 = vadd.f32 %v492_v7, %v439_v28  ;;  %v546_v35 = vmul.f32 %v3394_v46, %v4750_v51  ;;  %v593_v23 = vmul.f32 %v3400_v49, %v4750_v51  ;;  %v605_v4 = vmul.f32 %v3400_v49, %v4567_v17 }
 0x13f   :  { %v474_v12 = vadd.f32 %v468_v11, %v415_v27  ;;  %v564_v55 = vadd.f32 %v558_v40, %v486_v15  ;;  %v617_v31 = vmul.f32 %v3400_v49, %v4563_v18  ;;  %v462_v38 = vadd.f32 %v456_v26, %v403_v39  ;;  %v3430_v26 = vld [vmem:[%s7620_s0 + $0x388] sm:$0xff]  ;;  %v3436_v39 = vld [vmem:[%s7620_s0 + $0x3b8] sm:$0xff] }
 0x140   :  { %v529_v50 = vadd.f32 %v523_v8, %v498_v16  ;;  %v581_v44 = vmul.f32 %v3400_v49, %v4759_v34  ;;  %v652_v59 = vmul.f32 %v3406_v22, %v4759_v34  ;;  %v664_v1 = vmul.f32 %v3406_v22, %v4668_v21 }
 0x141   :  { %v517_v3 = vadd.f32 %v511_v47, %v474_v12  ;;  %v611_v42 = vadd.f32 %v605_v4, %v564_v55  ;;  %v676_v0 = vmul.f32 %v3406_v22, %v4567_v17  ;;  %v552_v52 = vadd.f32 %v546_v35, %v462_v38  ;;  %v3424_v17 = vld [vmem:[%s7620_s0 + $0x358] sm:$0xff] }
 0x142   :  { %v623_v20 = vadd.f32 %v617_v31, %v529_v50  ;;  %v640_v18 = vmul.f32 %v3406_v22, %v4794_v36  ;;  %v711_v14 = vmul.f32 %v3412_v2, %v4794_v36  ;;  %v723_v46 = vmul.f32 %v3412_v2, %v4678_v48 }
 0x143   :  { %v599_v11 = vadd.f32 %v593_v23, %v517_v3  ;;  %v670_v61 = vadd.f32 %v664_v1, %v611_v42  ;;  %v735_v29 = vmul.f32 %v3412_v2, %v4668_v21  ;;  %v587_v9 = vadd.f32 %v581_v44, %v552_v52  ;;  %v3448_v1 = vld [vmem:[%s7620_s0 + $0x418] sm:$0xff] }
 0x144   :  { %v682_v53 = vadd.f32 %v676_v0, %v623_v20  ;;  %v699_v28 = vmul.f32 %v3412_v2, %v7803_v62  ;;  %v770_v57 = vmul.f32 %v3418_v43, %v7803_v62  ;;  %v782_v49 = vmul.f32 %v3418_v43, %v4716_v24 }
 0x145   :  { %v658_v7 = vadd.f32 %v652_v59, %v599_v11  ;;  %v729_v8 = vadd.f32 %v723_v46, %v670_v61  ;;  %v794_v21 = vmul.f32 %v3418_v43, %v4678_v48  ;;  %v646_v27 = vadd.f32 %v640_v18, %v587_v9  ;;  %v3454_v61 = vld [vmem:[%s7620_s0 + $0x448] sm:$0xff] }
 0x146   :  { %v741_v15 = vadd.f32 %v735_v29, %v682_v53  ;;  %v758_v47 = vmul.f32 %v3418_v43, %v7804_v25  ;;  %v825_v40 = vmul.f32 %v3424_v17, %v4716_v24  ;;  %v813_v23 = vmul.f32 %v3424_v17, %v7804_v25  ;;  %v3442_v24 = vld [vmem:[%s7620_s0 + $0x3e8] sm:$0xff] }
 0x147   :  { %v717_v16 = vadd.f32 %v711_v14, %v658_v7  ;;  %v788_v35 = vadd.f32 %v782_v49, %v729_v8  ;;  %v860_v22 = vmul.f32 %v3430_v26, %v4750_v51  ;;  %v705_v12 = vadd.f32 %v699_v28, %v646_v27  ;;  %v3466_v7 = vld [vmem:[%s7620_s0 + $0x4a8] sm:$0xff] }
 0x148   :  { %v800_v55 = vadd.f32 %v794_v21, %v741_v15  ;;  %v848_v48 = vmul.f32 %v3430_v26, %v7809_v30  ;;  %v895_v4 = vmul.f32 %v3436_v39, %v7809_v30  ;;  %v907_v50 = vmul.f32 %v3436_v39, %v4759_v34 }
 0x149   :  { %v776_v31 = vadd.f32 %v770_v57, %v717_v16  ;;  %v866_v38 = vadd.f32 %v860_v22, %v788_v35  ;;  %v919_v44 = vmul.f32 %v3436_v39, %v4750_v51  ;;  %v764_v59 = vadd.f32 %v758_v47, %v705_v12 }
 0x14a   :  { %v831_v2 = vadd.f32 %v825_v40, %v800_v55  ;;  %v883_v3 = vmul.f32 %v3436_v39, %v7810_v45  ;;  %v954_v42 = vmul.f32 %v3442_v24, %v7810_v45  ;;  %v966_v20 = vmul.f32 %v3442_v24, %v4794_v36  ;;  %v3472_v39 = vld [vmem:[%s7620_s0 + $0x4d8] sm:$0xff] }
 0x14b   :  { %v819_v0 = vadd.f32 %v813_v23, %v776_v31  ;;  %v913_v52 = vadd.f32 %v907_v50, %v866_v38  ;;  %v978_v18 = vmul.f32 %v3442_v24, %v4759_v34  ;;  %v854_v14 = vadd.f32 %v848_v48, %v764_v59  ;;  %v3460_v34 = vld [vmem:[%s7620_s0 + $0x478] sm:$0xff] }
 0x14c   :  { %v925_v43 = vadd.f32 %v919_v44, %v831_v2  ;;  %v942_v51 = vmul.f32 %v3442_v24, %v7813_v41  ;;  %v1013_v11 = vmul.f32 %v3448_v1, %v7813_v41  ;;  %v1025_v17 = vmul.f32 %v3448_v1, %v7803_v62 }
 0x14d   :  { %v901_v46 = vadd.f32 %v895_v4, %v819_v0  ;;  %v972_v29 = vadd.f32 %v966_v20, %v913_v52  ;;  %v1037_v9 = vmul.f32 %v3448_v1, %v4794_v36  ;;  %v889_v53 = vadd.f32 %v883_v3, %v854_v14  ;;  %v3484_v3 = vld [vmem:[%s7620_s0 + $0x538] sm:$0xff] }
 0x14e   :  { %v984_v28 = vadd.f32 %v978_v18, %v925_v43  ;;  %v1001_v57 = vmul.f32 %v3448_v1, %v7814_v60  ;;  %v1072_v26 = vmul.f32 %v3454_v61, %v7814_v60  ;;  %v1084_v21 = vmul.f32 %v3454_v61, %v7804_v25  ;;  %v3490_v43 = vld [vmem:[%s7620_s0 + $0x568] sm:$0xff] }
 0x14f   :  { %v960_v8 = vadd.f32 %v954_v42, %v901_v46  ;;  %v1031_v49 = vadd.f32 %v1025_v17, %v972_v29  ;;  %v1096_v36 = vmul.f32 %v3454_v61, %v7803_v62  ;;  %v948_v27 = vadd.f32 %v942_v51, %v889_v53 }
 0x150   :  { %v1043_v15 = vadd.f32 %v1037_v9, %v984_v28  ;;  %v1060_v47 = vmul.f32 %v3454_v61, %v7819_v19  ;;  %v1127_v40 = vmul.f32 %v3460_v34, %v7804_v25  ;;  %v1115_v23 = vmul.f32 %v3460_v34, %v7819_v19  ;;  %v3478_v25 = vld [vmem:[%s7620_s0 + $0x508] sm:$0xff] }
 0x151   :  { %v1019_v16 = vadd.f32 %v1013_v11, %v960_v8  ;;  %v1090_v35 = vadd.f32 %v1084_v21, %v1031_v49  ;;  %v1162_v22 = vmul.f32 %v3466_v7, %v7809_v30  ;;  %v1007_v12 = vadd.f32 %v1001_v57, %v948_v27  ;;  %v3503_v34 = vld [vmem:[%s7620_s0 + $0x5c8] sm:$0xff] }
 0x152   :  { %v1102_v55 = vadd.f32 %v1096_v36, %v1043_v15  ;;  %v1150_v62 = vmul.f32 %v3466_v7, %v7821_v33  ;;  %v1197_v48 = vmul.f32 %v3472_v39, %v7821_v33  ;;  %v1209_v31 = vmul.f32 %v3472_v39, %v7810_v45 }
 0x153   :  { %v1078_v4 = vadd.f32 %v1072_v26, %v1019_v16  ;;  %v1168_v24 = vadd.f32 %v1162_v22, %v1090_v35  ;;  %v1221_v38 = vmul.f32 %v3472_v39, %v7809_v30  ;;  %v1066_v50 = vadd.f32 %v1060_v47, %v1007_v12  ;;  %v3521_v16 = vld [vmem:[%s7620_s0 + $0x658] sm:$0xff]  ;;  %v1825_v12 = vld [vmem:[%s7618_s3 + $0x3e0] sm:$0xff] }
 0x154   :  { %v1133_v44 = vadd.f32 %v1127_v40, %v1102_v55  ;;  %v1185_v59 = vmul.f32 %v3472_v39, %v7825_v58  ;;  %v1256_v2 = vmul.f32 %v3478_v25, %v7825_v58  ;;  %v1268_v0 = vmul.f32 %v3478_v25, %v7813_v41  ;;  %v1828_v22 = vld [vmem:[%s7618_s3 + $0x3f8] sm:$0xff] }
 0x155   :  { %v1121_v42 = vadd.f32 %v1115_v23, %v1078_v4  ;;  %v1215_v1 = vadd.f32 %v1209_v31, %v1168_v24  ;;  %v1280_v52 = vmul.f32 %v3478_v25, %v7810_v45  ;;  %v1156_v20 = vadd.f32 %v1150_v62, %v1066_v50  ;;  %v3497_v45 = vld [vmem:[%s7620_s0 + $0x598] sm:$0xff]  ;;  %v3527_v50 = vld [vmem:[%s7620_s0 + $0x688] sm:$0xff] }
 0x156   :  { %v1227_v18 = vadd.f32 %v1221_v38, %v1133_v44  ;;  %v1244_v30 = vmul.f32 %v3478_v25, %v7826_v10  ;;  %v1315_v14 = vmul.f32 %v3484_v3, %v7826_v10  ;;  %v1327_v61 = vmul.f32 %v3484_v3, %v7814_v60  ;;  %v1830_v44 = vld [vmem:[%s7618_s3 + $0x408] sm:$0xff] }
 0x157   :  { %v1203_v51 = vadd.f32 %v1197_v48, %v1121_v42  ;;  %v1274_v11 = vadd.f32 %v1268_v0, %v1215_v1  ;;  %v1339_v46 = vmul.f32 %v3484_v3, %v7813_v41  ;;  %v1191_v29 = vadd.f32 %v1185_v59, %v1156_v20  ;;  %v3509_v41 = vld [vmem:[%s7620_s0 + $0x5f8] sm:$0xff] }
 0x158   :  { %v1286_v17 = vadd.f32 %v1280_v52, %v1227_v18  ;;  %v1303_v9 = vmul.f32 %v3484_v3, %v7830_v56  ;;  %v1386_v57 = vmul.f32 %v3490_v43, %v7819_v19  ;;  %v1398_v26 = vmul.f32 %v3490_v43, %v7814_v60  ;;  %v3515_v60 = vld [vmem:[%s7620_s0 + $0x628] sm:$0xff]  ;;  %v1832_v59 = vld [vmem:[%s7618_s3 + $0x418] sm:$0xff] }
 0x159   :  { %v1262_v53 = vadd.f32 %v1256_v2, %v1203_v51  ;;  %v1333_v28 = vadd.f32 %v1327_v61, %v1274_v11  ;;  %v1250_v7 = vadd.f32 %v1244_v30, %v1191_v29  ;;  %v1374_v49 = vmul.f32 %v3490_v43, %v7830_v56  ;;  %v3533_v0 = vld [vmem:[%s7620_s0 + $0x6b8] sm:$0xff] }
 0x15a   :  { %v1345_v8 = vadd.f32 %v1339_v46, %v1286_v17  ;;  %v1429_v21 = vmul.f32 %v3497_v45, %v7819_v19  ;;  %v1448_v15 = vmul.f32 %v3503_v34, %v7821_v33  ;;  %v1467_v47 = vmul.f32 %v3509_v41, %v7825_v58  ;;  %v1826_v19 = vld [vmem:[%s7618_s3 + $0x3e8] sm:$0xff] }
 0x15b   :  { %v1321_v36 = vadd.f32 %v1315_v14, %v1262_v53  ;;  %v1392_v27 = vadd.f32 %v1386_v57, %v1333_v28  ;;  %v1479_v39 = vmul.f32 %v3509_v41, %v7821_v33  ;;  %v1498_v23 = vmul.f32 %v3515_v60, %v7826_v10  ;;  %v1827_v33 = vld [vmem:[%s7618_s3 + $0x3f0] sm:$0xff] }
 0x15c   :  { %v1404_v40 = vadd.f32 %v1398_v26, %v1345_v8  ;;  %v1362_v55 = vmul.f32 %v6114_v6, %v3490_v43  ;;  %v1417_v62 = vmul.f32 %v6114_v6, %v3497_v45  ;;  %v1510_v25 = vmul.f32 %v3515_v60, %v7825_v58 }
 0x15d   :  { %v1454_v35 = vadd.f32 %v1448_v15, %v1392_v27  ;;  %v1309_v4 = vadd.f32 %v1303_v9, %v1250_v7  ;;  %v1380_v24 = vadd.f32 %v1374_v49, %v1321_v36  ;;  %v1529_v38 = vmul.f32 %v3521_v16, %v7830_v56 }
 0x15e   :  { %v1435_v48 = vadd.f32 %v1429_v21, %v1404_v40  ;;  %v1541_v58 = vmul.f32 %v3521_v16, %v7826_v10  ;;  %v3729_v3 = vpack.c.bf16 %v1828_v22, %v1826_v19  ;;  %v3731_v42 = vpack.c.bf16 %v1827_v33, %v1825_v12  ;;  %v7860_v21 = vld [vmem:[#allocation44_spill] sm:$0xff]  ;;  %v1829_v40 = vld [vmem:[%s7618_s3 + $0x400] sm:$0xff] }
 0x15f   :  { %v1473_v31 = vadd.f32 %v1467_v47, %v1454_v35  ;;  %v1560_v20 = vmul.f32 %v6114_v6, %v3527_v50  ;;  %v1572_v18 = vmul.f32 %v3527_v50, %v7830_v56  ;;  %v3733_v30 = vpack.c.bf16 %v1832_v59, %v1830_v44  ;;  %v1834_v19 = vld [vmem:[%s7618_s3 + $0x428] sm:$0xff]  ;;  %v1833_v33 = vld [vmem:[%s7618_s3 + $0x420] sm:$0xff]  ;;  %v1839_v50 = vld [vmem:[%s7618_s3 + $0x450] sm:$0xff] }
 0x160   :  { %v1485_v2 = vadd.f32 %v1479_v39, %v1435_v48  ;;  %3730 = vmatprep.subr.bf16.mxu0 %v3729_v3  ;;  %v1368_v14 = vadd.f32 %v1362_v55, %v1309_v4  ;;  %v1423_v43 = vadd.f32 %v1417_v62, %v1380_v24  ;;  %v1591_v10 = vmul.f32 %v6114_v6, %v3533_v0  ;;  %v1831_v39 = vld [vmem:[%s7618_s3 + $0x410] sm:$0xff]  ;;  %v1838_v48 = vld [vmem:[%s7618_s3 + $0x448] sm:$0xff] }
 0x161   :  { %v1504_v1 = vadd.f32 %v1498_v23, %v1473_v31  ;;  %3732 = vmatpush1.bf16.msra.mxu0 %v3731_v42  ;;  %v1679_v17 = vrot.slane %v6262_v32, 3  ;;  %v1680_v9 = vrot.slane %v6269_v5, 3  ;;  %v1664_v56 = vrot.slane %v6262_v32, 2  ;;  %v1835_v55 = vld [vmem:[%s7618_s3 + $0x430] sm:$0xff]  ;;  %v1842_v59 = vld [vmem:[%s7618_s3 + $0x468] sm:$0xff] }
 0x162   :  { %v1516_v52 = vadd.f32 %v1510_v25, %v1485_v2  ;;  %3734 = vmatprep.subr.bf16.mxu0 %v3733_v30  ;;  %v1603_v45 = vmax.f32 %v1368_v14, %v1423_v43  ;;  %v1665_v34 = vrot.slane %v6269_v5, 2  ;;  %v1694_v26 = vrot.slane %v6262_v32, 4  ;;  %v1840_v25 = vld [vmem:[%s7618_s3 + $0x458] sm:$0xff]  ;;  %v1843_v0 = vld [vmem:[%s7618_s3 + $0x470] sm:$0xff] }
 0x163   :  { %v1535_v51 = vadd.f32 %v1529_v38, %v1504_v1  ;;  %v1681_v28 = vsel %vm1671_vm1, %v1679_v17, %v1680_v9  ;;  %v1695_v41 = vrot.slane %v6269_v5, 4  ;;  %v1672_v36 = vrot.slane %v7860_v21, 3  ;;  %v1837_v38 = vld [vmem:[%s7618_s3 + $0x440] sm:$0xff]  ;;  %v1844_v2 = vld [vmem:[%s7618_s3 + $0x478] sm:$0xff] }
 0x164   :  { %v1547_v11 = vadd.f32 %v1541_v58, %v1516_v52  ;;  %v1666_v6 = vsel %vm1656_vm2, %v1664_v56, %v1665_v34  ;;  %v1673_v27 = vrot.slane %v7858_v13, 3  ;;  %v1657_v32 = vrot.slane %v7860_v21, 2  ;;  %v1841_v1 = vld [vmem:[%s7618_s3 + $0x460] sm:$0xff]  ;;  %v1854_v56 = vld [vmem:[%s7618_s3 + $0x4c8] sm:$0xff] }
 0x165   :  { %v1566_v61 = vadd.f32 %v1560_v20, %v1535_v51  ;;  %v6468_v8 = vsel %vm1686_vm3, %v1694_v26, %v1695_v41  ;;  %v1658_v47 = vrot.slane %v7858_v13, 2  ;;  %v1675_v16 = vrot.slane %v5838_v54, 3  ;;  %v1846_v20 = vld [vmem:[%s7618_s3 + $0x488] sm:$0xff]  ;;  %v1845_v51 = vld [vmem:[%s7618_s3 + $0x480] sm:$0xff] }
 0x166   :  { %v1578_v46 = vadd.f32 %v1572_v18, %v1547_v11  ;;  %v1674_v60 = vsel %vm1671_vm1, %v1672_v36, %v1673_v27  ;;  %v3735_v23 = vpack.c.bf16 %v1831_v39, %v1829_v40  ;;  %v1660_v22 = vrot.slane %v5838_v54, 2  ;;  %v1848_v18 = vld [vmem:[%s7618_s3 + $0x498] sm:$0xff]  ;;  %v1847_v11 = vld [vmem:[%s7618_s3 + $0x490] sm:$0xff]  ;;  %v1849_v17 = vld [vmem:[%s7618_s3 + $0x4a0] sm:$0xff] }
 0x167   :  { %v1659_v35 = vsel %vm1656_vm2, %v1657_v32, %v1658_v47  ;;  %v1676_v62 = vsel %vm1671_vm1, %v1673_v27, %v1675_v16  ;;  %v3739_v4 = vpack.c.bf16 %v1835_v55, %v1833_v33  ;;  %v3741_v31 = vpack.c.bf16 %v1840_v25, %v1838_v48  ;;  %v1858_v26 = vld [vmem:[%s7618_s3 + $0x4e8] sm:$0xff]  ;;  %v1859_v32 = vld [vmem:[%s7618_s3 + $0x4f0] sm:$0xff]  ;;  %v2255_v55 = vld [vmem:[%s7622_s5 + $0x80] sm:$0xff] }
 0x168   :  { %v1597_v29 = vadd.f32 %v1591_v10, %v1578_v46  ;;  %v1661_v24 = vsel %vm1656_vm2, %v1658_v47, %v1660_v22  ;;  %v3743_v58 = vpack.c.bf16 %v1839_v50, %v1837_v38  ;;  %v3745_v42 = vpack.c.bf16 %v1844_v2, %v1842_v59  ;;  %v1850_v10 = vld [vmem:[%s7618_s3 + $0x4a8] sm:$0xff]  ;;  %v2245_v22 = vld [vmem:[%s7622_s5 + $0x30] sm:$0xff]  ;;  %v2251_v25 = vld [vmem:[%s7622_s5 + $0x60] sm:$0xff] }
 0x169   :  { %v3747_v30 = vpack.c.bf16 %v1843_v0, %v1841_v1  ;;  %v3749_v43 = vpack.c.bf16 %v1848_v18, %v1846_v20  ;;  %v3751_v46 = vpack.c.bf16 %v1847_v11, %v1845_v51  ;;  %v1690_v39 = vrot.slane %v5838_v54, 4  ;;  %v2240_v54 = vld [vmem:[%s7622_s5 + $0x8] sm:$0xff]  ;;  %v2263_v1 = vld [vmem:[%s7622_s5 + $0xc0] sm:$0xff]  ;;  %v2266_v0 = vld [vmem:[%s7622_s5 + $0xd8] sm:$0xff] }
 0x16a   :  { %v1609_v53 = vmax.f32 %v1566_v61, %v1597_v29  ;;  %v1852_v61 = vld [vmem:[%s7618_s3 + $0x4b8] sm:$0xff]  ;;  %v2252_v33 = vld [vmem:[%s7622_s5 + $0x68] sm:$0xff]  ;;  %v2273_v20 = vld [vmem:[%s7622_s5 + $0x110] sm:$0xff]  ;;  %v3783_v18 = vpack.c.bf16 %v2266_v0, %v2263_v1 }
 0x16b   :  { %v3753_v29 = vpack.c.bf16 %v1852_v61, %v1850_v10  ;;  %v3773_v48 = vpack.c.bf16 %v2255_v55, %v2252_v33  ;;  %v2260_v59 = vld [vmem:[%s7622_s5 + $0xa8] sm:$0xff]  ;;  %v2279_v11 = vld [vmem:[%s7622_s5 + $0x140] sm:$0xff] }
 0x16c   :  { %v1615_v57 = vmax.f32 %v1603_v45, %v1609_v53  ;;  %v4108_v45 = vmov 0.0   ;;  %v2264_v2 = vld [vmem:[%s7622_s5 + $0xc8] sm:$0xff]  ;;  %v2315_v33 = vld [vmem:[%s7622_s5 + $0x260] sm:$0xff] }
 0x16d   :  { %v2276_v51 = vld [vmem:[%s7622_s5 + $0x128] sm:$0xff] }
 0x16e   :  { %v1628_v7 = vadd.f32 %v6255_v63, %v1615_v57  ;;  %v1855_v57 = vld [vmem:[%s7618_s3 + $0x4d0] sm:$0xff]  ;;  %v3789_v61 = vpack.c.bf16 %v2279_v11, %v2276_v51 }
 0x170   :  { %v6470_v49 = vmax.f32 %v1628_v7, 0.0  ;;  %v1860_v7 = vld [vmem:[%s7618_s3 + $0x4f8] sm:$0xff] }
 0x171   :  { %v3761_v27 = vpack.c.bf16 %v1860_v7, %v1858_v26 }
 0x172   :  { %v1652_v15 = vrot.slane %v6470_v49, 1  ;;  %v1682_v44 = vrot.slane %v6470_v49, 3  ;;  %v1667_v3 = vrot.slane %v6470_v49, 2 }
 0x174   :  { %v1653_v63 = vsel %vm1638_vm0, %v1650_v37, %v1652_v15  ;;  %v1836_v37 = vld [vmem:[%s7618_s3 + $0x438] sm:$0xff]  ;;  %v1683_v52 = vsel %vm1671_vm1, %v1680_v9, %v1682_v44  ;;  %v1668_v14 = vsel %vm1656_vm2, %v1665_v34, %v1667_v3  ;;  %v1851_v9 = vld [vmem:[%s7618_s3 + $0x4b0] sm:$0xff]  ;;  %v1857_v15 = vld [vmem:[%s7618_s3 + $0x4e0] sm:$0xff] }
 0x175   :  { %1943 = vmatprep.mubr.f32.mxu0 %v1653_v63  ;;  %v3737_v12 = vpack.c.bf16 %v1836_v37, %v1834_v19  ;;  %v1856_v34 = vld [vmem:[%s7618_s3 + $0x4d8] sm:$0xff]  ;;  %v3755_v53 = vpack.c.bf16 %v1851_v9, %v1849_v17  ;;  %v3763_v47 = vpack.c.bf16 %v1859_v32, %v1857_v15  ;;  %v1687_v63 = vrot.slane %v7860_v21, 4  ;;  %v2243_v21 = vld [vmem:[%s7622_s5 + $0x20] sm:$0xff]  ;;  %v2249_v37 = vld [vmem:[%s7622_s5 + $0x50] sm:$0xff] }
 0x176   :  { %1944 = vmatmul.mubr.f32.gmra.mrb[6].mxu0 %v6269_v5  ;;  %v1697_v19 = vrot.slane %v6470_v49, 4  ;;  %v2239_v49 = vld [vmem:[%s7622_s5] sm:$0xff]  ;;  %v2242_v5 = vld [vmem:[%s7622_s5 + $0x18] sm:$0xff]  ;;  %v2257_v44 = vld [vmem:[%s7622_s5 + $0x90] sm:$0xff] }
 0x177   :  { %2014 = vmatprep.mubr.f32.mxu0 %v1674_v60  ;;  %v1688_v60 = vrot.slane %v7858_v13, 4  ;;  %v3779_v3 = vpack.c.bf16 %v2260_v59, %v2257_v44  ;;  %v2282_v17 = vld [vmem:[%s7622_s5 + $0x158] sm:$0xff]  ;;  %v2285_v9 = vld [vmem:[%s7622_s5 + $0x170] sm:$0xff] }
 0x178   :  { %v1698_v13 = vsel %vm1686_vm3, %v1695_v41, %v1697_v19  ;;  %v2246_v41 = vld [vmem:[%s7622_s5 + $0x38] sm:$0xff]  ;;  %v2303_v19 = vld [vmem:[%s7622_s5 + $0x200] sm:$0xff] }
 0x179   :  { %v1689_v40 = vsel %vm1686_vm3, %v1687_v63, %v1688_v60  ;;  %v1691_v16 = vsel %vm1686_vm3, %v1688_v60, %v1690_v39  ;;  %v2294_v32 = vld [vmem:[%s7622_s5 + $0x1b8] sm:$0xff]  ;;  %v2293_v60 = vld [vmem:[%s7622_s5 + $0x1b0] sm:$0xff] }
 0x17a   :  { %2015 = vmatmul.mubr.f32.vlgmr.msra.gmra.mrb[0].mxu0 %v1659_v35  ;;  %v3767_v35 = vpack.c.bf16 %v2242_v5, %v2239_v49  ;;  %v2309_v5 = vld [vmem:[%s7622_s5 + $0x230] sm:$0xff] }
 0x17b   :  { %3736 = vmatpush1.bf16.msra.mxu0 %v3735_v23  ;;  %2020 = vmatprep.mubr.f32.mxu0 %v1676_v62  ;;  %v3769_v23 = vpack.c.bf16 %v2249_v37, %v2246_v41  ;;  %v2305_v37 = vld [vmem:[%s7622_s5 + $0x210] sm:$0xff] }
 0x17c   :  { %3738 = vmatprep.subr.bf16.mxu0 %v3737_v12  ;;  %v2248_v12 = vld [vmem:[%s7622_s5 + $0x48] sm:$0xff] }
 0x17d   :  { %v3771_v62 = vpack.c.bf16 %v2248_v12, %v2245_v22  ;;  %v2312_v12 = vld [vmem:[%s7622_s5 + $0x248] sm:$0xff] }
 0x17e   :  { %2021 = vmatmul.mubr.f32.gmra.mrb[2].mxu0 %v1661_v24  ;;  %v2258_v24 = vld [vmem:[%s7622_s5 + $0x98] sm:$0xff] }
 0x17f   :  { %3740 = vmatpush1.bf16.msra.mxu0 %v3739_v4  ;;  %2026 = vmatprep.mubr.f32.mxu0 %v1681_v28  ;;  %v3757_v28 = vpack.c.bf16 %v1856_v34, %v1854_v56  ;;  %v2254_v4 = vld [vmem:[%s7622_s5 + $0x78] sm:$0xff]  ;;  %v3793_v34 = vpack.c.bf16 %v2285_v9, %v2282_v17  ;;  %v7861_v17 = vld [vmem:[#allocation4_spill] sm:$0xff] }
 0x180   :  { %3742 = vmatprep.subr.bf16.mxu0 %v3741_v31  ;;  %v2261_v31 = vld [vmem:[%s7622_s5 + $0xb0] sm:$0xff]  ;;  %v3775_v38 = vpack.c.bf16 %v2254_v4, %v2251_v25  ;;  %v2314_v25 = vld [vmem:[%s7622_s5 + $0x258] sm:$0xff] }
 0x181   :  { %v3777_v50 = vpack.c.bf16 %v2261_v31, %v2258_v24 }
 0x182   :  { %2027 = vmatmul.mubr.f32.gmra.mrb[4].mxu0 %v1666_v6  ;;  %v1853_v6 = vld [vmem:[%s7618_s3 + $0x4c0] sm:$0xff] }
 0x183   :  { %3744 = vmatpush1.bf16.msra.mxu0 %v3743_v58  ;;  %2032 = vmatprep.mubr.f32.mxu0 %v1683_v52  ;;  %v3759_v36 = vpack.c.bf16 %v1855_v57, %v1853_v6  ;;  %v2267_v58 = vld [vmem:[%s7622_s5 + $0xe0] sm:$0xff]  ;;  %v2270_v52 = vld [vmem:[%s7622_s5 + $0xf8] sm:$0xff]  ;;  %v2288_v6 = vld [vmem:[%s7622_s5 + $0x188] sm:$0xff] }
 0x184   :  { %3746 = vmatprep.subr.bf16.mxu0 %v3745_v42  ;;  %v3781_v42 = vpack.c.bf16 %v2267_v58, %v2264_v2  ;;  %v2291_v57 = vld [vmem:[%s7622_s5 + $0x1a0] sm:$0xff] }
 0x185   :  { %v3797_v7 = vpack.c.bf16 %v2291_v57, %v2288_v6  ;;  %v2241_v57 = vld [vmem:[%s7622_s5 + $0x10] sm:$0xff] }
 0x186   :  { %2033 = vmatmul.mubr.f32.gmra.mrb[6].mxu0 %v1668_v14  ;;  %v2269_v14 = vld [vmem:[%s7622_s5 + $0xf0] sm:$0xff] }
 0x187   :  { %3748 = vmatpush1.bf16.msra.mxu0 %v3747_v30  ;;  %2103 = vmatprep.mubr.f32.mxu0 %v4108_v45  ;;  %v3785_v30 = vpack.c.bf16 %v2273_v20, %v2270_v52 }
 0x188   :  { %3750 = vmatprep.subr.bf16.mxu0 %v3749_v43  ;;  %v2272_v43 = vld [vmem:[%s7622_s5 + $0x108] sm:$0xff] }
 0x189   :  { %v3787_v10 = vpack.c.bf16 %v2272_v43, %v2269_v14  ;;  %v2211_v14 = vld [vmem:[%s7623_s4] sm:$0x3] }
 0x18a   :  { %v2220_v9 = vrot.slane %v2211_v14, %v7861_v17 }
 0x18b   :  { %3752 = vmatpush1.bf16.msra.mxu0 %v3751_v46  ;;  %v2275_v46 = vld [vmem:[%s7622_s5 + $0x120] sm:$0xff] }
 0x18c   :  { %3754 = vmatprep.subr.bf16.mxu0 %v3753_v29  ;;  %v2278_v29 = vld [vmem:[%s7622_s5 + $0x138] sm:$0xff] }
 0x18d   :  { %v3791_v56 = vpack.c.bf16 %v2278_v29, %v2275_v46 }
 0x18f   :  { %3756 = vmatpush1.bf16.msra.mxu0 %v3755_v53  ;;  %v2281_v53 = vld [vmem:[%s7622_s5 + $0x150] sm:$0xff] }
 0x190   :  { %3758 = vmatprep.subr.bf16.mxu0 %v3757_v28  ;;  %v2284_v28 = vld [vmem:[%s7622_s5 + $0x168] sm:$0xff] }
 0x191   :  { %v3795_v26 = vpack.c.bf16 %v2284_v28, %v2281_v53  ;;  %v7862_v28 = vld [vmem:[#allocation3_spill] sm:$0xff] }
 0x192   :  { %v2216_v6 = vrot.slane %v2211_v14, %v7862_v28  ;;  %v2262_v14 = vld [vmem:[%s7622_s5 + $0xb8] sm:$0xff] }
 0x193   :  { %3760 = vmatpush1.bf16.msra.mxu0 %v3759_v36  ;;  %v2287_v36 = vld [vmem:[%s7622_s5 + $0x180] sm:$0xff] }
 0x194   :  { %3762 = vmatprep.subr.bf16.mxu0 %v3761_v27  ;;  %v2290_v27 = vld [vmem:[%s7622_s5 + $0x198] sm:$0xff] }
 0x195   :  { %v3799_v15 = vpack.c.bf16 %v2290_v27, %v2287_v36 }
 0x197   :  { %3764 = vmatpush1.bf16.msra.mxu0 %v3763_v47  ;;  %v2297_v47 = vld [vmem:[%s7622_s5 + $0x1d0] sm:$0xff] }
 0x198   :  { %v3801_v63 = vpack.c.bf16 %v2297_v47, %v2294_v32 }
 0x19a   :  { %2104 = vmatmul.mubr.f32.vlgmr.msra.gmra.mrb[0].mxu0 %v1689_v40  ;;  %v2296_v40 = vld [vmem:[%s7622_s5 + $0x1c8] sm:$0xff] }
 0x19b   :  { %2109 = vmatprep.mubr.f32.mxu0 %v4108_v45  ;;  %v3803_v39 = vpack.c.bf16 %v2296_v40, %v2293_v60 }
 0x19e   :  { %2110 = vmatmul.mubr.f32.gmra.mrb[2].mxu0 %v1691_v16  ;;  %v2300_v16 = vld [vmem:[%s7622_s5 + $0x1e8] sm:$0xff] }
 0x19f   :  { %2115 = vmatprep.mubr.f32.mxu0 %v4108_v45 }
 0x1a2   :  { %2116 = vmatmul.mubr.f32.gmra.mrb[4].mxu0 %v6468_v8  ;;  %v3765_v8 = vpack.c.bf16 %v2243_v21, %v2240_v54  ;;  %v2299_v54 = vld [vmem:[%s7622_s5 + $0x1e0] sm:$0xff]  ;;  %v2302_v21 = vld [vmem:[%s7622_s5 + $0x1f8] sm:$0xff] }
 0x1a3   :  { %2121 = vmatprep.mubr.f32.mxu0 %v4108_v45  ;;  %v3807_v49 = vpack.c.bf16 %v2302_v21, %v2299_v54 }
 0x1a4   :  { %3766 = vmatprep.subr.bf16.mxu1 %v3765_v8  ;;  %v2306_v8 = vld [vmem:[%s7622_s5 + $0x218] sm:$0xff] }
 0x1a5   :  { %3768 = vmatpush1.bf16.msra.mxu1 %v3767_v35  ;;  %v3809_v41 = vpack.c.bf16 %v2309_v5, %v2306_v8  ;;  %v2308_v35 = vld [vmem:[%s7622_s5 + $0x228] sm:$0xff] }
 0x1a6   :  { %2122 = vmatmul.mubr.f32.gmra.mrb[6].mxu0 %v1698_v13  ;;  %3770 = vmatprep.subr.bf16.mxu1 %v3769_v23  ;;  %v3805_v13 = vpack.c.bf16 %v2303_v19, %v2300_v16  ;;  %v3811_v23 = vpack.c.bf16 %v2308_v35, %v2305_v37 }
 0x1a9   :  { %3772 = vmatpush1.bf16.msra.mxu1 %v3771_v62  ;;  %v3813_v62 = vpack.c.bf16 %v2315_v33, %v2312_v12 }
 0x1aa   :  { %3774 = vmatprep.subr.bf16.mxu1 %v3773_v48  ;;  %v2311_v48 = vld [vmem:[%s7622_s5 + $0x240] sm:$0xff] }
 0x1ab   :  { %v3815_v4 = vpack.c.bf16 %v2314_v25, %v2311_v48 }
 0x1ad   :  { %3776 = vmatpush1.bf16.msra.mxu1 %v3775_v38  ;;  %v4110_v38 = vmov 0.0|0.0  }
 0x1ae   :  { %3778 = vmatprep.subr.bf16.mxu1 %v3777_v50 }
 0x1b1   :  { %3780 = vmatpush1.bf16.msra.mxu1 %v3779_v3 }
 0x1b2   :  { %3782 = vmatprep.subr.bf16.mxu1 %v3781_v42 }
 0x1b5   :  { %3784 = vmatpush1.bf16.msra.mxu1 %v3783_v18 }
 0x1b6   :  { %3786 = vmatprep.subr.bf16.mxu1 %v3785_v30 }
 0x1b9   :  { %3788 = vmatpush1.bf16.msra.mxu1 %v3787_v10 }
 0x1ba   :  { %3790 = vmatprep.subr.bf16.mxu1 %v3789_v61 }
 0x1bd   :  { %3792 = vmatpush1.bf16.msra.mxu1 %v3791_v56 }
 0x1be   :  { %3794 = vmatprep.subr.bf16.mxu1 %v3793_v34 }
 0x1c1   :  { %3796 = vmatpush1.bf16.msra.mxu1 %v3795_v26  ;;  %v2244_v26 = vld [vmem:[%s7622_s5 + $0x28] sm:$0xff] }
 0x1c2   :  { %3798 = vmatprep.subr.bf16.mxu1 %v3797_v7 }
 0x1c5   :  { %3800 = vmatpush1.bf16.msra.mxu1 %v3799_v15 }
 0x1c6   :  { %3802 = vmatprep.subr.bf16.mxu1 %v3801_v63 }
 0x1c9   :  { %3804 = vmatpush1.bf16.msra.mxu1 %v3803_v39  ;;  %v3818_v39 = vpack.c.bf16 %v2244_v26, %v2241_v57  ;;  %v2283_v57 = vld [vmem:[%s7622_s5 + $0x160] sm:$0xff]  ;;  %v2286_v26 = vld [vmem:[%s7622_s5 + $0x178] sm:$0xff] }
 0x1ca   :  { %3806 = vmatprep.subr.bf16.mxu1 %v3805_v13 }
 0x1cd   :  { %3808 = vmatpush1.bf16.msra.mxu1 %v3807_v49 }
 0x1ce   :  { %3810 = vmatprep.subr.bf16.mxu1 %v3809_v41 }
 0x1d1   :  { %3812 = vmatpush1.bf16.msra.mxu1 %v3811_v23  ;;  %v2247_v23 = vld [vmem:[%s7622_s5 + $0x40] sm:$0xff] }
 0x1d2   :  { %3814 = vmatprep.subr.bf16.mxu1 %v3813_v62 }
 0x1d5   :  { %3816 = vmatpush1.bf16.msra.mxu1 %v3815_v4 }
 0x1d6   :  { %3817 = vmatprep.subr.bf16.mxu1 %v4110_v38 }
 0x26d   :  { %v2105_v22 = vpop.f32.mrb[0].mxu0 }
 0x26e   :  { %2136 = vrot.lane.b32.xlu0 %v2105_v22, %s4109_s21  ;;  %v2107_v55 = vpop.f32.mrb[1].mxu0 }
 0x271   :  { %v2111_v24 = vpop.f32.mrb[2].mxu0 }
 0x272   :  { %2138 = vrot.lane.b32.xlu0 %v2107_v55, %s4109_s21  ;;  %2140 = vrot.lane.b32.xlu1 %v2111_v24, %s4109_s21  ;;  %v2113_v31 = vpop.f32.mrb[3].mxu0 }
 0x275   :  { %v2117_v50 = vpop.f32.mrb[4].mxu0 }
 0x276   :  { %2142 = vrot.lane.b32.xlu1 %v2113_v31, %s4109_s21  ;;  %2144 = vrot.lane.b32.xlu0 %v2117_v50, %s4109_s21  ;;  %v2119_v44 = vpop.f32.mrb[5].mxu0 }
 0x279   :  { %v2123_v59 = vpop.f32.mrb[6].mxu0 }
 0x27a   :  { %2146 = vrot.lane.b32.xlu1 %v2119_v44, %s4109_s21  ;;  %2148 = vrot.lane.b32.xlu0 %v2123_v59, %s4109_s21  ;;  %v2125_v2 = vpop.f32.mrb[7].mxu0 }
 0x27e   :  { %2150 = vrot.lane.b32.xlu1 %v2125_v2, %s4109_s21 }
 0x2e0   :  { %v2137_v58 = vpop.permute.xlu0 %2136 }
 0x2e4   :  { %v2139_v3 = vpop.permute.xlu0 %2138  ;;  %v2141_v42 = vpop.permute.xlu1 %2140 }
 0x2e5   :  { %v2153_v1 = vsel %vm2152_vm4, %v2137_v58, %v2139_v3  ;;  %v2166_v0 = vmax.f32 %v2107_v55, %v2139_v3  ;;  %v2256_v58 = vld [vmem:[%s7622_s5 + $0x88] sm:$0xff] }
 0x2e6   :  { %v2165_v52 = vmax.f32 %v2105_v22, %v2153_v1  ;;  %v2250_v22 = vld [vmem:[%s7622_s5 + $0x58] sm:$0xff] }
 0x2e7   :  { %v2184_v11 = vrot.slane %v2166_v0, 1 }
 0x2e8   :  { %v2143_v20 = vpop.permute.xlu1 %2142  ;;  %v2145_v51 = vpop.permute.xlu0 %2144  ;;  %v2181_v61 = vrot.slane %v2165_v52, 1 }
 0x2e9   :  { %v2154_v18 = vsel %vm2152_vm4, %v2141_v42, %v2143_v20  ;;  %v2168_v30 = vmax.f32 %v2113_v31, %v2143_v20  ;;  %v3821_v31 = vpack.c.bf16 %v2250_v22, %v2247_v23  ;;  %v2504_v23 = vld [vmem:[%s7624_s6] sm:$0xff]  ;;  %v2507_v22 = vld [vmem:[%s7624_s6 + $0x18] sm:$0xff] }
 0x2ea   :  { %v2167_v43 = vmax.f32 %v2111_v24, %v2154_v18 }
 0x2eb   :  { %v2185_v10 = vrot.slane %v2168_v30, 1 }
 0x2ec   :  { %v2182_v46 = vrot.slane %v2167_v43, 1  ;;  %v2147_v29 = vpop.permute.xlu1 %2146  ;;  %v2149_v63 = vpop.permute.xlu0 %2148 }
 0x2ed   :  { %v2186_v56 = vsel %vm1638_vm0, %v2184_v11, %v2185_v10  ;;  %v2155_v34 = vsel %vm2152_vm4, %v2145_v51, %v2147_v29  ;;  %v2170_v53 = vmax.f32 %v2119_v44, %v2147_v29  ;;  %v2271_v29 = vld [vmem:[%s7622_s5 + $0x100] sm:$0xff] }
 0x2ee   :  { %v2183_v7 = vsel %vm1638_vm0, %v2181_v61, %v2182_v46  ;;  %v2204_v36 = vmax.f32 %v2166_v0, %v2186_v56  ;;  %v2169_v27 = vmax.f32 %v2117_v50, %v2155_v34  ;;  %v2268_v61 = vld [vmem:[%s7622_s5 + $0xe8] sm:$0xff]  ;;  %v2277_v34 = vld [vmem:[%s7622_s5 + $0x130] sm:$0xff] }
 0x2ef   :  { %v2189_v15 = vrot.slane %v2170_v53, 1  ;;  %v2203_v32 = vmax.f32 %v2165_v52, %v2183_v7  ;;  %v3839_v7 = vpack.c.bf16 %v2286_v26, %v2283_v57  ;;  %v2537_v57 = vld [vmem:[%s7624_s6 + $0x108] sm:$0xff] }
 0x2f0   :  { %v2187_v47 = vrot.slane %v2169_v27, 1  ;;  %v2151_v60 = vpop.permute.xlu1 %2150  ;;  %v2224_v40 = vadd.f32 %v2220_v9, %v2204_v36  ;;  %v2289_v36 = vld [vmem:[%s7622_s5 + $0x190] sm:$0xff]  ;;  %v2541_v26 = vld [vmem:[%s7624_s6 + $0x128] sm:$0xff] }
 0x2f1   :  { %v2190_v16 = vsel %vm1638_vm0, %v2185_v10, %v2189_v15  ;;  %v2156_v19 = vsel %vm2152_vm4, %v2149_v63, %v2151_v60  ;;  %v2172_v13 = vmax.f32 %v2125_v2, %v2151_v60  ;;  %v2223_v54 = vadd.f32 %v2216_v6, %v2203_v32  ;;  %v2253_v2 = vld [vmem:[%s7622_s5 + $0x70] sm:$0xff]  ;;  %v2295_v32 = vld [vmem:[%s7622_s5 + $0x1c0] sm:$0xff] }
 0x2f2   :  { %v2188_v21 = vsel %vm1638_vm0, %v2182_v46, %v2187_v47  ;;  %v2206_v49 = vmax.f32 %v2168_v30, %v2190_v16  ;;  %v2171_v8 = vmax.f32 %v2123_v59, %v2156_v19  ;;  %v6773_v5 = vmax.f32 %v2224_v40, 0.0  ;;  %v2259_v30 = vld [vmem:[%s7622_s5 + $0xa0] sm:$0xff]  ;;  %v2265_v10 = vld [vmem:[%s7622_s5 + $0xd0] sm:$0xff]  ;;  %v2304_v40 = vld [vmem:[%s7622_s5 + $0x208] sm:$0xff] }
 0x2f3   :  { %v2193_v41 = vrot.slane %v2172_v13, 1  ;;  %v6775_v37 = vmax.f32 %v2223_v54, 0.0  ;;  %v2205_v35 = vmax.f32 %v2167_v43, %v2188_v21  ;;  %v3824_v52 = vpack.c.bf16 %v2256_v58, %v2253_v2  ;;  %v2301_v60 = vld [vmem:[%s7622_s5 + $0x1f0] sm:$0xff]  ;;  %v2307_v16 = vld [vmem:[%s7622_s5 + $0x220] sm:$0xff]  ;;  %v2310_v19 = vld [vmem:[%s7622_s5 + $0x238] sm:$0xff] }
 0x2f4   :  { %v2191_v12 = vrot.slane %v2171_v8, 1  ;;  %3535 = vmatprep.mubr.msk.f32.mxu1 %vm2317_vm5, %v6773_v5  ;;  %v2226_v33 = vadd.f32 %v2220_v9, %v2206_v49  ;;  %v3827_v51 = vpack.c.bf16 %v2262_v14, %v2259_v30  ;;  %v3830_v46 = vpack.c.bf16 %v2268_v61, %v2265_v10  ;;  %v2313_v54 = vld [vmem:[%s7622_s5 + $0x250] sm:$0xff]  ;;  %v2316_v21 = vld [vmem:[%s7622_s5 + $0x268] sm:$0xff]  ;;  %v2516_v2 = vld [vmem:[%s7624_s6 + $0x60] sm:$0xff] }
 0x2f5   :  { %v2194_v55 = vsel %vm1638_vm0, %v2189_v15, %v2193_v41  ;;  %v2210_v62 = vmax.f32 %v2172_v13, %v2193_v41  ;;  %2395 = vmatmul.mubr.f32.vlgmr.msra.gmra.mrb[0].mxu1 %v6775_v37  ;;  %v2225_v48 = vadd.f32 %v2216_v6, %v2205_v35  ;;  %v3851_v13 = vpack.c.bf16 %v2310_v19, %v2307_v16  ;;  %v2505_v49 = vld [vmem:[%s7624_s6 + $0x8] sm:$0xff]  ;;  %v2519_v58 = vld [vmem:[%s7624_s6 + $0x78] sm:$0xff] }
 0x2f6   :  { %v2192_v25 = vsel %vm1638_vm0, %v2187_v47, %v2191_v12  ;;  %v2208_v4 = vmax.f32 %v2170_v53, %v2194_v55  ;;  %3819 = vmatpush1.bf16.msra.mxu1 %v3818_v39  ;;  %v6788_v24 = vmax.f32 %v2226_v33, 0.0  ;;  %v2209_v50 = vmax.f32 %v2171_v8, %v2191_v12  ;;  %v2280_v53 = vld [vmem:[%s7622_s5 + $0x148] sm:$0xff]  ;;  %v2298_v47 = vld [vmem:[%s7622_s5 + $0x1d8] sm:$0xff]  ;;  %v2508_v8 = vld [vmem:[%s7624_s6 + $0x20] sm:$0xff] }
 0x2f7   :  { %3820 = vmatprep.subr.bf16.mxu1 %v4110_v38  ;;  %v6791_v44 = vmax.f32 %v2225_v48, 0.0  ;;  %v2207_v59 = vmax.f32 %v2169_v27, %v2192_v25  ;;  %v2230_v3 = vadd.f32 %v2220_v9, %v2210_v62  ;;  %v2292_v27 = vld [vmem:[%s7622_s5 + $0x1a8] sm:$0xff]  ;;  %v3845_v63 = vpack.c.bf16 %v2298_v47, %v2295_v32  ;;  %v2511_v12 = vld [vmem:[%s7624_s6 + $0x38] sm:$0xff]  ;;  %v2514_v33 = vld [vmem:[%s7624_s6 + $0x50] sm:$0xff] }
 0x2f8   :  { %3536 = vmatprep.mubr.msk.f32.mxu1 %vm2317_vm5, %v6788_v24  ;;  %v2228_v42 = vadd.f32 %v2220_v9, %v2208_v4  ;;  %v2229_v20 = vadd.f32 %v2216_v6, %v2209_v50  ;;  %v2274_v9 = vld [vmem:[%s7622_s5 + $0x118] sm:$0xff]  ;;  %v3842_v15 = vpack.c.bf16 %v2292_v27, %v2289_v36  ;;  %v3848_v39 = vpack.c.bf16 %v2304_v40, %v2301_v60  ;;  %v2510_v48 = vld [vmem:[%s7624_s6 + $0x30] sm:$0xff]  ;;  %v2513_v25 = vld [vmem:[%s7624_s6 + $0x48] sm:$0xff] }
 0x2f9   :  { %2401 = vmatmul.mubr.f32.gmra.mrb[2].mxu1 %v6791_v44  ;;  %v2227_v1 = vadd.f32 %v2216_v6, %v2207_v59  ;;  %v6813_v43 = vmax.f32 %v2230_v3, 0.0  ;;  %v3833_v56 = vpack.c.bf16 %v2274_v9, %v2271_v29  ;;  %v3836_v6 = vpack.c.bf16 %v2280_v53, %v2277_v34  ;;  %v2517_v4 = vld [vmem:[%s7624_s6 + $0x68] sm:$0xff]  ;;  %v2523_v3 = vld [vmem:[%s7624_s6 + $0x98] sm:$0xff] }
 0x2fa   :  { %3822 = vmatpush1.bf16.msra.mxu1 %v3821_v31  ;;  %v6802_v0 = vmax.f32 %v2228_v42, 0.0  ;;  %v6820_v11 = vmax.f32 %v2229_v20, 0.0  ;;  %v3854_v41 = vpack.c.bf16 %v2316_v21, %v2313_v54  ;;  %v3856_v35 = vpack.c.bf16 %v2508_v8, %v2505_v49  ;;  %v2520_v31 = vld [vmem:[%s7624_s6 + $0x80] sm:$0xff]  ;;  %v2526_v42 = vld [vmem:[%s7624_s6 + $0xb0] sm:$0xff]  ;;  %v2525_v30 = vld [vmem:[%s7624_s6 + $0xa8] sm:$0xff] }
 0x2fb   :  { %3823 = vmatprep.subr.bf16.mxu1 %v4110_v38  ;;  %v6805_v18 = vmax.f32 %v2227_v1, 0.0  ;;  %v3858_v55 = vpack.c.bf16 %v2507_v22, %v2504_v23  ;;  %v3860_v62 = vpack.c.bf16 %v2514_v33, %v2511_v12  ;;  %v3862_v50 = vpack.c.bf16 %v2513_v25, %v2510_v48  ;;  %v2522_v20 = vld [vmem:[%s7624_s6 + $0x90] sm:$0xff]  ;;  %v2529_v14 = vld [vmem:[%s7624_s6 + $0xc8] sm:$0xff]  ;;  %v2531_v29 = vld [vmem:[%s7624_s6 + $0xd8] sm:$0xff] }
 0x2fc   :  { %3537 = vmatprep.mubr.msk.f32.mxu1 %vm2317_vm5, %v6802_v0  ;;  %v3864_v59 = vpack.c.bf16 %v2520_v31, %v2517_v4  ;;  %v3866_v1 = vpack.c.bf16 %v2519_v58, %v2516_v2  ;;  %v3870_v10 = vpack.c.bf16 %v2525_v30, %v2522_v20  ;;  %v2535_v9 = vld [vmem:[%s7624_s6 + $0xf8] sm:$0xff]  ;;  %v2549_v16 = vld [vmem:[%s7624_s6 + $0x168] sm:$0xff]  ;;  %v2552_v49 = vld [vmem:[%s7624_s6 + $0x180] sm:$0xff] }
 0x2fd   :  { %2407 = vmatmul.mubr.f32.gmra.mrb[4].mxu1 %v6805_v18  ;;  %v2543_v32 = vld [vmem:[%s7624_s6 + $0x138] sm:$0xff]  ;;  %v2553_v19 = vld [vmem:[%s7624_s6 + $0x188] sm:$0xff]  ;;  %v2558_v12 = vld [vmem:[%s7624_s6 + $0x1b0] sm:$0xff] }
 0x2fe   :  { %3825 = vmatpush1.bf16.msra.mxu1 %v3824_v52  ;;  %3538 = vmatprep.mubr.msk.f32.mxu1 %vm2317_vm5, %v6813_v43  ;;  %v3868_v52 = vpack.c.bf16 %v2526_v42, %v2523_v3  ;;  %v2547_v47 = vld [vmem:[%s7624_s6 + $0x158] sm:$0xff]  ;;  %v2561_v33 = vld [vmem:[%s7624_s6 + $0x1c8] sm:$0xff]  ;;  %v2564_v4 = vld [vmem:[%s7624_s6 + $0x1e0] sm:$0xff] }
 0x2ff   :  { %3826 = vmatprep.subr.bf16.mxu1 %v4110_v38  ;;  %v2555_v8 = vld [vmem:[%s7624_s6 + $0x198] sm:$0xff]  ;;  %v3894_v48 = vpack.c.bf16 %v2561_v33, %v2558_v12  ;;  %v2570_v3 = vld [vmem:[%s7624_s6 + $0x210] sm:$0xff]  ;;  %v2573_v42 = vld [vmem:[%s7624_s6 + $0x228] sm:$0xff] }
 0x300   :  { %v3890_v23 = vpack.c.bf16 %v2555_v8, %v2552_v49  ;;  %v2567_v31 = vld [vmem:[%s7624_s6 + $0x1f8] sm:$0xff]  ;;  %v3902_v20 = vpack.c.bf16 %v2573_v42, %v2570_v3  ;;  %v2560_v8 = vld [vmem:[%s7624_s6 + $0x1c0] sm:$0xff] }
 0x301   :  { %2413 = vmatmul.mubr.f32.gmra.mrb[6].mxu1 %v6820_v11  ;;  %v3898_v2 = vpack.c.bf16 %v2567_v31, %v2564_v4  ;;  %v2854_v33 = vld [vmem:[%s7625_s8] sm:$0xff]  ;;  %v2859_v4 = vld [vmem:[%s7625_s8 + $0x28] sm:$0xff]  ;;  %v2861_v31 = vld [vmem:[%s7625_s8 + $0x38] sm:$0xff] }
 0x302   :  { %3828 = vmatpush1.bf16.msra.mxu1 %v3827_v51  ;;  %3539 = vmatprep.mubr.msk.f32.mxu1 %vm2317_vm5, %v6773_v5  ;;  %v2532_v51 = vld [vmem:[%s7624_s6 + $0xe0] sm:$0xff]  ;;  %v2575_v42 = vld [vmem:[%s7624_s6 + $0x238] sm:$0xff] }
 0x303   :  { %3829 = vmatprep.subr.bf16.mxu1 %v4110_v38  ;;  %v3872_v61 = vpack.c.bf16 %v2532_v51, %v2529_v14  ;;  %v2576_v14 = vld [vmem:[%s7624_s6 + $0x240] sm:$0xff]  ;;  %v2579_v51 = vld [vmem:[%s7624_s6 + $0x258] sm:$0xff] }
 0x304   :  { %v2572_v3 = vld [vmem:[%s7624_s6 + $0x220] sm:$0xff] }
 0x306   :  { %3831 = vmatpush1.bf16.msra.mxu1 %v3830_v46  ;;  %v2528_v46 = vld [vmem:[%s7624_s6 + $0xc0] sm:$0xff] }
 0x307   :  { %3832 = vmatprep.subr.bf16.mxu1 %v4110_v38  ;;  %v3874_v34 = vpack.c.bf16 %v2531_v29, %v2528_v46  ;;  %v2509_v46 = vld [vmem:[%s7624_s6 + $0x28] sm:$0xff] }
 0x30a   :  { %3834 = vmatpush1.bf16.msra.mxu1 %v3833_v56  ;;  %v2538_v56 = vld [vmem:[%s7624_s6 + $0x110] sm:$0xff] }
 0x30b   :  { %3835 = vmatprep.subr.bf16.mxu1 %v4110_v38  ;;  %v3876_v53 = vpack.c.bf16 %v2538_v56, %v2535_v9  ;;  %v2512_v9 = vld [vmem:[%s7624_s6 + $0x40] sm:$0xff]  ;;  %v2515_v56 = vld [vmem:[%s7624_s6 + $0x58] sm:$0xff] }
 0x30e   :  { %3837 = vmatpush1.bf16.msra.mxu1 %v3836_v6  ;;  %v2534_v6 = vld [vmem:[%s7624_s6 + $0xf0] sm:$0xff] }
 0x30f   :  { %3838 = vmatprep.subr.bf16.mxu1 %v4110_v38  ;;  %v3878_v36 = vpack.c.bf16 %v2537_v57, %v2534_v6  ;;  %v2521_v6 = vld [vmem:[%s7624_s6 + $0x88] sm:$0xff] }
 0x312   :  { %3840 = vmatpush1.bf16.msra.mxu1 %v3839_v7  ;;  %v2544_v7 = vld [vmem:[%s7624_s6 + $0x140] sm:$0xff] }
 0x313   :  { %3841 = vmatprep.subr.bf16.mxu1 %v4110_v38  ;;  %v3880_v27 = vpack.c.bf16 %v2544_v7, %v2541_v26  ;;  %v2524_v26 = vld [vmem:[%s7624_s6 + $0xa0] sm:$0xff]  ;;  %v2527_v7 = vld [vmem:[%s7624_s6 + $0xb8] sm:$0xff] }
 0x316   :  { %3843 = vmatpush1.bf16.msra.mxu1 %v3842_v15  ;;  %v2540_v15 = vld [vmem:[%s7624_s6 + $0x120] sm:$0xff] }
 0x317   :  { %3844 = vmatprep.subr.bf16.mxu1 %v4110_v38  ;;  %v3882_v60 = vpack.c.bf16 %v2543_v32, %v2540_v15  ;;  %v2533_v15 = vld [vmem:[%s7624_s6 + $0xe8] sm:$0xff] }
 0x31a   :  { %3846 = vmatpush1.bf16.msra.mxu1 %v3845_v63  ;;  %v2550_v63 = vld [vmem:[%s7624_s6 + $0x170] sm:$0xff] }
 0x31b   :  { %3847 = vmatprep.subr.bf16.mxu1 %v4110_v38  ;;  %v3884_v40 = vpack.c.bf16 %v2550_v63, %v2547_v47  ;;  %v2536_v47 = vld [vmem:[%s7624_s6 + $0x100] sm:$0xff]  ;;  %v2539_v63 = vld [vmem:[%s7624_s6 + $0x118] sm:$0xff] }
 0x31e   :  { %3849 = vmatpush1.bf16.msra.mxu1 %v3848_v39  ;;  %v2546_v39 = vld [vmem:[%s7624_s6 + $0x150] sm:$0xff] }
 0x31f   :  { %3850 = vmatprep.subr.bf16.mxu1 %v4110_v38  ;;  %v3886_v54 = vpack.c.bf16 %v2549_v16, %v2546_v39  ;;  %v2548_v16 = vld [vmem:[%s7624_s6 + $0x160] sm:$0xff] }
 0x322   :  { %3852 = vmatpush1.bf16.msra.mxu1 %v3851_v13  ;;  %v2556_v13 = vld [vmem:[%s7624_s6 + $0x1a0] sm:$0xff] }
 0x323   :  { %3853 = vmatprep.subr.bf16.mxu1 %v4110_v38  ;;  %v3888_v21 = vpack.c.bf16 %v2556_v13, %v2553_v19  ;;  %v2551_v19 = vld [vmem:[%s7624_s6 + $0x178] sm:$0xff] }
 0x324   :  { %v3930_v13 = vpack.c.bf16 %v2551_v19, %v2548_v16  ;;  %v2881_v16 = vld [vmem:[%s7625_s8 + $0xd8] sm:$0xff] }
 0x326   :  { %3855 = vmatpush1.bf16.msra.mxu1 %v3854_v41  ;;  %v2559_v41 = vld [vmem:[%s7624_s6 + $0x1b8] sm:$0xff] }
 0x327   :  { %3857 = vmatprep.subr.bf16.mxu1 %v3856_v35  ;;  %v2562_v35 = vld [vmem:[%s7624_s6 + $0x1d0] sm:$0xff] }
 0x328   :  { %v3892_v22 = vpack.c.bf16 %v2562_v35, %v2559_v41  ;;  %v2563_v41 = vld [vmem:[%s7624_s6 + $0x1d8] sm:$0xff]  ;;  %v2855_v35 = vld [vmem:[%s7625_s8 + $0x8] sm:$0xff] }
 0x329   :  { %2484 = vmatmul.mubr.f32.vlgmr.msra.gmra.mrb[8].mxu1 %v6775_v37 }
 0x32a   :  { %3540 = vmatprep.mubr.msk.f32.mxu1 %vm2317_vm5, %v6788_v24  ;;  %3859 = vmatpush1.bf16.msra.mxu1 %v3858_v55  ;;  %v2565_v55 = vld [vmem:[%s7624_s6 + $0x1e8] sm:$0xff] }
 0x32b   :  { %3861 = vmatprep.subr.bf16.mxu1 %v3860_v62  ;;  %v2568_v62 = vld [vmem:[%s7624_s6 + $0x200] sm:$0xff] }
 0x32c   :  { %v3896_v25 = vpack.c.bf16 %v2568_v62, %v2565_v55  ;;  %v2856_v55 = vld [vmem:[%s7625_s8 + $0x10] sm:$0xff] }
 0x32d   :  { %2489 = vmatmul.mubr.f32.gmra.mrb[10].mxu1 %v6791_v44  ;;  %v2566_v62 = vld [vmem:[%s7624_s6 + $0x1f0] sm:$0xff] }
 0x32e   :  { %3541 = vmatprep.mubr.msk.f32.mxu1 %vm2317_vm5, %v6802_v0  ;;  %3863 = vmatpush1.bf16.msra.mxu1 %v3862_v50  ;;  %v2571_v50 = vld [vmem:[%s7624_s6 + $0x218] sm:$0xff] }
 0x32f   :  { %3865 = vmatprep.subr.bf16.mxu1 %v3864_v59  ;;  %v2574_v59 = vld [vmem:[%s7624_s6 + $0x230] sm:$0xff] }
 0x330   :  { %v3900_v58 = vpack.c.bf16 %v2574_v59, %v2571_v50  ;;  %v3951_v59 = vpack.c.bf16 %v2861_v31, %v2859_v4  ;;  %v2895_v4 = vld [vmem:[%s7625_s8 + $0x148] sm:$0xff] }
 0x331   :  { %2494 = vmatmul.mubr.f32.gmra.mrb[12].mxu1 %v6805_v18 }
 0x332   :  { %3542 = vmatprep.mubr.msk.f32.mxu1 %vm2317_vm5, %v6813_v43  ;;  %3867 = vmatpush1.bf16.msra.mxu1 %v3866_v1  ;;  %v2577_v1 = vld [vmem:[%s7624_s6 + $0x248] sm:$0xff] }
 0x333   :  { %3869 = vmatprep.subr.bf16.mxu1 %v3868_v52  ;;  %v2580_v52 = vld [vmem:[%s7624_s6 + $0x260] sm:$0xff] }
 0x334   :  { %v3904_v30 = vpack.c.bf16 %v2580_v52, %v2577_v1  ;;  %v2863_v52 = vld [vmem:[%s7625_s8 + $0x48] sm:$0xff] }
 0x335   :  { %2499 = vmatmul.mubr.f32.gmra.mrb[14].mxu1 %v6820_v11 }
 0x336   :  { %3871 = vmatpush1.bf16.msra.mxu1 %v3870_v10  ;;  %3543 = vmatprep.mubr.msk.f32.mxu1 %vm2317_vm5, %v6773_v5  ;;  %v3906_v10 = vpack.c.bf16 %v2579_v51, %v2576_v14  ;;  %v2862_v51 = vld [vmem:[%s7625_s8 + $0x40] sm:$0xff] }
 0x337   :  { %3873 = vmatprep.subr.bf16.mxu1 %v3872_v61  ;;  %v2506_v61 = vld [vmem:[%s7624_s6 + $0x10] sm:$0xff] }
 0x338   :  { %v3909_v29 = vpack.c.bf16 %v2509_v46, %v2506_v61  ;;  %v2578_v61 = vld [vmem:[%s7624_s6 + $0x250] sm:$0xff]  ;;  %v2581_v46 = vld [vmem:[%s7624_s6 + $0x268] sm:$0xff] }
 0x33a   :  { %3875 = vmatpush1.bf16.msra.mxu1 %v3874_v34  ;;  %v3912_v34 = vpack.c.bf16 %v2515_v56, %v2512_v9  ;;  %v2867_v9 = vld [vmem:[%s7625_s8 + $0x68] sm:$0xff]  ;;  %v2869_v56 = vld [vmem:[%s7625_s8 + $0x78] sm:$0xff] }
 0x33b   :  { %3877 = vmatprep.subr.bf16.mxu1 %v3876_v53  ;;  %v2518_v53 = vld [vmem:[%s7624_s6 + $0x70] sm:$0xff] }
 0x33c   :  { %v3915_v57 = vpack.c.bf16 %v2521_v6, %v2518_v53  ;;  %v3945_v53 = vpack.c.bf16 %v2581_v46, %v2578_v61  ;;  %v3959_v6 = vpack.c.bf16 %v2869_v56, %v2867_v9  ;;  %v2902_v61 = vld [vmem:[%s7625_s8 + $0x180] sm:$0xff]  ;;  %v2904_v46 = vld [vmem:[%s7625_s8 + $0x190] sm:$0xff]  ;;  %v2907_v9 = vld [vmem:[%s7625_s8 + $0x1a8] sm:$0xff] }
 0x33d   :  { %v2909_v56 = vld [vmem:[%s7625_s8 + $0x1b8] sm:$0xff] }
 0x33e   :  { %3879 = vmatpush1.bf16.msra.mxu1 %v3878_v36  ;;  %v3918_v36 = vpack.c.bf16 %v2527_v7, %v2524_v26  ;;  %v2871_v26 = vld [vmem:[%s7625_s8 + $0x88] sm:$0xff]  ;;  %v2873_v7 = vld [vmem:[%s7625_s8 + $0x98] sm:$0xff] }
 0x33f   :  { %3881 = vmatprep.subr.bf16.mxu1 %v3880_v27  ;;  %v2530_v27 = vld [vmem:[%s7624_s6 + $0xd0] sm:$0xff] }
 0x340   :  { %v3921_v32 = vpack.c.bf16 %v2533_v15, %v2530_v27  ;;  %v3963_v27 = vpack.c.bf16 %v2873_v7, %v2871_v26  ;;  %v2870_v15 = vld [vmem:[%s7625_s8 + $0x80] sm:$0xff]  ;;  %v2911_v26 = vld [vmem:[%s7625_s8 + $0x1c8] sm:$0xff]  ;;  %v2913_v7 = vld [vmem:[%s7625_s8 + $0x1d8] sm:$0xff] }
 0x342   :  { %3883 = vmatpush1.bf16.msra.mxu1 %v3882_v60  ;;  %v3924_v60 = vpack.c.bf16 %v2539_v63, %v2536_v47  ;;  %v2875_v47 = vld [vmem:[%s7625_s8 + $0xa8] sm:$0xff]  ;;  %v2877_v63 = vld [vmem:[%s7625_s8 + $0xb8] sm:$0xff] }
 0x343   :  { %3885 = vmatprep.subr.bf16.mxu1 %v3884_v40  ;;  %v2542_v40 = vld [vmem:[%s7624_s6 + $0x130] sm:$0xff] }
 0x346   :  { %3887 = vmatpush1.bf16.msra.mxu1 %v3886_v54  ;;  %v2554_v54 = vld [vmem:[%s7624_s6 + $0x190] sm:$0xff] }
 0x347   :  { %3889 = vmatprep.subr.bf16.mxu1 %v3888_v21  ;;  %v2557_v21 = vld [vmem:[%s7624_s6 + $0x1a8] sm:$0xff] }
 0x348   :  { %v3933_v49 = vpack.c.bf16 %v2557_v21, %v2554_v54  ;;  %v2878_v54 = vld [vmem:[%s7625_s8 + $0xc0] sm:$0xff]  ;;  %v2880_v21 = vld [vmem:[%s7625_s8 + $0xd0] sm:$0xff] }
 0x34a   :  { %3891 = vmatpush1.bf16.msra.mxu1 %v3890_v23  ;;  %v2857_v23 = vld [vmem:[%s7625_s8 + $0x18] sm:$0xff] }
 0x34b   :  { %3893 = vmatprep.subr.bf16.mxu1 %v3892_v22  ;;  %v3936_v22 = vpack.c.bf16 %v2563_v41, %v2560_v8  ;;  %v3947_v12 = vpack.c.bf16 %v2857_v23, %v2855_v35  ;;  %v2882_v41 = vld [vmem:[%s7625_s8 + $0xe0] sm:$0xff]  ;;  %v2884_v35 = vld [vmem:[%s7625_s8 + $0xf0] sm:$0xff]  ;;  %v2887_v23 = vld [vmem:[%s7625_s8 + $0x108] sm:$0xff] }
 0x34d   :  { %3948 = vmatprep.subr.bf16.mxu0 %v3947_v12  ;;  %v2886_v12 = vld [vmem:[%s7625_s8 + $0x100] sm:$0xff] }
 0x34e   :  { %3895 = vmatpush1.bf16.msra.mxu1 %v3894_v48  ;;  %v2569_v48 = vld [vmem:[%s7624_s6 + $0x208] sm:$0xff] }
 0x34f   :  { %3897 = vmatprep.subr.bf16.mxu1 %v3896_v25  ;;  %v3949_v25 = vpack.c.bf16 %v2856_v55, %v2854_v33  ;;  %v3939_v50 = vpack.c.bf16 %v2569_v48, %v2566_v62  ;;  %v2888_v33 = vld [vmem:[%s7625_s8 + $0x110] sm:$0xff]  ;;  %v2891_v55 = vld [vmem:[%s7625_s8 + $0x128] sm:$0xff]  ;;  %v2890_v48 = vld [vmem:[%s7625_s8 + $0x120] sm:$0xff] }
 0x351   :  { %3950 = vmatpush1.bf16.msra.mxu0 %v3949_v25  ;;  %v2892_v25 = vld [vmem:[%s7625_s8 + $0x130] sm:$0xff] }
 0x352   :  { %3899 = vmatpush1.bf16.msra.mxu1 %v3898_v2  ;;  %v2858_v2 = vld [vmem:[%s7625_s8 + $0x20] sm:$0xff]  ;;  %3952 = vmatprep.subr.bf16.mxu0 %v3951_v59  ;;  %v3985_v31 = vpack.c.bf16 %v2892_v25, %v2890_v48 }
 0x353   :  { %3901 = vmatprep.subr.bf16.mxu1 %v3900_v58  ;;  %v2860_v58 = vld [vmem:[%s7625_s8 + $0x30] sm:$0xff]  ;;  %v2894_v59 = vld [vmem:[%s7625_s8 + $0x140] sm:$0xff] }
 0x354   :  { %v3953_v1 = vpack.c.bf16 %v2860_v58, %v2858_v2  ;;  %v2896_v2 = vld [vmem:[%s7625_s8 + $0x150] sm:$0xff]  ;;  %v2899_v58 = vld [vmem:[%s7625_s8 + $0x168] sm:$0xff] }
 0x356   :  { %3903 = vmatpush1.bf16.msra.mxu1 %v3902_v20  ;;  %3954 = vmatpush1.bf16.msra.mxu0 %v3953_v1  ;;  %v2865_v20 = vld [vmem:[%s7625_s8 + $0x58] sm:$0xff] }
 0x357   :  { %3905 = vmatprep.subr.bf16.mxu1 %v3904_v30  ;;  %v3942_v30 = vpack.c.bf16 %v2575_v42, %v2572_v3  ;;  %v3955_v14 = vpack.c.bf16 %v2865_v20, %v2863_v52  ;;  %v2901_v3 = vld [vmem:[%s7625_s8 + $0x178] sm:$0xff]  ;;  %v3989_v42 = vpack.c.bf16 %v2896_v2, %v2894_v59  ;;  %v2898_v52 = vld [vmem:[%s7625_s8 + $0x160] sm:$0xff]  ;;  %v2900_v20 = vld [vmem:[%s7625_s8 + $0x170] sm:$0xff] }
 0x358   :  { %v3991_v1 = vpack.c.bf16 %v2901_v3, %v2899_v58  ;;  %v3159_v3 = vld [vmem:[%s7626_s10 + $0x20] sm:$0xff] }
 0x359   :  { %3956 = vmatprep.subr.bf16.mxu0 %v3955_v14  ;;  %v2903_v14 = vld [vmem:[%s7625_s8 + $0x188] sm:$0xff] }
 0x35a   :  { %3907 = vmatpush1.bf16.msra.mxu1 %v3906_v10  ;;  %v2864_v10 = vld [vmem:[%s7625_s8 + $0x50] sm:$0xff] }
 0x35b   :  { %3908 = vmatprep.subr.bf16.mxu1 %v4110_v38 }
 0x35d   :  { %2647 = vmatmul.mubr.f32.vlgmr.msra.gmra.mrb[16].mxu1 %v6775_v37 }
 0x35e   :  { %3544 = vmatprep.mubr.msk.f32.mxu1 %vm2317_vm5, %v6788_v24  ;;  %3910 = vmatpush1.bf16.msra.mxu1 %v3909_v29  ;;  %v3957_v29 = vpack.c.bf16 %v2864_v10, %v2862_v51  ;;  %v2905_v51 = vld [vmem:[%s7625_s8 + $0x198] sm:$0xff] }
 0x35f   :  { %3911 = vmatprep.subr.bf16.mxu1 %v4110_v38  ;;  %v3995_v10 = vpack.c.bf16 %v2905_v51, %v2903_v14 }
 0x360   :  { %3958 = vmatpush1.bf16.msra.mxu0 %v3957_v29  ;;  %v3997_v29 = vpack.c.bf16 %v2904_v46, %v2902_v61  ;;  %v3162_v61 = vld [vmem:[%s7626_s10 + $0x38] sm:$0xff] }
 0x361   :  { %2653 = vmatmul.mubr.f32.gmra.mrb[18].mxu1 %v6791_v44  ;;  %3960 = vmatprep.subr.bf16.mxu0 %v3959_v6  ;;  %v2908_v6 = vld [vmem:[%s7625_s8 + $0x1b0] sm:$0xff] }
 0x362   :  { %3545 = vmatprep.mubr.msk.f32.mxu1 %vm2317_vm5, %v6802_v0  ;;  %3913 = vmatpush1.bf16.msra.mxu1 %v3912_v34  ;;  %v2866_v34 = vld [vmem:[%s7625_s8 + $0x60] sm:$0xff] }
 0x363   :  { %3914 = vmatprep.subr.bf16.mxu1 %v4110_v38 }
 0x365   :  { %2659 = vmatmul.mubr.f32.gmra.mrb[20].mxu1 %v6805_v18 }
 0x366   :  { %3546 = vmatprep.mubr.msk.f32.mxu1 %vm2317_vm5, %v6813_v43  ;;  %3916 = vmatpush1.bf16.msra.mxu1 %v3915_v57  ;;  %v2868_v57 = vld [vmem:[%s7625_s8 + $0x70] sm:$0xff] }
 0x367   :  { %3917 = vmatprep.subr.bf16.mxu1 %v4110_v38 }
 0x369   :  { %2665 = vmatmul.mubr.f32.gmra.mrb[22].mxu1 %v6820_v11 }
 0x36a   :  { %3919 = vmatpush1.bf16.msra.mxu1 %v3918_v36  ;;  %3547 = vmatprep.mubr.msk.f32.mxu1 %vm2317_vm5, %v6773_v5  ;;  %v2545_v5 = vld [vmem:[%s7624_s6 + $0x148] sm:$0xff]  ;;  %v3961_v36 = vpack.c.bf16 %v2868_v57, %v2866_v34  ;;  %v3999_v34 = vpack.c.bf16 %v2909_v56, %v2907_v9 }
 0x36b   :  { %3920 = vmatprep.subr.bf16.mxu1 %v4110_v38  ;;  %v3927_v39 = vpack.c.bf16 %v2545_v5, %v2542_v40  ;;  %v2874_v40 = vld [vmem:[%s7625_s8 + $0xa0] sm:$0xff]  ;;  %v2876_v5 = vld [vmem:[%s7625_s8 + $0xb0] sm:$0xff]  ;;  %v3180_v9 = vld [vmem:[%s7626_s10 + $0xc8] sm:$0xff] }
 0x36c   :  { %3962 = vmatpush1.bf16.msra.mxu0 %v3961_v36  ;;  %v3969_v19 = vpack.c.bf16 %v2876_v5, %v2874_v40  ;;  %v4003_v36 = vpack.c.bf16 %v2913_v7, %v2911_v26  ;;  %v2916_v40 = vld [vmem:[%s7625_s8 + $0x1f0] sm:$0xff]  ;;  %v3182_v26 = vld [vmem:[%s7626_s10 + $0xd8] sm:$0xff] }
 0x36d   :  { %3964 = vmatprep.subr.bf16.mxu0 %v3963_v27  ;;  %v2910_v27 = vld [vmem:[%s7625_s8 + $0x1c0] sm:$0xff] }
 0x36e   :  { %3922 = vmatpush1.bf16.msra.mxu1 %v3921_v32  ;;  %v2872_v32 = vld [vmem:[%s7625_s8 + $0x90] sm:$0xff] }
 0x36f   :  { %3923 = vmatprep.subr.bf16.mxu1 %v4110_v38 }
 0x372   :  { %3925 = vmatpush1.bf16.msra.mxu1 %v3924_v60  ;;  %v3967_v60 = vpack.c.bf16 %v2877_v63, %v2875_v47  ;;  %v2915_v47 = vld [vmem:[%s7625_s8 + $0x1e8] sm:$0xff]  ;;  %v2917_v63 = vld [vmem:[%s7625_s8 + $0x1f8] sm:$0xff] }
 0x373   :  { %3926 = vmatprep.subr.bf16.mxu1 %v4110_v38 }
 0x376   :  { %3928 = vmatpush1.bf16.msra.mxu1 %v3927_v39  ;;  %v2879_v39 = vld [vmem:[%s7625_s8 + $0xc8] sm:$0xff] }
 0x377   :  { %3929 = vmatprep.subr.bf16.mxu1 %v4110_v38 }
 0x37a   :  { %3931 = vmatpush1.bf16.msra.mxu1 %v3930_v13  ;;  %v3971_v13 = vpack.c.bf16 %v2881_v16, %v2879_v39 }
 0x37b   :  { %3932 = vmatprep.subr.bf16.mxu1 %v4110_v38 }
 0x37e   :  { %3934 = vmatpush1.bf16.msra.mxu1 %v3933_v49  ;;  %v2883_v49 = vld [vmem:[%s7625_s8 + $0xe8] sm:$0xff] }
 0x37f   :  { %3935 = vmatprep.subr.bf16.mxu1 %v4110_v38 }
 0x382   :  { %3937 = vmatpush1.bf16.msra.mxu1 %v3936_v22 }
 0x383   :  { %3938 = vmatprep.subr.bf16.mxu1 %v4110_v38 }
 0x386   :  { %3940 = vmatpush1.bf16.msra.mxu1 %v3939_v50 }
 0x387   :  { %3941 = vmatprep.subr.bf16.mxu1 %v4110_v38 }
 0x38a   :  { %3943 = vmatpush1.bf16.msra.mxu1 %v3942_v30  ;;  %v3993_v30 = vpack.c.bf16 %v2900_v20, %v2898_v52  ;;  %v3177_v52 = vld [vmem:[%s7626_s10 + $0xb0] sm:$0xff]  ;;  %v3178_v20 = vld [vmem:[%s7626_s10 + $0xb8] sm:$0xff] }
 0x38b   :  { %3944 = vmatprep.subr.bf16.mxu1 %v4110_v38  ;;  %v3965_v38 = vpack.c.bf16 %v2872_v32, %v2870_v15  ;;  %v2912_v15 = vld [vmem:[%s7625_s8 + $0x1d0] sm:$0xff]  ;;  %v4047_v51 = vpack.c.bf16 %v3178_v20, %v3177_v52 }
 0x38c   :  { %v4005_v32 = vpack.c.bf16 %v2912_v15, %v2910_v27  ;;  %v3165_v27 = vld [vmem:[%s7626_s10 + $0x50] sm:$0xff]  ;;  %v3166_v15 = vld [vmem:[%s7626_s10 + $0x58] sm:$0xff] }
 0x38d   :  { %3966 = vmatpush1.bf16.msra.mxu0 %v3965_v38  ;;  %v4007_v38 = vpack.c.bf16 %v2917_v63, %v2915_v47  ;;  %v3184_v47 = vld [vmem:[%s7626_s10 + $0xe8] sm:$0xff]  ;;  %v4057_v63 = vpack.c.bf16 %v3166_v15, %v3165_v27 }
 0x38e   :  { %3946 = vmatpush1.bf16.msra.mxu1 %v3945_v53  ;;  %3968 = vmatprep.subr.bf16.mxu0 %v3967_v60  ;;  %v2906_v53 = vld [vmem:[%s7625_s8 + $0x1a0] sm:$0xff] }
 0x38f   :  { %v4001_v57 = vpack.c.bf16 %v2908_v6, %v2906_v53  ;;  %v2914_v60 = vld [vmem:[%s7625_s8 + $0x1e0] sm:$0xff]  ;;  %v3164_v6 = vld [vmem:[%s7626_s10 + $0x48] sm:$0xff] }
 0x390   :  { %v4009_v5 = vpack.c.bf16 %v2916_v40, %v2914_v60  ;;  %v3163_v53 = vld [vmem:[%s7626_s10 + $0x40] sm:$0xff] }
 0x391   :  { %2736 = vmatmul.mubr.f32.vlgmr.msra.gmra.mrb[24].mxu1 %v6775_v37  ;;  %v2885_v37 = vld [vmem:[%s7625_s8 + $0xf8] sm:$0xff]  ;;  %3970 = vmatpush1.bf16.msra.mxu0 %v3969_v19  ;;  %v4053_v7 = vpack.c.bf16 %v3164_v6, %v3163_v53 }
 0x392   :  { %3548 = vmatprep.mubr.msk.f32.mxu1 %vm2317_vm5, %v6788_v24  ;;  %v3973_v24 = vpack.c.bf16 %v2880_v21, %v2878_v54  ;;  %3972 = vmatprep.subr.bf16.mxu0 %v3971_v13  ;;  %v3975_v8 = vpack.c.bf16 %v2885_v37, %v2883_v49  ;;  %v2919_v13 = vld [vmem:[%s7625_s8 + $0x208] sm:$0xff]  ;;  %v2921_v54 = vld [vmem:[%s7625_s8 + $0x218] sm:$0xff] }
 0x393   :  { %v4011_v49 = vpack.c.bf16 %v2921_v54, %v2919_v13 }
 0x395   :  { %2741 = vmatmul.mubr.f32.gmra.mrb[26].mxu1 %v6791_v44  ;;  %v2889_v44 = vld [vmem:[%s7625_s8 + $0x118] sm:$0xff]  ;;  %3974 = vmatpush1.bf16.msra.mxu0 %v3973_v24 }
 0x396   :  { %3549 = vmatprep.mubr.msk.f32.mxu1 %vm2317_vm5, %v6802_v0  ;;  %v3977_v0 = vpack.c.bf16 %v2884_v35, %v2882_v41  ;;  %3976 = vmatprep.subr.bf16.mxu0 %v3975_v8  ;;  %v3979_v22 = vpack.c.bf16 %v2889_v44, %v2887_v23  ;;  %v3171_v44 = vld [vmem:[%s7626_s10 + $0x80] sm:$0xff] }
 0x399   :  { %2746 = vmatmul.mubr.f32.gmra.mrb[28].mxu1 %v6805_v18  ;;  %v2893_v18 = vld [vmem:[%s7625_s8 + $0x138] sm:$0xff]  ;;  %3978 = vmatpush1.bf16.msra.mxu0 %v3977_v0  ;;  %v3172_v0 = vld [vmem:[%s7626_s10 + $0x88] sm:$0xff] }
 0x39a   :  { %3550 = vmatprep.mubr.msk.f32.mxu1 %vm2317_vm5, %v6813_v43  ;;  %v3981_v43 = vpack.c.bf16 %v2888_v33, %v2886_v12  ;;  %3980 = vmatprep.subr.bf16.mxu0 %v3979_v22  ;;  %v3983_v62 = vpack.c.bf16 %v2893_v18, %v2891_v55  ;;  %v3155_v22 = vld [vmem:[%s7626_s10] sm:$0xff]  ;;  %v4035_v33 = vpack.c.bf16 %v3172_v0, %v3171_v44  ;;  %v3156_v55 = vld [vmem:[%s7626_s10 + $0x8] sm:$0xff]  ;;  %v3173_v18 = vld [vmem:[%s7626_s10 + $0x90] sm:$0xff] }
 0x39b   :  { %v4037_v48 = vpack.c.bf16 %v3156_v55, %v3155_v22 }
 0x39c   :  { %4036 = vmatprep.subr.bf16.mxu1 %v4035_v33 }
 0x39d   :  { %2751 = vmatmul.mubr.f32.gmra.mrb[30].mxu1 %v6820_v11  ;;  %v2897_v11 = vld [vmem:[%s7625_s8 + $0x158] sm:$0xff]  ;;  %3982 = vmatpush1.bf16.msra.mxu0 %v3981_v43 }
 0x39e   :  { %3984 = vmatprep.subr.bf16.mxu0 %v3983_v62  ;;  %v3987_v50 = vpack.c.bf16 %v2897_v11, %v2895_v4  ;;  %v3174_v43 = vld [vmem:[%s7626_s10 + $0x98] sm:$0xff]  ;;  %v3157_v4 = vld [vmem:[%s7626_s10 + $0x10] sm:$0xff]  ;;  %4038 = vmatpush3.bf16.msra.mxu1 %v4037_v48 }
 0x39f   :  { %v4039_v25 = vpack.c.bf16 %v3174_v43, %v3173_v18  ;;  %v3158_v11 = vld [vmem:[%s7626_s10 + $0x18] sm:$0xff] }
 0x3a0   :  { %v4041_v59 = vpack.c.bf16 %v3158_v11, %v3157_v4 }
 0x3a1   :  { %3986 = vmatpush1.bf16.msra.mxu0 %v3985_v31  ;;  %v3175_v31 = vld [vmem:[%s7626_s10 + $0xa0] sm:$0xff]  ;;  %4040 = vmatprep.subr.bf16.mxu1 %v4039_v25 }
 0x3a2   :  { %3988 = vmatprep.subr.bf16.mxu0 %v3987_v50  ;;  %v3176_v50 = vld [vmem:[%s7626_s10 + $0xa8] sm:$0xff]  ;;  %4042 = vmatpush3.bf16.msra.mxu1 %v4041_v59  ;;  %v2920_v59 = vld [vmem:[%s7625_s8 + $0x210] sm:$0xff] }
 0x3a3   :  { %v4043_v58 = vpack.c.bf16 %v3176_v50, %v3175_v31  ;;  %v2918_v50 = vld [vmem:[%s7625_s8 + $0x200] sm:$0xff] }
 0x3a5   :  { %3990 = vmatpush1.bf16.msra.mxu0 %v3989_v42  ;;  %v3160_v42 = vld [vmem:[%s7626_s10 + $0x28] sm:$0xff]  ;;  %4044 = vmatprep.subr.bf16.mxu1 %v4043_v58 }
 0x3a6   :  { %3992 = vmatprep.subr.bf16.mxu0 %v3991_v1 }
 0x3a9   :  { %3994 = vmatpush1.bf16.msra.mxu0 %v3993_v30  ;;  %v4045_v30 = vpack.c.bf16 %v3160_v42, %v3159_v3  ;;  %v2923_v3 = vld [vmem:[%s7625_s8 + $0x228] sm:$0xff] }
 0x3aa   :  { %3996 = vmatprep.subr.bf16.mxu0 %v3995_v10  ;;  %v3161_v10 = vld [vmem:[%s7626_s10 + $0x30] sm:$0xff] }
 0x3ab   :  { %4046 = vmatpush3.bf16.msra.mxu1 %v4045_v30  ;;  %v4049_v56 = vpack.c.bf16 %v3162_v61, %v3161_v10  ;;  %v4013_v61 = vpack.c.bf16 %v2920_v59, %v2918_v50  ;;  %v2941_v50 = vld [vmem:[%s7625_s8 + $0x2b8] sm:$0xff] }
 0x3ac   :  { %4048 = vmatprep.subr.bf16.mxu1 %v4047_v51 }
 0x3ad   :  { %3998 = vmatpush1.bf16.msra.mxu0 %v3997_v29  ;;  %v3179_v29 = vld [vmem:[%s7626_s10 + $0xc0] sm:$0xff] }
 0x3ae   :  { %4000 = vmatprep.subr.bf16.mxu0 %v3999_v34  ;;  %v4051_v34 = vpack.c.bf16 %v3180_v9, %v3179_v29 }
 0x3af   :  { %4050 = vmatpush3.bf16.msra.mxu1 %v4049_v56 }
 0x3b0   :  { %4052 = vmatprep.subr.bf16.mxu1 %v4051_v34  ;;  %v2922_v34 = vld [vmem:[%s7625_s8 + $0x220] sm:$0xff] }
 0x3b1   :  { %4002 = vmatpush1.bf16.msra.mxu0 %v4001_v57  ;;  %v3181_v57 = vld [vmem:[%s7626_s10 + $0xd0] sm:$0xff] }
 0x3b2   :  { %4004 = vmatprep.subr.bf16.mxu0 %v4003_v36  ;;  %v4055_v36 = vpack.c.bf16 %v3182_v26, %v3181_v57  ;;  %v2927_v57 = vld [vmem:[%s7625_s8 + $0x248] sm:$0xff]  ;;  %v2929_v26 = vld [vmem:[%s7625_s8 + $0x258] sm:$0xff] }
 0x3b3   :  { %4054 = vmatpush3.bf16.msra.mxu1 %v4053_v7 }
 0x3b4   :  { %4056 = vmatprep.subr.bf16.mxu1 %v4055_v36 }
 0x3b5   :  { %4006 = vmatpush1.bf16.msra.mxu0 %v4005_v32  ;;  %v3183_v32 = vld [vmem:[%s7626_s10 + $0xe0] sm:$0xff] }
 0x3b6   :  { %4008 = vmatprep.subr.bf16.mxu0 %v4007_v38  ;;  %v4059_v38 = vpack.c.bf16 %v3184_v47, %v3183_v32 }
 0x3b7   :  { %4058 = vmatpush3.bf16.msra.mxu1 %v4057_v63 }
 0x3b8   :  { %4060 = vmatprep.subr.bf16.mxu1 %v4059_v38  ;;  %v4019_v38 = vpack.c.bf16 %v2929_v26, %v2927_v57 }
 0x3b9   :  { %4010 = vmatpush1.bf16.msra.mxu0 %v4009_v5  ;;  %v7473_v5 = vld [vmem:[%s7627_s7] sm:$0x7] }
 0x3ba   :  { %4012 = vmatprep.subr.bf16.mxu0 %v4011_v49  ;;  %v2818_v0 = vrot.slane %v7473_v5, %v7862_v28  ;;  %v2822_v55 = vrot.slane %v7473_v5, %v7861_v17 }
 0x3c8   :  { %v7362_v39 = vpop.f32.mrb[0].mxu1 }
 0x3c9   :  { %v7364_v16 = vpop.f32.mrb[1].mxu1 }
 0x3cc   :  { %v7366_v19 = vpop.f32.mrb[2].mxu1 }
 0x3cd   :  { %v7374_v21 = vpop.f32.mrb[3].mxu1 }
 0x3d0   :  { %v7376_v37 = vpop.f32.mrb[4].mxu1 }
 0x3d1   :  { %v7378_v24 = vpop.f32.mrb[5].mxu1 }
 0x3d4   :  { %v7380_v8 = vpop.f32.mrb[6].mxu1 }
 0x3d5   :  { %v7382_v41 = vpop.f32.mrb[7].mxu1 }
 0x3fc   :  { %v7384_v35 = vpop.f32.mrb[8].mxu1 }
 0x3fd   :  { %v2487_v23 = vpop.f32.mrb[9].mxu1 }
 0x400   :  { %v7395_v12 = vpop.f32.mrb[10].mxu1 }
 0x401   :  { %v2492_v62 = vpop.f32.mrb[11].mxu1 }
 0x404   :  { %v7418_v2 = vpop.f32.mrb[12].mxu1 }
 0x405   :  { %v2497_v1 = vpop.f32.mrb[13].mxu1 }
 0x408   :  { %v7432_v14 = vpop.f32.mrb[14].mxu1 }
 0x409   :  { %v2502_v46 = vpop.f32.mrb[15].mxu1 }
 0x430   :  { %v2648_v60 = vpop.f32.mrb[16].mxu1 }
 0x431   :  { %v2650_v40 = vpop.f32.mrb[17].mxu1  ;;  %v2768_v54 = vrot.slane %v2648_v60, 2  ;;  %v2926_v60 = vld [vmem:[%s7625_s8 + $0x240] sm:$0xff] }
 0x432   :  { %v2771_v44 = vrot.slane %v2650_v40, 2 }
 0x434   :  { %v2654_v13 = vpop.f32.mrb[18].mxu1 }
 0x435   :  { %v2769_v49 = vrot.slane %v2654_v13, 2  ;;  %v2656_v23 = vpop.f32.mrb[19].mxu1  ;;  %v2933_v13 = vld [vmem:[%s7625_s8 + $0x278] sm:$0xff] }
 0x436   :  { %v2772_v22 = vrot.slane %v2656_v23, 2 }
 0x437   :  { %v2770_v33 = vsel %vm1656_vm2, %v2768_v54, %v2769_v49 }
 0x438   :  { %v2801_v18 = vadd.f32 %v2770_v33, %v7362_v39  ;;  %v2773_v43 = vsel %vm1656_vm2, %v2771_v44, %v2772_v22  ;;  %v2660_v62 = vpop.f32.mrb[20].mxu1  ;;  %v2930_v33 = vld [vmem:[%s7625_s8 + $0x260] sm:$0xff] }
 0x439   :  { %v2802_v48 = vadd.f32 %v2773_v43, %v7364_v16  ;;  %v2777_v25 = vrot.slane %v2660_v62, 2  ;;  %v2662_v4 = vpop.f32.mrb[21].mxu1  ;;  %v2925_v16 = vld [vmem:[%s7625_s8 + $0x238] sm:$0xff]  ;;  %v2935_v43 = vld [vmem:[%s7625_s8 + $0x288] sm:$0xff] }
 0x43a   :  { %v2830_v11 = vadd.f32 %v2818_v0, %v2801_v18  ;;  %v2779_v31 = vrot.slane %v2662_v4, 2  ;;  %v4015_v56 = vpack.c.bf16 %v2925_v16, %v2923_v3  ;;  %v2934_v4 = vld [vmem:[%s7625_s8 + $0x280] sm:$0xff]  ;;  %v2940_v3 = vld [vmem:[%s7625_s8 + $0x2b0] sm:$0xff] }
 0x43b   :  { %v2778_v58 = vsel %vm1656_vm2, %v2769_v49, %v2777_v25  ;;  %v2831_v39 = vadd.f32 %v2822_v55, %v2802_v48 }
 0x43c   :  { %v2804_v42 = vadd.f32 %v2778_v58, %v7366_v19  ;;  %v2780_v1 = vsel %vm1656_vm2, %v2772_v22, %v2779_v31  ;;  %v2666_v52 = vpop.f32.mrb[22].mxu1  ;;  %v2842_v46 = vmax.f32 %v2830_v11, 0.0  ;;  %v2924_v19 = vld [vmem:[%s7625_s8 + $0x230] sm:$0xff] }
 0x43d   :  { %v2805_v20 = vadd.f32 %v2780_v1, %v7374_v21  ;;  %v2783_v30 = vrot.slane %v2666_v52, 2  ;;  %v2668_v51 = vpop.f32.mrb[23].mxu1  ;;  %v2843_v10 = vmax.f32 %v2831_v39, 0.0  ;;  %v4017_v32 = vpack.c.bf16 %v2924_v19, %v2922_v34  ;;  %v2936_v11 = vld [vmem:[%s7625_s8 + $0x290] sm:$0xff]  ;;  %v2938_v39 = vld [vmem:[%s7625_s8 + $0x2a0] sm:$0xff] }
 0x43e   :  { %v2785_v29 = vrot.slane %v2668_v51, 2  ;;  %v2833_v9 = vadd.f32 %v2818_v0, %v2804_v42  ;;  %v4029_v59 = vpack.c.bf16 %v2936_v11, %v2934_v4  ;;  %v4033_v16 = vpack.c.bf16 %v2940_v3, %v2938_v39  ;;  %v2943_v42 = vld [vmem:[%s7625_s8 + $0x2c8] sm:$0xff]  ;;  %v2942_v1 = vld [vmem:[%s7625_s8 + $0x2c0] sm:$0xff] }
 0x43f   :  { %v2784_v53 = vsel %vm1656_vm2, %v2777_v25, %v2783_v30  ;;  %v2810_v21 = vadd.f32 %v2783_v30, %v7380_v8  ;;  %3033 = vmatprep.mubr.f32.mxu0 %v2843_v10  ;;  %v2834_v6 = vadd.f32 %v2822_v55, %v2805_v20 }
 0x440   :  { %v2807_v7 = vadd.f32 %v2784_v53, %v7376_v37  ;;  %v2786_v36 = vsel %vm1656_vm2, %v2779_v31, %v2785_v29  ;;  %v2811_v27 = vadd.f32 %v2785_v29, %v7382_v41  ;;  %3034 = vmatmul.mubr.f32.vlgmr.msra.gmra.mrb[8].mxu0 %v2842_v46  ;;  %v2845_v47 = vmax.f32 %v2833_v9, 0.0  ;;  %v2928_v37 = vld [vmem:[%s7625_s8 + $0x250] sm:$0xff]  ;;  %v2939_v31 = vld [vmem:[%s7625_s8 + $0x2a8] sm:$0xff] }
 0x441   :  { %v2808_v15 = vadd.f32 %v2786_v36, %v7378_v24  ;;  %v2846_v8 = vmax.f32 %v2834_v6, 0.0  ;;  %4014 = vmatpush1.bf16.msra.mxu0 %v4013_v61  ;;  %v2931_v24 = vld [vmem:[%s7625_s8 + $0x268] sm:$0xff]  ;;  %v4021_v49 = vpack.c.bf16 %v2928_v37, %v2926_v60  ;;  %v2839_v44 = vadd.f32 %v2818_v0, %v2810_v21  ;;  %v7863_v46 = vld [vmem:[#allocation5_spill] sm:$0xff] }
 0x442   :  { %v2836_v63 = vadd.f32 %v2818_v0, %v2807_v7  ;;  %4016 = vmatprep.subr.bf16.mxu0 %v4015_v56  ;;  %v2840_v40 = vadd.f32 %v2822_v55, %v2811_v27  ;;  %v4023_v22 = vpack.c.bf16 %v2933_v13, %v2931_v24  ;;  %v2937_v0 = vld [vmem:[%s7625_s8 + $0x298] sm:$0xff]  ;;  %v4031_v58 = vpack.c.bf16 %v2941_v50, %v2939_v31  ;;  %v3185_v37 = vld [vmem:[%s7626_s10 + $0xf0] sm:$0xff] }
 0x443   :  { %3039 = vmatprep.mubr.f32.mxu0 %v2846_v8  ;;  %v2837_v41 = vadd.f32 %v2822_v55, %v2808_v15  ;;  %v2932_v55 = vld [vmem:[%s7625_s8 + $0x270] sm:$0xff]  ;;  %v2851_v48 = vmax.f32 %v2839_v44, 0.0  ;;  %v4027_v25 = vpack.c.bf16 %v2937_v0, %v2935_v43  ;;  %v2826_v29 = vrot.slane %v7473_v5, %v7863_v46  ;;  %v3170_v24 = vld [vmem:[%s7626_s10 + $0x78] sm:$0xff]  ;;  %v2944_v44 = vld [vmem:[%s7629_s9] sm:$0x3] }
 0x444   :  { %3040 = vmatmul.mubr.f32.gmra.mrb[10].mxu0 %v2845_v47  ;;  %v2848_v23 = vmax.f32 %v2836_v63, 0.0  ;;  %v2852_v18 = vmax.f32 %v2840_v40, 0.0  ;;  %v4025_v62 = vpack.c.bf16 %v2932_v55, %v2930_v33  ;;  %v3169_v40 = vld [vmem:[%s7626_s10 + $0x70] sm:$0xff]  ;;  %v2953_v33 = vrot.slane %v2944_v44, %v7861_v17 }
 0x445   :  { %v2849_v54 = vmax.f32 %v2837_v41, 0.0  ;;  %4018 = vmatpush1.bf16.msra.mxu0 %v4017_v32  ;;  %v4066_v13 = vpack.c.bf16 %v3170_v24, %v3169_v40 }
 0x446   :  { %4020 = vmatprep.subr.bf16.mxu0 %v4019_v38 }
 0x447   :  { %3045 = vmatprep.mubr.f32.mxu0 %v2849_v54  ;;  %v4112_v54 = vmov 0  }
 0x448   :  { %3046 = vmatmul.mubr.f32.gmra.mrb[12].mxu0 %v2848_v23  ;;  %4105 = vset.pattern.permute.xlu0 %v4112_v54 }
 0x449   :  { %3051 = vmatprep.mubr.f32.mxu0 %v2852_v18  ;;  %4022 = vmatpush1.bf16.msra.mxu0 %v4021_v49  ;;  %v17_v49 = vstv %s7628_s11 }
 0x44a   :  { %4024 = vmatprep.subr.bf16.mxu0 %v4023_v22  ;;  %18 = vst [vmem:[#allocation2] sm:$0x1] %v17_v49  ;;  %v2949_v22 = vrot.slane %v2944_v44, %v7862_v28 }
 0x44c   :  { %3052 = vmatmul.mubr.f32.gmra.mrb[14].mxu0 %v2851_v48 }
 0x44d   :  { %4026 = vmatpush1.bf16.msra.mxu0 %v4025_v62  ;;  %3122 = vmatprep.mubr.f32.mxu0 %v4108_v45 }
 0x44e   :  { %4028 = vmatprep.subr.bf16.mxu0 %v4027_v25 }
 0x451   :  { %4030 = vmatpush1.bf16.msra.mxu0 %v4029_v59  ;;  %v3555_v23 = vld [vmem:[#allocation2] ss:$0 sm:$0xff] }
 0x452   :  { %4032 = vmatprep.subr.bf16.mxu0 %v4031_v58  ;;  %3194 = vperm.xlu0 %4105, %v3555_v23  }
 0x455   :  { %4034 = vmatpush1.bf16.msra.mxu0 %v4033_v16 }
 0x456   :  { %3082 = vmatprep.subr.mxu0 %v2943_v42 }
 0x459   :  { %3083 = vmatpush1.msra.mxu0 %v2942_v1 }
 0x464   :  { %v2737_v52 = vpop.f32.mrb[24].mxu1 }
 0x465   :  { %v2739_v20 = vpop.f32.mrb[25].mxu1  ;;  %v2774_v51 = vrot.slane %v2737_v52, 2 }
 0x468   :  { %v2742_v30 = vpop.f32.mrb[26].mxu1 }
 0x469   :  { %v2775_v10 = vrot.slane %v2742_v30, 2  ;;  %v2744_v61 = vpop.f32.mrb[27].mxu1 }
 0x46b   :  { %v2776_v9 = vsel %vm1656_vm2, %v2774_v51, %v2775_v10 }
 0x46c   :  { %v2803_v56 = vadd.f32 %v2776_v9, %v7384_v35  ;;  %v2747_v34 = vpop.f32.mrb[28].mxu1 }
 0x46d   :  { %v2781_v19 = vrot.slane %v2747_v34, 2  ;;  %v2749_v53 = vpop.f32.mrb[29].mxu1 }
 0x46e   :  { %v2832_v21 = vadd.f32 %v2826_v29, %v2803_v56 }
 0x46f   :  { %v2782_v6 = vsel %vm1656_vm2, %v2775_v10, %v2781_v19 }
 0x470   :  { %v2844_v57 = vmax.f32 %v2832_v21, 0.0  ;;  %v2806_v26 = vadd.f32 %v2782_v6, %v7395_v12  ;;  %v2752_v7 = vpop.f32.mrb[30].mxu1 }
 0x471   :  { %v2787_v36 = vrot.slane %v2752_v7, 2  ;;  %v2754_v27 = vpop.f32.mrb[31].mxu1 }
 0x472   :  { %3551 = vmatmul.mubr.msk.f32.vlgmr.msra.gmra.mrb[8].mxu0 %vm2956_vm6, %v2844_v57  ;;  %v2835_v5 = vadd.f32 %v2826_v29, %v2806_v26 }
 0x473   :  { %v2788_v15 = vsel %vm1656_vm2, %v2781_v19, %v2787_v36  ;;  %v2812_v35 = vadd.f32 %v2787_v36, %v7432_v14  ;;  %3128 = vmatprep.mubr.f32.mxu0 %v4108_v45  ;;  %v3167_v14 = vld [vmem:[%s7626_s10 + $0x60] sm:$0xff] }
 0x474   :  { %v2809_v8 = vadd.f32 %v2788_v15, %v7418_v2  ;;  %v2847_v32 = vmax.f32 %v2835_v5, 0.0  ;;  %v3168_v2 = vld [vmem:[%s7626_s10 + $0x68] sm:$0xff] }
 0x475   :  { %v2841_v12 = vadd.f32 %v2826_v29, %v2812_v35  ;;  %v4061_v60 = vpack.c.bf16 %v3168_v2, %v3167_v14 }
 0x476   :  { %3552 = vmatmul.mubr.msk.f32.gmra.mrb[10].mxu0 %vm2956_vm6, %v2847_v32  ;;  %v2838_v47 = vadd.f32 %v2826_v29, %v2809_v8 }
 0x477   :  { %3134 = vmatprep.mubr.f32.mxu0 %v4108_v45  ;;  %v2853_v38 = vmax.f32 %v2841_v12, 0.0  ;;  %4062 = vmatpush3.bf16.msra.mxu1 %v4061_v60 }
 0x478   :  { %v2850_v63 = vmax.f32 %v2838_v47, 0.0 }
 0x47a   :  { %3553 = vmatmul.mubr.msk.f32.gmra.mrb[12].mxu0 %vm2956_vm6, %v2850_v63 }
 0x47b   :  { %3140 = vmatprep.mubr.f32.mxu0 %v4108_v45  ;;  %v3186_v45 = vld [vmem:[%s7626_s10 + $0xf8] sm:$0xf] }
 0x47c   :  { %v4063_v41 = vpack.c.bf16 %v3186_v45, %v3185_v37 }
 0x47e   :  { %3554 = vmatmul.mubr.msk.f32.gmra.mrb[14].mxu0 %vm2956_vm6, %v2853_v38  ;;  %4065 = vmatprep.subr.msk.bf16.mxu1 %vm4064_vm8, %v4063_v41 }
 0x47f   :  { %4067 = vmatpush3.bf16.msra.mxu1 %v4066_v13 }
 0x4d1   :  { %v3195_v46 = vpop.permute.xlu0 %3194 }
 0x545   :  { %v3124_v55 = vpop.f32.mrb[8].mxu0 }
 0x546   :  { %v4068_v18 = vadd.f32 %v3124_v55, %v2949_v22  ;;  %v3126_v43 = vpop.f32.mrb[9].mxu0 }
 0x547   :  { %v4069_v0 = vadd.f32 %v3126_v43, %v2953_v33 }
 0x548   :  { %v3147_v25 = vmax.f32 %v4068_v18, 0.0 }
 0x549   :  { %v3148_v62 = vmax.f32 %v4069_v0, 0.0  ;;  %v3130_v48 = vpop.f32.mrb[10].mxu0 }
 0x54a   :  { %v4070_v4 = vadd.f32 %v3130_v48, %v2949_v22  ;;  %v3132_v11 = vpop.f32.mrb[11].mxu0 }
 0x54b   :  { %v4071_v31 = vadd.f32 %v3132_v11, %v2953_v33  ;;  %3557 = vmatprep.mubr.msk.f32.mxu1 %vm3197_vm9, %v3148_v62 }
 0x54c   :  { %3278 = vmatmul.mubr.f32.vlgmr.msra.gmra.mrb[32].mxu1 %v3147_v25  ;;  %v3149_v58 = vmax.f32 %v4070_v4, 0.0 }
 0x54d   :  { %v3150_v50 = vmax.f32 %v4071_v31, 0.0  ;;  %v3136_v59 = vpop.f32.mrb[12].mxu0 }
 0x54e   :  { %v4072_v28 = vadd.f32 %v3136_v59, %v2949_v22  ;;  %v3138_v39 = vpop.f32.mrb[13].mxu0 }
 0x54f   :  { %v4073_v17 = vadd.f32 %v3138_v39, %v2953_v33  ;;  %3558 = vmatprep.mubr.msk.f32.mxu1 %vm3197_vm9, %v3150_v50 }
 0x550   :  { %3283 = vmatmul.mubr.f32.gmra.mrb[34].mxu1 %v3149_v58  ;;  %v3151_v42 = vmax.f32 %v4072_v28, 0.0 }
 0x551   :  { %v3152_v3 = vmax.f32 %v4073_v17, 0.0  ;;  %v3142_v16 = vpop.f32.mrb[14].mxu0 }
 0x552   :  { %v4074_v1 = vadd.f32 %v3142_v16, %v2949_v22  ;;  %v3144_v52 = vpop.f32.mrb[15].mxu0 }
 0x553   :  { %v4075_v20 = vadd.f32 %v3144_v52, %v2953_v33  ;;  %3559 = vmatprep.mubr.msk.f32.mxu1 %vm3197_vm9, %v3152_v3 }
 0x554   :  { %3288 = vmatmul.mubr.f32.gmra.mrb[36].mxu1 %v3151_v42  ;;  %v3153_v51 = vmax.f32 %v4074_v1, 0.0 }
 0x555   :  { %v3154_v30 = vmax.f32 %v4075_v20, 0.0 }
 0x557   :  { %3560 = vmatprep.mubr.msk.f32.mxu1 %vm3197_vm9, %v3154_v30 }
 0x558   :  { %3293 = vmatmul.mubr.f32.gmra.mrb[38].mxu1 %v3153_v51 }
 0x61f   :  { %v3593_v10 = vpop.f32.mrb[32].mxu1 }
 0x620   :  { %v3594_v61 = vpop.f32.mrb[33].mxu1 }
 0x621   :  { %v3595_v29 = vadd.f32 %v3594_v61, %v3593_v10 }
 0x623   :  { %v3280_v9 = vadd.f32 %v3595_v29, %v3195_v46  ;;  %v3596_v56 = vpop.f32.mrb[34].mxu1 }
 0x624   :  { %v3597_v34 = vpop.f32.mrb[35].mxu1 }
 0x625   :  { %v3299_v19 = vrot.slane %v3280_v9, 4  ;;  %v3598_v53 = vadd.f32 %v3597_v34, %v3596_v56 }
 0x627   :  { %v3310_v21 = vsel %vm3309_vm10, %v3280_v9, %v3299_v19  ;;  %v3285_v6 = vadd.f32 %v3598_v53, %v3195_v46  ;;  %v3599_v57 = vpop.f32.mrb[36].mxu1 }
 0x628   :  { %v3600_v26 = vpop.f32.mrb[37].mxu1 }
 0x629   :  { %v3312_v7 = vsel %vm3311_vm11, %v3310_v21, %v3285_v6  ;;  %v3601_v36 = vadd.f32 %v3600_v26, %v3599_v57 }
 0x62b   :  { %v3290_v27 = vadd.f32 %v3601_v36, %v3195_v46  ;;  %v3602_v5 = vpop.f32.mrb[38].mxu1 }
 0x62c   :  { %v3603_v15 = vpop.f32.mrb[39].mxu1 }
 0x62d   :  { %v3302_v35 = vrot.slane %v3290_v27, 5  ;;  %v3304_v8 = vrot.slane %v3290_v27, 1  ;;  %v3604_v32 = vadd.f32 %v3603_v15, %v3602_v5 }
 0x62f   :  { %v3314_v47 = vsel %vm3313_vm12, %v3312_v7, %v3302_v35  ;;  %v3295_v12 = vadd.f32 %v3604_v32, %v3195_v46 }
 0x630   :  { %v3315_v63 = vsel %vm1686_vm3, %v3314_v47, %v3304_v8 }
 0x631   :  { %v3307_v38 = vrot.slane %v3295_v12, 5 }
 0x633   :  { %v3316_v14 = vsel %vm1671_vm1, %v3315_v63, %v3307_v38 }
 0x634   :  { %3318 = vst.msk [vmem:[%s7630_s12] sm:$0x3f] %vm3317_vm13, %v3316_v14 }

</bundles_post_ra>
